<compile_context>
chip_gen: v6e
topology: v6e:2x2x1
jax: 0.10.0
libtpu: 0.0.40
codegen_flags: <defaults>
</compile_context>

<pallas_src>
import math

import jax
import jax.numpy as jnp
from jax.experimental import pallas as pl
from jax.experimental.pallas import tpu as pltpu

D_MODEL = 32
N_HEADS = 4
D_HEAD = D_MODEL // N_HEADS
D_FF = 64
EPS = 1e-6
NEG_INF = -1e9


# ----------------------------- fused Pallas kernel -----------------------------

def _decoder_layer_caption_kernel(
    x_ref, tf_ref, mem_ref,                         # per-batch activations
    tgt_add_ref, src_add_ref, tr_add_ref,           # per-batch additive masks
    wqkv_ref, bqkv_ref,                             # [5, D, 3D] / [5, 1, 3D] (Wq pre-scaled)
    wmkv_ref, bmkv_ref,                             # fused memory-KV [D, 4D] / [1, 4D]
    wo_ref, bo_ref,                                 # [5, D, D] / [5, 1, D]
    w1_ref, b1_ref, w2_ref, b2_ref,                 # caption FFN
    lng_ref, lnb_ref,                               # [6, 1, D] LayerNorm params
    o_ref,
):
    D = D_MODEL

    def layer_norm(z, idx):
        # torch LayerNorm variant: Bessel-corrected std, eps added to std.
        g = lng_ref[idx]                            # [1, D]
        b = lnb_ref[idx]                            # [1, D]
        mean = jnp.mean(z, axis=-1, keepdims=True)
        diff = z - mean
        var = jnp.sum(diff * diff, axis=-1, keepdims=True) * (1.0 / (D - 1))
        inv = pl.reciprocal(jnp.sqrt(var) + EPS, approx=True)   # EUP, not VALU divide
        return g * (diff * inv) + b

    def attend(idx, q2, k2, v2, mask_add):
        # q2: [Mq, D]; k2, v2: [Mk, D]; mask_add: [1 or Mq, Mk] additive (0 / -1e9)
        k2t = jnp.transpose(k2)                     # ONE transpose per module
        ctxs = []
        for h in range(N_HEADS):
            sl = slice(h * D_HEAD, (h + 1) * D_HEAD)
            s = jnp.dot(q2[:, sl], k2t[sl, :],
                        preferred_element_type=jnp.float32)      # [Mq, Mk]
            s = s + mask_add
            s = s - jnp.max(s, axis=-1, keepdims=True)
            p = jnp.exp(s)
            p = p * pl.reciprocal(jnp.sum(p, axis=-1, keepdims=True), approx=True)
            ctxs.append(jnp.dot(p, v2[:, sl],
                                preferred_element_type=jnp.float32))  # [Mq, dk]
        ctx = jnp.concatenate(ctxs, axis=-1)        # [Mq, D] lane concat
        # head merge = single [Mq,D] x [D,D] matmul
        return jnp.dot(ctx, wo_ref[idx], preferred_element_type=jnp.float32) + bo_ref[idx]

    def qkv_self(idx, z):
        qkv = jnp.dot(z, wqkv_ref[idx], preferred_element_type=jnp.float32) + bqkv_ref[idx]
        return qkv[:, :D], qkv[:, D:2 * D], qkv[:, 2 * D:]

    def q_only(idx, z):
        return (jnp.dot(z, wqkv_ref[idx][:, :D], preferred_element_type=jnp.float32)
                + bqkv_ref[idx][:, :D])

    x2 = x_ref[...]        # [Tq,  D] caption stream (batch dim squeezed by BlockSpec)
    tf2 = tf_ref[...]      # [Ttr, D] trace stream
    m2 = mem_ref[...]      # [Tm,  D] encoder memory

    tgt_add = tgt_add_ref[...]   # [Tq, Tq]
    src_add = src_add_ref[...]   # [1,  Tm]
    tr_add = tr_add_ref[...]     # [1,  Ttr]

    # fused KV projection of encoder memory for sublayers 1 & 3 (one 128-lane matmul)
    mem_kv = jnp.dot(m2, wmkv_ref[...], preferred_element_type=jnp.float32) + bmkv_ref[...]
    k_m1, v_m1 = mem_kv[:, :D], mem_kv[:, D:2 * D]
    k_m3, v_m3 = mem_kv[:, 2 * D:3 * D], mem_kv[:, 3 * D:]

    # TODO(synk): dropout in SublayerConnection omitted (eval mode / p = 0).
    # sublayer[0]: caption self-attention
    q, k, v = qkv_self(0, layer_norm(x2, 0))
    x2 = x2 + attend(0, q, k, v, tgt_add)
    # sublayer[1]: caption -> encoder-memory cross-attention
    x2 = x2 + attend(1, q_only(1, layer_norm(x2, 1)), k_m1, v_m1, src_add)
    # sublayer[2]: trace self-attention
    q, k, v = qkv_self(2, layer_norm(tf2, 2))
    tf2 = tf2 + attend(2, q, k, v, tr_add)
    # sublayer[3]: trace -> encoder-memory cross-attention
    tf2 = tf2 + attend(3, q_only(3, layer_norm(tf2, 3)), k_m3, v_m3, src_add)
    # sublayer[4]: caption -> trace cross-attention (KV from the updated trace)
    q4 = q_only(4, layer_norm(x2, 4))
    kv4 = (jnp.dot(tf2, wqkv_ref[4][:, D:], preferred_element_type=jnp.float32)
           + bqkv_ref[4][:, D:])
    x2 = x2 + attend(4, q4, kv4[:, :D], kv4[:, D:], tr_add)
    # sublayer[5]: position-wise feed-forward (caption branch), fused w1+ReLU+w2
    hid = jnp.dot(layer_norm(x2, 5), w1_ref[...],
                  preferred_element_type=jnp.float32) + b1_ref[...]
    hid = jnp.maximum(hid, 0.0)
    x2 = x2 + jnp.dot(hid, w2_ref[...], preferred_element_type=jnp.float32) + b2_ref[...]

    o_ref[...] = x2.astype(o_ref.dtype)


# ------------------------ one-time parameter packing --------------------------

def pack_params(params):
    """Done ONCE at parameter-load time (hoisted out of the per-call path)."""
    scale = 1.0 / math.sqrt(D_HEAD)
    order = ["self_attn", "src_attn", "trace_self_attn", "trace_src_attn",
             "caption_trace_attn"]
    wqkv, bqkv, wo, bo = [], [], [], []
    for n in order:
        p = params[n]
        wqkv.append(jnp.concatenate([p["wq"] * scale, p["wk"], p["wv"]], axis=1))
        bqkv.append(jnp.concatenate([p["bq"] * scale, p["bk"], p["bv"]])[None, :])
        wo.append(p["wo"])
        bo.append(p["bo"][None, :])
    sa, ta = params["src_attn"], params["trace_src_attn"]
    packed = {
        "wqkv": jnp.stack(wqkv),                                   # [5, D, 3D]
        "bqkv": jnp.stack(bqkv),                                   # [5, 1, 3D]
        "wo": jnp.stack(wo),                                       # [5, D, D]
        "bo": jnp.stack(bo),                                       # [5, 1, D]
        # fused [D, 4D] = [32, 128] KV projection of encoder memory (modules 1 & 3)
        "w_memkv": jnp.concatenate([sa["wk"], sa["wv"], ta["wk"], ta["wv"]], axis=1),
        "b_memkv": jnp.concatenate([sa["bk"], sa["bv"], ta["bk"], ta["bv"]])[None, :],
        "w1": params["ffn_w1"], "b1": params["ffn_b1"][None, :],
        "w2": params["ffn_w2"], "b2": params["ffn_b2"][None, :],
        "lng": jnp.stack([params[f"ln{i}_g"][None, :] for i in range(6)]),  # [6,1,D]
        "lnb": jnp.stack([params[f"ln{i}_b"][None, :] for i in range(6)]),  # [6,1,D]
    }
    return packed


# --------------------------------- wrapper ----------------------------------

@jax.jit
def decoder_layer_caption(packed, x, trace_feat, memory, src_mask, tgt_mask,
                          trace_masks):
    """DecoderLayer.forward(..., task='caption'); dropout = identity (eval)."""
    B, Tq, D = x.shape
    Ttr = trace_feat.shape[1]
    Tm = memory.shape[1]

    # tiny additive masks (0 where attended, -1e9 where masked), built once per call
    tgt_add = jnp.where(tgt_mask == 0, NEG_INF, 0.0).astype(jnp.float32)          # [B,Tq,Tq]
    src_add = jnp.where(src_mask == 0, NEG_INF, 0.0).astype(jnp.float32)           # [B,1,Tm]
    # the module does trace_masks.unsqueeze(1) inside the caption branch
    tr_add = jnp.where(trace_masks[:, None, :] == 0, NEG_INF, 0.0).astype(jnp.float32)  # [B,1,Ttr]

    out = pl.pallas_call(
        _decoder_layer_caption_kernel,
        out_shape=jax.ShapeDtypeStruct((B, Tq, D), jnp.float32),
        grid_spec=pltpu.PrefetchScalarGridSpec(
            num_scalar_prefetch=0,
            grid=(B,),
            in_specs=[
                pl.BlockSpec((None, Tq, D), lambda b: (b, 0, 0)),     # x
                pl.BlockSpec((None, Ttr, D), lambda b: (b, 0, 0)),    # trace_feat
                pl.BlockSpec((None, Tm, D), lambda b: (b, 0, 0)),     # memory
                pl.BlockSpec((None, Tq, Tq), lambda b: (b, 0, 0)),    # tgt additive mask
                pl.BlockSpec((None, 1, Tm), lambda b: (b, 0, 0)),     # src additive mask
                pl.BlockSpec((None, 1, Ttr), lambda b: (b, 0, 0)),    # trace additive mask
                pl.BlockSpec((5, D, 3 * D), lambda b: (0, 0, 0)),     # wqkv
                pl.BlockSpec((5, 1, 3 * D), lambda b: (0, 0, 0)),     # bqkv
                pl.BlockSpec((D, 4 * D), lambda b: (0, 0)),           # w_memkv
                pl.BlockSpec((1, 4 * D), lambda b: (0, 0)),           # b_memkv
                pl.BlockSpec((5, D, D), lambda b: (0, 0, 0)),         # wo
                pl.BlockSpec((5, 1, D), lambda b: (0, 0, 0)),         # bo
                pl.BlockSpec((D, D_FF), lambda b: (0, 0)),            # w1
                pl.BlockSpec((1, D_FF), lambda b: (0, 0)),            # b1
                pl.BlockSpec((D_FF, D), lambda b: (0, 0)),            # w2
                pl.BlockSpec((1, D), lambda b: (0, 0)),               # b2
                pl.BlockSpec((6, 1, D), lambda b: (0, 0, 0)),         # lng
                pl.BlockSpec((6, 1, D), lambda b: (0, 0, 0)),         # lnb
            ],
            out_specs=pl.BlockSpec((None, Tq, D), lambda b: (b, 0, 0)),
        ),
        compiler_params=pltpu.CompilerParams(
            dimension_semantics=("parallel",),
        ),
    )(
        x, trace_feat, memory, tgt_add, src_add, tr_add,
        packed["wqkv"], packed["bqkv"], packed["w_memkv"], packed["b_memkv"],
        packed["wo"], packed["bo"],
        packed["w1"], packed["b1"], packed["w2"], packed["b2"],
        packed["lng"], packed["lnb"],
    )
    return out


def decoder_layer_forward(packed, x, trace_feat, memory, src_mask, tgt_mask,
                          trace_masks, task="caption"):
    if task != "caption":
        # TODO(synk): 'trace'/'cycle_trace'/'both' branches need the
        # feed_forward_trace / both_* injected modules; only 'caption' is done.
        raise NotImplementedError("only task='caption' is implemented")
    return decoder_layer_caption(packed, x, trace_feat, memory, src_mask,
                                 tgt_mask, trace_masks)


# ----------------------------- pure-JAX reference ----------------------------

def _layer_norm_ref(z, g, b):
    mean = z.mean(-1, keepdims=True)
    var = jnp.sum((z - mean) ** 2, axis=-1, keepdims=True) / (z.shape[-1] - 1)
    return g * (z - mean) / (jnp.sqrt(var) + EPS) + b


def _mha_ref(p, q, k, v, mask):
    B, Tq, D = q.shape
    Tk = k.shape[1]
    hi = jax.lax.Precision.HIGHEST

    def proj(z, w, b):
        return jnp.einsum("btd,de->bte", z, w, precision=hi) + b

    qh = proj(q, p["wq"], p["bq"]).reshape(B, Tq, N_HEADS, D_HEAD).transpose(0, 2, 1, 3)
    kh = proj(k, p["wk"], p["bk"]).reshape(B, Tk, N_HEADS, D_HEAD).transpose(0, 2, 1, 3)
    vh = proj(v, p["wv"], p["bv"]).reshape(B, Tk, N_HEADS, D_HEAD).transpose(0, 2, 1, 3)
    s = jnp.einsum("bhqd,bhkd->bhqk", qh, kh, precision=hi) / math.sqrt(D_HEAD)
    s = jnp.where(mask[:, None, :, :] == 0, NEG_INF, s)
    a = jax.nn.softmax(s, axis=-1)
    o = jnp.einsum("bhqk,bhkd->bhqd", a, vh, precision=hi)
    o = o.transpose(0, 2, 1, 3).reshape(B, Tq, D)
    return jnp.einsum("btd,de->bte", o, p["wo"], precision=hi) + p["bo"]


def decoder_layer_caption_ref(params, x, trace_feat, memory, src_mask, tgt_mask,
                              trace_masks):
    hi = jax.lax.Precision.HIGHEST

    def subl(z, i, fn):
        return z + fn(_layer_norm_ref(z, params[f"ln{i}_g"], params[f"ln{i}_b"]))

    m = memory
    x = subl(x, 0, lambda z: _mha_ref(params["self_attn"], z, z, z, tgt_mask))
    x = subl(x, 1, lambda z: _mha_ref(params["src_attn"], z, m, m, src_mask))
    tm = trace_masks[:, None, :]
    tf = trace_feat
    tf = subl(tf, 2, lambda z: _mha_ref(params["trace_self_attn"], z, z, z, tm))
    tf = subl(tf, 3, lambda z: _mha_ref(params["trace_src_attn"], z, m, m, src_mask))
    x = subl(x, 4, lambda z: _mha_ref(params["caption_trace_attn"], z, tf, tf, tm))

    def ffn(z):
        hid = jnp.maximum(
            jnp.einsum("btd,df->btf", z, params["ffn_w1"], precision=hi)
            + params["ffn_b1"], 0.0)
        return jnp.einsum("btf,fd->btd", hid, params["ffn_w2"], precision=hi) \
            + params["ffn_b2"]

    x = subl(x, 5, ffn)
    return x


# -------------------------------- param init ---------------------------------

def init_params(key):
    def w(k, din, dout):
        return jax.random.normal(k, (din, dout), jnp.float32) * 0.02

    def b(k, n):
        return jax.random.normal(k, (n,), jnp.float32) * 0.02

    def attn(k):
        ks = jax.random.split(k, 8)
        return {"wq": w(ks[0], D_MODEL, D_MODEL), "bq": b(ks[1], D_MODEL),
                "wk": w(ks[2], D_MODEL, D_MODEL), "bk": b(ks[3], D_MODEL),
                "wv": w(ks[4], D_MODEL, D_MODEL), "bv": b(ks[5], D_MODEL),
                "wo": w(ks[6], D_MODEL, D_MODEL), "bo": b(ks[7], D_MODEL)}

    keys = jax.random.split(key, 10)
    params = {
        "self_attn": attn(keys[0]),
        "src_attn": attn(keys[1]),
        "trace_self_attn": attn(keys[2]),
        "trace_src_attn": attn(keys[3]),
        "caption_trace_attn": attn(keys[4]),
        "ffn_w1": w(keys[5], D_MODEL, D_FF), "ffn_b1": b(keys[6], D_FF),
        "ffn_w2": w(keys[7], D_FF, D_MODEL), "ffn_b2": b(keys[8], D_MODEL),
    }
    ln_keys = jax.random.split(keys[9], 12)
    for i in range(6):
        params[f"ln{i}_g"] = 1.0 + 0.05 * jax.random.normal(
            ln_keys[2 * i], (D_MODEL,), jnp.float32)
        params[f"ln{i}_b"] = 0.05 * jax.random.normal(
            ln_keys[2 * i + 1], (D_MODEL,), jnp.float32)
    return params


# ----------------------------------- main ------------------------------------

if __name__ == "__main__":
    key = jax.random.PRNGKey(0)
    kx, ktf, km, kp = jax.random.split(key, 4)

    B, Tq, Ttr, Tm = 2, 8, 8, 16
    x = jax.random.normal(kx, (B, Tq, D_MODEL), jnp.float32)        # embedded caption tokens
    trace_feat = jax.random.normal(ktf, (B, Ttr, D_MODEL), jnp.float32)
    memory = jax.random.normal(km, (B, Tm, D_MODEL), jnp.float32)   # encoder memory

    tgt_mask = jnp.broadcast_to(jnp.tril(jnp.ones((Tq, Tq), jnp.float32)), (B, Tq, Tq))
    src_mask = jnp.ones((B, 1, Tm), jnp.float32).at[0, 0, Tm - 3:].set(0.0)
    trace_masks = jnp.ones((B, Ttr), jnp.float32).at[1, Ttr - 2:].set(0.0)

    params = init_params(kp)
    packed = pack_params(params)          # one-time packing (not per forward call)

    out = decoder_layer_forward(packed, x, trace_feat, memory, src_mask, tgt_mask,
                                trace_masks, task="caption")
    out = jax.block_until_ready(out)

    ref = decoder_layer_caption_ref(params, x, trace_feat, memory, src_mask,
                                    tgt_mask, trace_masks)
    ref = jax.block_until_ready(ref)

    assert out.shape == (B, Tq, D_MODEL) and out.dtype == jnp.float32
    assert bool(jnp.all(jnp.isfinite(out)))
    max_err = float(jnp.max(jnp.abs(out - ref)))
    # slightly relaxed tolerance for pl.reciprocal(approx=True) in softmax/LayerNorm
    assert max_err < 3e-3, f"max abs diff {max_err}"
    print("KERNEL_OK")
</pallas_src>

<mosaic_0001>
module attributes {stable_mosaic.version = 11 : i64} {
  func.func @_decoder_layer_caption_kernel(%arg0: i32, %arg1: memref<1x8x32xf32, #tpu.memory_space<vmem>>, %arg2: memref<1x8x32xf32, #tpu.memory_space<vmem>>, %arg3: memref<1x16x32xf32, #tpu.memory_space<vmem>>, %arg4: memref<1x8x8xf32, #tpu.memory_space<vmem>>, %arg5: memref<1x1x16xf32, #tpu.memory_space<vmem>>, %arg6: memref<1x1x8xf32, #tpu.memory_space<vmem>>, %arg7: memref<5x32x96xf32, #tpu.memory_space<vmem>>, %arg8: memref<5x1x96xf32, #tpu.memory_space<vmem>>, %arg9: memref<32x128xf32, #tpu.memory_space<vmem>>, %arg10: memref<1x128xf32, #tpu.memory_space<vmem>>, %arg11: memref<5x32x32xf32, #tpu.memory_space<vmem>>, %arg12: memref<5x1x32xf32, #tpu.memory_space<vmem>>, %arg13: memref<32x64xf32, #tpu.memory_space<vmem>>, %arg14: memref<1x64xf32, #tpu.memory_space<vmem>>, %arg15: memref<64x32xf32, #tpu.memory_space<vmem>>, %arg16: memref<1x32xf32, #tpu.memory_space<vmem>>, %arg17: memref<6x1x32xf32, #tpu.memory_space<vmem>>, %arg18: memref<6x1x32xf32, #tpu.memory_space<vmem>>, %arg19: memref<1x8x32xf32, #tpu.memory_space<vmem>>) attributes {dimension_semantics = [#tpu.dimension_semantics<parallel>], iteration_bounds = array<i64: 2>, scalar_prefetch = 0 : i64, scratch_operands = 0 : i64, tpu.core_type = #tpu.core_type<tc>, window_params = [{transform_indices = @transform_0, window_bounds = array<i64: 1, 8, 32>}, {transform_indices = @transform_1, window_bounds = array<i64: 1, 8, 32>}, {transform_indices = @transform_2, window_bounds = array<i64: 1, 16, 32>}, {transform_indices = @transform_3, window_bounds = array<i64: 1, 8, 8>}, {transform_indices = @transform_4, window_bounds = array<i64: 1, 1, 16>}, {transform_indices = @transform_5, window_bounds = array<i64: 1, 1, 8>}, {pipeline_mode = #tpu.pipeline_mode<synchronous>, transform_indices = @transform_6, window_bounds = array<i64: 5, 32, 96>}, {pipeline_mode = #tpu.pipeline_mode<synchronous>, transform_indices = @transform_7, window_bounds = array<i64: 5, 1, 96>}, {pipeline_mode = #tpu.pipeline_mode<synchronous>, transform_indices = @transform_8, window_bounds = array<i64: 32, 128>}, {pipeline_mode = #tpu.pipeline_mode<synchronous>, transform_indices = @transform_9, window_bounds = array<i64: 1, 128>}, {pipeline_mode = #tpu.pipeline_mode<synchronous>, transform_indices = @transform_10, window_bounds = array<i64: 5, 32, 32>}, {pipeline_mode = #tpu.pipeline_mode<synchronous>, transform_indices = @transform_11, window_bounds = array<i64: 5, 1, 32>}, {pipeline_mode = #tpu.pipeline_mode<synchronous>, transform_indices = @transform_12, window_bounds = array<i64: 32, 64>}, {pipeline_mode = #tpu.pipeline_mode<synchronous>, transform_indices = @transform_13, window_bounds = array<i64: 1, 64>}, {pipeline_mode = #tpu.pipeline_mode<synchronous>, transform_indices = @transform_14, window_bounds = array<i64: 64, 32>}, {pipeline_mode = #tpu.pipeline_mode<synchronous>, transform_indices = @transform_15, window_bounds = array<i64: 1, 32>}, {pipeline_mode = #tpu.pipeline_mode<synchronous>, transform_indices = @transform_16, window_bounds = array<i64: 6, 1, 32>}, {pipeline_mode = #tpu.pipeline_mode<synchronous>, transform_indices = @transform_17, window_bounds = array<i64: 6, 1, 32>}, {transform_indices = @transform_18, window_bounds = array<i64: 1, 8, 32>}]} {
    %c0 = arith.constant 0 : index
    %c0_0 = arith.constant 0 : index
    %c0_1 = arith.constant 0 : index
    %0 = vector.load %arg1[%c0, %c0_0, %c0_1] : memref<1x8x32xf32, #tpu.memory_space<vmem>>, vector<1x8x32xf32>
    %1 = vector.shape_cast %0 : vector<1x8x32xf32> to vector<8x32xf32>
    %c0_2 = arith.constant 0 : index
    %c0_3 = arith.constant 0 : index
    %c0_4 = arith.constant 0 : index
    %2 = vector.load %arg2[%c0_2, %c0_3, %c0_4] : memref<1x8x32xf32, #tpu.memory_space<vmem>>, vector<1x8x32xf32>
    %3 = vector.shape_cast %2 : vector<1x8x32xf32> to vector<8x32xf32>
    %c0_5 = arith.constant 0 : index
    %c0_6 = arith.constant 0 : index
    %c0_7 = arith.constant 0 : index
    %4 = vector.load %arg3[%c0_5, %c0_6, %c0_7] : memref<1x16x32xf32, #tpu.memory_space<vmem>>, vector<1x16x32xf32>
    %5 = vector.shape_cast %4 : vector<1x16x32xf32> to vector<16x32xf32>
    %c0_8 = arith.constant 0 : index
    %c0_9 = arith.constant 0 : index
    %c0_10 = arith.constant 0 : index
    %6 = vector.load %arg4[%c0_8, %c0_9, %c0_10] : memref<1x8x8xf32, #tpu.memory_space<vmem>>, vector<1x8x8xf32>
    %7 = vector.shape_cast %6 : vector<1x8x8xf32> to vector<8x8xf32>
    %c0_11 = arith.constant 0 : index
    %c0_12 = arith.constant 0 : index
    %c0_13 = arith.constant 0 : index
    %8 = vector.load %arg5[%c0_11, %c0_12, %c0_13] : memref<1x1x16xf32, #tpu.memory_space<vmem>>, vector<1x1x16xf32>
    %9 = vector.shape_cast %8 : vector<1x1x16xf32> to vector<1x16xf32>
    %c0_14 = arith.constant 0 : index
    %c0_15 = arith.constant 0 : index
    %c0_16 = arith.constant 0 : index
    %10 = vector.load %arg6[%c0_14, %c0_15, %c0_16] : memref<1x1x8xf32, #tpu.memory_space<vmem>>, vector<1x1x8xf32>
    %11 = vector.shape_cast %10 : vector<1x1x8xf32> to vector<1x8xf32>
    %c0_17 = arith.constant 0 : index
    %c0_18 = arith.constant 0 : index
    %12 = vector.load %arg9[%c0_17, %c0_18] : memref<32x128xf32, #tpu.memory_space<vmem>>, vector<32x128xf32>
    %cst = arith.constant dense<0.000000e+00> : vector<16x128xf32>
    %13 = tpu.matmul %5, %12, %cst {dimension_numbers = #tpu.dot_dimension_numbers<[1], [0], [0], [1], [0, 0, 1, 1], [], []>} : vector<16x32xf32>, vector<32x128xf32>, vector<16x128xf32> -> vector<16x128xf32>
    %c0_19 = arith.constant 0 : index
    %c0_20 = arith.constant 0 : index
    %14 = vector.load %arg10[%c0_19, %c0_20] : memref<1x128xf32, #tpu.memory_space<vmem>>, vector<1x128xf32>
    %15 = vector.broadcast %14 : vector<1x128xf32> to vector<16x128xf32>
    %16 = arith.addf %13, %15 : vector<16x128xf32>
    %17 = vector.extract_strided_slice %16 {offsets = [0, 0], sizes = [16, 32], strides = [1, 1]} : vector<16x128xf32> to vector<16x32xf32>
    %18 = vector.extract_strided_slice %16 {offsets = [0, 32], sizes = [16, 32], strides = [1, 1]} : vector<16x128xf32> to vector<16x32xf32>
    %19 = vector.extract_strided_slice %16 {offsets = [0, 64], sizes = [16, 32], strides = [1, 1]} : vector<16x128xf32> to vector<16x32xf32>
    %20 = vector.extract_strided_slice %16 {offsets = [0, 96], sizes = [16, 32], strides = [1, 1]} : vector<16x128xf32> to vector<16x32xf32>
    %c0_21 = arith.constant 0 : index
    %c0_22 = arith.constant 0 : index
    %c0_23 = arith.constant 0 : index
    %21 = vector.load %arg17[%c0_21, %c0_22, %c0_23] : memref<6x1x32xf32, #tpu.memory_space<vmem>>, vector<1x1x32xf32>
    %22 = vector.shape_cast %21 : vector<1x1x32xf32> to vector<1x32xf32>
    %c0_24 = arith.constant 0 : index
    %c0_25 = arith.constant 0 : index
    %c0_26 = arith.constant 0 : index
    %23 = vector.load %arg18[%c0_24, %c0_25, %c0_26] : memref<6x1x32xf32, #tpu.memory_space<vmem>>, vector<1x1x32xf32>
    %24 = vector.shape_cast %23 : vector<1x1x32xf32> to vector<1x32xf32>
    %cst_27 = arith.constant dense<0.000000e+00> : vector<8xf32>
    %25 = vector.multi_reduction <add>, %1, %cst_27 [1] : vector<8x32xf32> to vector<8xf32>
    %26 = vector.shape_cast %25 : vector<8xf32> to vector<8x1xf32>
    %cst_28 = arith.constant 3.200000e+01 : f32
    %27 = vector.broadcast %cst_28 : f32 to vector<8x1xf32>
    %28 = arith.divf %26, %27 : vector<8x1xf32>
    %29 = vector.broadcast %28 : vector<8x1xf32> to vector<8x32xf32>
    %30 = arith.subf %1, %29 : vector<8x32xf32>
    %31 = arith.mulf %30, %30 : vector<8x32xf32>
    %cst_29 = arith.constant dense<0.000000e+00> : vector<8xf32>
    %32 = vector.multi_reduction <add>, %31, %cst_29 [1] : vector<8x32xf32> to vector<8xf32>
    %33 = vector.shape_cast %32 : vector<8xf32> to vector<8x1xf32>
    %cst_30 = arith.constant 0.0322580636 : f32
    %34 = vector.broadcast %cst_30 : f32 to vector<8x1xf32>
    %35 = arith.mulf %33, %34 : vector<8x1xf32>
    %36 = math.sqrt %35 : vector<8x1xf32>
    %cst_31 = arith.constant 9.99999997E-7 : f32
    %37 = vector.broadcast %cst_31 : f32 to vector<8x1xf32>
    %38 = arith.addf %36, %37 : vector<8x1xf32>
    %39 = tpu.reciprocal %38 {approx = true} : vector<8x1xf32> -> vector<8x1xf32>
    %40 = vector.broadcast %39 : vector<8x1xf32> to vector<8x32xf32>
    %41 = arith.mulf %30, %40 : vector<8x32xf32>
    %42 = vector.broadcast %22 : vector<1x32xf32> to vector<8x32xf32>
    %43 = arith.mulf %42, %41 : vector<8x32xf32>
    %44 = vector.broadcast %24 : vector<1x32xf32> to vector<8x32xf32>
    %45 = arith.addf %43, %44 : vector<8x32xf32>
    %c0_32 = arith.constant 0 : index
    %c0_33 = arith.constant 0 : index
    %c0_34 = arith.constant 0 : index
    %46 = vector.load %arg7[%c0_32, %c0_33, %c0_34] : memref<5x32x96xf32, #tpu.memory_space<vmem>>, vector<1x32x96xf32>
    %47 = vector.shape_cast %46 : vector<1x32x96xf32> to vector<32x96xf32>
    %cst_35 = arith.constant dense<0.000000e+00> : vector<8x96xf32>
    %48 = tpu.matmul %45, %47, %cst_35 {dimension_numbers = #tpu.dot_dimension_numbers<[1], [0], [0], [1], [0, 0, 1, 1], [], []>} : vector<8x32xf32>, vector<32x96xf32>, vector<8x96xf32> -> vector<8x96xf32>
    %c0_36 = arith.constant 0 : index
    %c0_37 = arith.constant 0 : index
    %c0_38 = arith.constant 0 : index
    %49 = vector.load %arg8[%c0_36, %c0_37, %c0_38] : memref<5x1x96xf32, #tpu.memory_space<vmem>>, vector<1x1x96xf32>
    %50 = vector.shape_cast %49 : vector<1x1x96xf32> to vector<1x96xf32>
    %51 = vector.broadcast %50 : vector<1x96xf32> to vector<8x96xf32>
    %52 = arith.addf %48, %51 : vector<8x96xf32>
    %53 = vector.extract_strided_slice %52 {offsets = [0, 0], sizes = [8, 32], strides = [1, 1]} : vector<8x96xf32> to vector<8x32xf32>
    %54 = vector.extract_strided_slice %52 {offsets = [0, 32], sizes = [8, 32], strides = [1, 1]} : vector<8x96xf32> to vector<8x32xf32>
    %55 = vector.extract_strided_slice %52 {offsets = [0, 64], sizes = [8, 32], strides = [1, 1]} : vector<8x96xf32> to vector<8x32xf32>
    %56 = tpu.transpose %54, [1, 0] : vector<8x32xf32> -> vector<32x8xf32>
    %57 = vector.extract_strided_slice %53 {offsets = [0, 0], sizes = [8, 8], strides = [1, 1]} : vector<8x32xf32> to vector<8x8xf32>
    %58 = vector.extract_strided_slice %56 {offsets = [0, 0], sizes = [8, 8], strides = [1, 1]} : vector<32x8xf32> to vector<8x8xf32>
    %cst_39 = arith.constant dense<0.000000e+00> : vector<8x8xf32>
    %59 = tpu.matmul %57, %58, %cst_39 {dimension_numbers = #tpu.dot_dimension_numbers<[1], [0], [0], [1], [0, 0, 1, 1], [], []>} : vector<8x8xf32>, vector<8x8xf32>, vector<8x8xf32> -> vector<8x8xf32>
    %60 = arith.addf %59, %7 : vector<8x8xf32>
    %cst_40 = arith.constant dense<0xFF800000> : vector<8xf32>
    %61 = vector.multi_reduction <maximumf>, %60, %cst_40 [1] : vector<8x8xf32> to vector<8xf32>
    %62 = vector.shape_cast %61 : vector<8xf32> to vector<8x1xf32>
    %63 = vector.broadcast %62 : vector<8x1xf32> to vector<8x8xf32>
    %64 = arith.subf %60, %63 : vector<8x8xf32>
    %65 = math.exp %64 : vector<8x8xf32>
    %cst_41 = arith.constant dense<0.000000e+00> : vector<8xf32>
    %66 = vector.multi_reduction <add>, %65, %cst_41 [1] : vector<8x8xf32> to vector<8xf32>
    %67 = vector.shape_cast %66 : vector<8xf32> to vector<8x1xf32>
    %68 = tpu.reciprocal %67 {approx = true} : vector<8x1xf32> -> vector<8x1xf32>
    %69 = vector.broadcast %68 : vector<8x1xf32> to vector<8x8xf32>
    %70 = arith.mulf %65, %69 : vector<8x8xf32>
    %71 = vector.extract_strided_slice %55 {offsets = [0, 0], sizes = [8, 8], strides = [1, 1]} : vector<8x32xf32> to vector<8x8xf32>
    %cst_42 = arith.constant dense<0.000000e+00> : vector<8x8xf32>
    %72 = tpu.matmul %70, %71, %cst_42 {dimension_numbers = #tpu.dot_dimension_numbers<[1], [0], [0], [1], [0, 0, 1, 1], [], []>} : vector<8x8xf32>, vector<8x8xf32>, vector<8x8xf32> -> vector<8x8xf32>
    %73 = vector.extract_strided_slice %53 {offsets = [0, 8], sizes = [8, 8], strides = [1, 1]} : vector<8x32xf32> to vector<8x8xf32>
    %74 = vector.extract_strided_slice %56 {offsets = [8, 0], sizes = [8, 8], strides = [1, 1]} : vector<32x8xf32> to vector<8x8xf32>
    %cst_43 = arith.constant dense<0.000000e+00> : vector<8x8xf32>
    %75 = tpu.matmul %73, %74, %cst_43 {dimension_numbers = #tpu.dot_dimension_numbers<[1], [0], [0], [1], [0, 0, 1, 1], [], []>} : vector<8x8xf32>, vector<8x8xf32>, vector<8x8xf32> -> vector<8x8xf32>
    %76 = arith.addf %75, %7 : vector<8x8xf32>
    %cst_44 = arith.constant dense<0xFF800000> : vector<8xf32>
    %77 = vector.multi_reduction <maximumf>, %76, %cst_44 [1] : vector<8x8xf32> to vector<8xf32>
    %78 = vector.shape_cast %77 : vector<8xf32> to vector<8x1xf32>
    %79 = vector.broadcast %78 : vector<8x1xf32> to vector<8x8xf32>
    %80 = arith.subf %76, %79 : vector<8x8xf32>
    %81 = math.exp %80 : vector<8x8xf32>
    %cst_45 = arith.constant dense<0.000000e+00> : vector<8xf32>
    %82 = vector.multi_reduction <add>, %81, %cst_45 [1] : vector<8x8xf32> to vector<8xf32>
    %83 = vector.shape_cast %82 : vector<8xf32> to vector<8x1xf32>
    %84 = tpu.reciprocal %83 {approx = true} : vector<8x1xf32> -> vector<8x1xf32>
    %85 = vector.broadcast %84 : vector<8x1xf32> to vector<8x8xf32>
    %86 = arith.mulf %81, %85 : vector<8x8xf32>
    %87 = vector.extract_strided_slice %55 {offsets = [0, 8], sizes = [8, 8], strides = [1, 1]} : vector<8x32xf32> to vector<8x8xf32>
    %cst_46 = arith.constant dense<0.000000e+00> : vector<8x8xf32>
    %88 = tpu.matmul %86, %87, %cst_46 {dimension_numbers = #tpu.dot_dimension_numbers<[1], [0], [0], [1], [0, 0, 1, 1], [], []>} : vector<8x8xf32>, vector<8x8xf32>, vector<8x8xf32> -> vector<8x8xf32>
    %89 = vector.extract_strided_slice %53 {offsets = [0, 16], sizes = [8, 8], strides = [1, 1]} : vector<8x32xf32> to vector<8x8xf32>
    %90 = vector.extract_strided_slice %56 {offsets = [16, 0], sizes = [8, 8], strides = [1, 1]} : vector<32x8xf32> to vector<8x8xf32>
    %cst_47 = arith.constant dense<0.000000e+00> : vector<8x8xf32>
    %91 = tpu.matmul %89, %90, %cst_47 {dimension_numbers = #tpu.dot_dimension_numbers<[1], [0], [0], [1], [0, 0, 1, 1], [], []>} : vector<8x8xf32>, vector<8x8xf32>, vector<8x8xf32> -> vector<8x8xf32>
    %92 = arith.addf %91, %7 : vector<8x8xf32>
    %cst_48 = arith.constant dense<0xFF800000> : vector<8xf32>
    %93 = vector.multi_reduction <maximumf>, %92, %cst_48 [1] : vector<8x8xf32> to vector<8xf32>
    %94 = vector.shape_cast %93 : vector<8xf32> to vector<8x1xf32>
    %95 = vector.broadcast %94 : vector<8x1xf32> to vector<8x8xf32>
    %96 = arith.subf %92, %95 : vector<8x8xf32>
    %97 = math.exp %96 : vector<8x8xf32>
    %cst_49 = arith.constant dense<0.000000e+00> : vector<8xf32>
    %98 = vector.multi_reduction <add>, %97, %cst_49 [1] : vector<8x8xf32> to vector<8xf32>
    %99 = vector.shape_cast %98 : vector<8xf32> to vector<8x1xf32>
    %100 = tpu.reciprocal %99 {approx = true} : vector<8x1xf32> -> vector<8x1xf32>
    %101 = vector.broadcast %100 : vector<8x1xf32> to vector<8x8xf32>
    %102 = arith.mulf %97, %101 : vector<8x8xf32>
    %103 = vector.extract_strided_slice %55 {offsets = [0, 16], sizes = [8, 8], strides = [1, 1]} : vector<8x32xf32> to vector<8x8xf32>
    %cst_50 = arith.constant dense<0.000000e+00> : vector<8x8xf32>
    %104 = tpu.matmul %102, %103, %cst_50 {dimension_numbers = #tpu.dot_dimension_numbers<[1], [0], [0], [1], [0, 0, 1, 1], [], []>} : vector<8x8xf32>, vector<8x8xf32>, vector<8x8xf32> -> vector<8x8xf32>
    %105 = vector.extract_strided_slice %53 {offsets = [0, 24], sizes = [8, 8], strides = [1, 1]} : vector<8x32xf32> to vector<8x8xf32>
    %106 = vector.extract_strided_slice %56 {offsets = [24, 0], sizes = [8, 8], strides = [1, 1]} : vector<32x8xf32> to vector<8x8xf32>
    %cst_51 = arith.constant dense<0.000000e+00> : vector<8x8xf32>
    %107 = tpu.matmul %105, %106, %cst_51 {dimension_numbers = #tpu.dot_dimension_numbers<[1], [0], [0], [1], [0, 0, 1, 1], [], []>} : vector<8x8xf32>, vector<8x8xf32>, vector<8x8xf32> -> vector<8x8xf32>
    %108 = arith.addf %107, %7 : vector<8x8xf32>
    %cst_52 = arith.constant dense<0xFF800000> : vector<8xf32>
    %109 = vector.multi_reduction <maximumf>, %108, %cst_52 [1] : vector<8x8xf32> to vector<8xf32>
    %110 = vector.shape_cast %109 : vector<8xf32> to vector<8x1xf32>
    %111 = vector.broadcast %110 : vector<8x1xf32> to vector<8x8xf32>
    %112 = arith.subf %108, %111 : vector<8x8xf32>
    %113 = math.exp %112 : vector<8x8xf32>
    %cst_53 = arith.constant dense<0.000000e+00> : vector<8xf32>
    %114 = vector.multi_reduction <add>, %113, %cst_53 [1] : vector<8x8xf32> to vector<8xf32>
    %115 = vector.shape_cast %114 : vector<8xf32> to vector<8x1xf32>
    %116 = tpu.reciprocal %115 {approx = true} : vector<8x1xf32> -> vector<8x1xf32>
    %117 = vector.broadcast %116 : vector<8x1xf32> to vector<8x8xf32>
    %118 = arith.mulf %113, %117 : vector<8x8xf32>
    %119 = vector.extract_strided_slice %55 {offsets = [0, 24], sizes = [8, 8], strides = [1, 1]} : vector<8x32xf32> to vector<8x8xf32>
    %cst_54 = arith.constant dense<0.000000e+00> : vector<8x8xf32>
    %120 = tpu.matmul %118, %119, %cst_54 {dimension_numbers = #tpu.dot_dimension_numbers<[1], [0], [0], [1], [0, 0, 1, 1], [], []>} : vector<8x8xf32>, vector<8x8xf32>, vector<8x8xf32> -> vector<8x8xf32>
    %121 = tpu.concatenate %72, %88, %104, %120 in 1 : vector<8x8xf32>, vector<8x8xf32>, vector<8x8xf32>, vector<8x8xf32> -> vector<8x32xf32>
    %c0_55 = arith.constant 0 : index
    %c0_56 = arith.constant 0 : index
    %c0_57 = arith.constant 0 : index
    %122 = vector.load %arg11[%c0_55, %c0_56, %c0_57] : memref<5x32x32xf32, #tpu.memory_space<vmem>>, vector<1x32x32xf32>
    %123 = vector.shape_cast %122 : vector<1x32x32xf32> to vector<32x32xf32>
    %cst_58 = arith.constant dense<0.000000e+00> : vector<8x32xf32>
    %124 = tpu.matmul %121, %123, %cst_58 {dimension_numbers = #tpu.dot_dimension_numbers<[1], [0], [0], [1], [0, 0, 1, 1], [], []>} : vector<8x32xf32>, vector<32x32xf32>, vector<8x32xf32> -> vector<8x32xf32>
    %c0_59 = arith.constant 0 : index
    %c0_60 = arith.constant 0 : index
    %c0_61 = arith.constant 0 : index
    %125 = vector.load %arg12[%c0_59, %c0_60, %c0_61] : memref<5x1x32xf32, #tpu.memory_space<vmem>>, vector<1x1x32xf32>
    %126 = vector.shape_cast %125 : vector<1x1x32xf32> to vector<1x32xf32>
    %127 = vector.broadcast %126 : vector<1x32xf32> to vector<8x32xf32>
    %128 = arith.addf %124, %127 : vector<8x32xf32>
    %129 = arith.addf %1, %128 : vector<8x32xf32>
    %c1 = arith.constant 1 : index
    %c0_62 = arith.constant 0 : index
    %c0_63 = arith.constant 0 : index
    %130 = vector.load %arg17[%c1, %c0_62, %c0_63] : memref<6x1x32xf32, #tpu.memory_space<vmem>>, vector<1x1x32xf32>
    %131 = vector.shape_cast %130 : vector<1x1x32xf32> to vector<1x32xf32>
    %c1_64 = arith.constant 1 : index
    %c0_65 = arith.constant 0 : index
    %c0_66 = arith.constant 0 : index
    %132 = vector.load %arg18[%c1_64, %c0_65, %c0_66] : memref<6x1x32xf32, #tpu.memory_space<vmem>>, vector<1x1x32xf32>
    %133 = vector.shape_cast %132 : vector<1x1x32xf32> to vector<1x32xf32>
    %cst_67 = arith.constant dense<0.000000e+00> : vector<8xf32>
    %134 = vector.multi_reduction <add>, %129, %cst_67 [1] : vector<8x32xf32> to vector<8xf32>
    %135 = vector.shape_cast %134 : vector<8xf32> to vector<8x1xf32>
    %cst_68 = arith.constant 3.200000e+01 : f32
    %136 = vector.broadcast %cst_68 : f32 to vector<8x1xf32>
    %137 = arith.divf %135, %136 : vector<8x1xf32>
    %138 = vector.broadcast %137 : vector<8x1xf32> to vector<8x32xf32>
    %139 = arith.subf %129, %138 : vector<8x32xf32>
    %140 = arith.mulf %139, %139 : vector<8x32xf32>
    %cst_69 = arith.constant dense<0.000000e+00> : vector<8xf32>
    %141 = vector.multi_reduction <add>, %140, %cst_69 [1] : vector<8x32xf32> to vector<8xf32>
    %142 = vector.shape_cast %141 : vector<8xf32> to vector<8x1xf32>
    %cst_70 = arith.constant 0.0322580636 : f32
    %143 = vector.broadcast %cst_70 : f32 to vector<8x1xf32>
    %144 = arith.mulf %142, %143 : vector<8x1xf32>
    %145 = math.sqrt %144 : vector<8x1xf32>
    %cst_71 = arith.constant 9.99999997E-7 : f32
    %146 = vector.broadcast %cst_71 : f32 to vector<8x1xf32>
    %147 = arith.addf %145, %146 : vector<8x1xf32>
    %148 = tpu.reciprocal %147 {approx = true} : vector<8x1xf32> -> vector<8x1xf32>
    %149 = vector.broadcast %148 : vector<8x1xf32> to vector<8x32xf32>
    %150 = arith.mulf %139, %149 : vector<8x32xf32>
    %151 = vector.broadcast %131 : vector<1x32xf32> to vector<8x32xf32>
    %152 = arith.mulf %151, %150 : vector<8x32xf32>
    %153 = vector.broadcast %133 : vector<1x32xf32> to vector<8x32xf32>
    %154 = arith.addf %152, %153 : vector<8x32xf32>
    %c1_72 = arith.constant 1 : index
    %c0_73 = arith.constant 0 : index
    %c0_74 = arith.constant 0 : index
    %155 = vector.load %arg7[%c1_72, %c0_73, %c0_74] : memref<5x32x96xf32, #tpu.memory_space<vmem>>, vector<1x32x96xf32>
    %156 = vector.shape_cast %155 : vector<1x32x96xf32> to vector<32x96xf32>
    %157 = vector.extract_strided_slice %156 {offsets = [0, 0], sizes = [32, 32], strides = [1, 1]} : vector<32x96xf32> to vector<32x32xf32>
    %cst_75 = arith.constant dense<0.000000e+00> : vector<8x32xf32>
    %158 = tpu.matmul %154, %157, %cst_75 {dimension_numbers = #tpu.dot_dimension_numbers<[1], [0], [0], [1], [0, 0, 1, 1], [], []>} : vector<8x32xf32>, vector<32x32xf32>, vector<8x32xf32> -> vector<8x32xf32>
    %c1_76 = arith.constant 1 : index
    %c0_77 = arith.constant 0 : index
    %c0_78 = arith.constant 0 : index
    %159 = vector.load %arg8[%c1_76, %c0_77, %c0_78] : memref<5x1x96xf32, #tpu.memory_space<vmem>>, vector<1x1x96xf32>
    %160 = vector.shape_cast %159 : vector<1x1x96xf32> to vector<1x96xf32>
    %161 = vector.extract_strided_slice %160 {offsets = [0, 0], sizes = [1, 32], strides = [1, 1]} : vector<1x96xf32> to vector<1x32xf32>
    %162 = vector.broadcast %161 : vector<1x32xf32> to vector<8x32xf32>
    %163 = arith.addf %158, %162 : vector<8x32xf32>
    %164 = tpu.transpose %17, [1, 0] : vector<16x32xf32> -> vector<32x16xf32>
    %165 = vector.extract_strided_slice %163 {offsets = [0, 0], sizes = [8, 8], strides = [1, 1]} : vector<8x32xf32> to vector<8x8xf32>
    %166 = vector.extract_strided_slice %164 {offsets = [0, 0], sizes = [8, 16], strides = [1, 1]} : vector<32x16xf32> to vector<8x16xf32>
    %cst_79 = arith.constant dense<0.000000e+00> : vector<8x16xf32>
    %167 = tpu.matmul %165, %166, %cst_79 {dimension_numbers = #tpu.dot_dimension_numbers<[1], [0], [0], [1], [0, 0, 1, 1], [], []>} : vector<8x8xf32>, vector<8x16xf32>, vector<8x16xf32> -> vector<8x16xf32>
    %168 = vector.broadcast %9 : vector<1x16xf32> to vector<8x16xf32>
    %169 = arith.addf %167, %168 : vector<8x16xf32>
    %cst_80 = arith.constant dense<0xFF800000> : vector<8xf32>
    %170 = vector.multi_reduction <maximumf>, %169, %cst_80 [1] : vector<8x16xf32> to vector<8xf32>
    %171 = vector.shape_cast %170 : vector<8xf32> to vector<8x1xf32>
    %172 = vector.broadcast %171 : vector<8x1xf32> to vector<8x16xf32>
    %173 = arith.subf %169, %172 : vector<8x16xf32>
    %174 = math.exp %173 : vector<8x16xf32>
    %cst_81 = arith.constant dense<0.000000e+00> : vector<8xf32>
    %175 = vector.multi_reduction <add>, %174, %cst_81 [1] : vector<8x16xf32> to vector<8xf32>
    %176 = vector.shape_cast %175 : vector<8xf32> to vector<8x1xf32>
    %177 = tpu.reciprocal %176 {approx = true} : vector<8x1xf32> -> vector<8x1xf32>
    %178 = vector.broadcast %177 : vector<8x1xf32> to vector<8x16xf32>
    %179 = arith.mulf %174, %178 : vector<8x16xf32>
    %180 = vector.extract_strided_slice %18 {offsets = [0, 0], sizes = [16, 8], strides = [1, 1]} : vector<16x32xf32> to vector<16x8xf32>
    %cst_82 = arith.constant dense<0.000000e+00> : vector<8x8xf32>
    %181 = tpu.matmul %179, %180, %cst_82 {dimension_numbers = #tpu.dot_dimension_numbers<[1], [0], [0], [1], [0, 0, 1, 1], [], []>} : vector<8x16xf32>, vector<16x8xf32>, vector<8x8xf32> -> vector<8x8xf32>
    %182 = vector.extract_strided_slice %163 {offsets = [0, 8], sizes = [8, 8], strides = [1, 1]} : vector<8x32xf32> to vector<8x8xf32>
    %183 = vector.extract_strided_slice %164 {offsets = [8, 0], sizes = [8, 16], strides = [1, 1]} : vector<32x16xf32> to vector<8x16xf32>
    %cst_83 = arith.constant dense<0.000000e+00> : vector<8x16xf32>
    %184 = tpu.matmul %182, %183, %cst_83 {dimension_numbers = #tpu.dot_dimension_numbers<[1], [0], [0], [1], [0, 0, 1, 1], [], []>} : vector<8x8xf32>, vector<8x16xf32>, vector<8x16xf32> -> vector<8x16xf32>
    %185 = vector.broadcast %9 : vector<1x16xf32> to vector<8x16xf32>
    %186 = arith.addf %184, %185 : vector<8x16xf32>
    %cst_84 = arith.constant dense<0xFF800000> : vector<8xf32>
    %187 = vector.multi_reduction <maximumf>, %186, %cst_84 [1] : vector<8x16xf32> to vector<8xf32>
    %188 = vector.shape_cast %187 : vector<8xf32> to vector<8x1xf32>
    %189 = vector.broadcast %188 : vector<8x1xf32> to vector<8x16xf32>
    %190 = arith.subf %186, %189 : vector<8x16xf32>
    %191 = math.exp %190 : vector<8x16xf32>
    %cst_85 = arith.constant dense<0.000000e+00> : vector<8xf32>
    %192 = vector.multi_reduction <add>, %191, %cst_85 [1] : vector<8x16xf32> to vector<8xf32>
    %193 = vector.shape_cast %192 : vector<8xf32> to vector<8x1xf32>
    %194 = tpu.reciprocal %193 {approx = true} : vector<8x1xf32> -> vector<8x1xf32>
    %195 = vector.broadcast %194 : vector<8x1xf32> to vector<8x16xf32>
    %196 = arith.mulf %191, %195 : vector<8x16xf32>
    %197 = vector.extract_strided_slice %18 {offsets = [0, 8], sizes = [16, 8], strides = [1, 1]} : vector<16x32xf32> to vector<16x8xf32>
    %cst_86 = arith.constant dense<0.000000e+00> : vector<8x8xf32>
    %198 = tpu.matmul %196, %197, %cst_86 {dimension_numbers = #tpu.dot_dimension_numbers<[1], [0], [0], [1], [0, 0, 1, 1], [], []>} : vector<8x16xf32>, vector<16x8xf32>, vector<8x8xf32> -> vector<8x8xf32>
    %199 = vector.extract_strided_slice %163 {offsets = [0, 16], sizes = [8, 8], strides = [1, 1]} : vector<8x32xf32> to vector<8x8xf32>
    %200 = vector.extract_strided_slice %164 {offsets = [16, 0], sizes = [8, 16], strides = [1, 1]} : vector<32x16xf32> to vector<8x16xf32>
    %cst_87 = arith.constant dense<0.000000e+00> : vector<8x16xf32>
    %201 = tpu.matmul %199, %200, %cst_87 {dimension_numbers = #tpu.dot_dimension_numbers<[1], [0], [0], [1], [0, 0, 1, 1], [], []>} : vector<8x8xf32>, vector<8x16xf32>, vector<8x16xf32> -> vector<8x16xf32>
    %202 = vector.broadcast %9 : vector<1x16xf32> to vector<8x16xf32>
    %203 = arith.addf %201, %202 : vector<8x16xf32>
    %cst_88 = arith.constant dense<0xFF800000> : vector<8xf32>
    %204 = vector.multi_reduction <maximumf>, %203, %cst_88 [1] : vector<8x16xf32> to vector<8xf32>
    %205 = vector.shape_cast %204 : vector<8xf32> to vector<8x1xf32>
    %206 = vector.broadcast %205 : vector<8x1xf32> to vector<8x16xf32>
    %207 = arith.subf %203, %206 : vector<8x16xf32>
    %208 = math.exp %207 : vector<8x16xf32>
    %cst_89 = arith.constant dense<0.000000e+00> : vector<8xf32>
    %209 = vector.multi_reduction <add>, %208, %cst_89 [1] : vector<8x16xf32> to vector<8xf32>
    %210 = vector.shape_cast %209 : vector<8xf32> to vector<8x1xf32>
    %211 = tpu.reciprocal %210 {approx = true} : vector<8x1xf32> -> vector<8x1xf32>
    %212 = vector.broadcast %211 : vector<8x1xf32> to vector<8x16xf32>
    %213 = arith.mulf %208, %212 : vector<8x16xf32>
    %214 = vector.extract_strided_slice %18 {offsets = [0, 16], sizes = [16, 8], strides = [1, 1]} : vector<16x32xf32> to vector<16x8xf32>
    %cst_90 = arith.constant dense<0.000000e+00> : vector<8x8xf32>
    %215 = tpu.matmul %213, %214, %cst_90 {dimension_numbers = #tpu.dot_dimension_numbers<[1], [0], [0], [1], [0, 0, 1, 1], [], []>} : vector<8x16xf32>, vector<16x8xf32>, vector<8x8xf32> -> vector<8x8xf32>
    %216 = vector.extract_strided_slice %163 {offsets = [0, 24], sizes = [8, 8], strides = [1, 1]} : vector<8x32xf32> to vector<8x8xf32>
    %217 = vector.extract_strided_slice %164 {offsets = [24, 0], sizes = [8, 16], strides = [1, 1]} : vector<32x16xf32> to vector<8x16xf32>
    %cst_91 = arith.constant dense<0.000000e+00> : vector<8x16xf32>
    %218 = tpu.matmul %216, %217, %cst_91 {dimension_numbers = #tpu.dot_dimension_numbers<[1], [0], [0], [1], [0, 0, 1, 1], [], []>} : vector<8x8xf32>, vector<8x16xf32>, vector<8x16xf32> -> vector<8x16xf32>
    %219 = vector.broadcast %9 : vector<1x16xf32> to vector<8x16xf32>
    %220 = arith.addf %218, %219 : vector<8x16xf32>
    %cst_92 = arith.constant dense<0xFF800000> : vector<8xf32>
    %221 = vector.multi_reduction <maximumf>, %220, %cst_92 [1] : vector<8x16xf32> to vector<8xf32>
    %222 = vector.shape_cast %221 : vector<8xf32> to vector<8x1xf32>
    %223 = vector.broadcast %222 : vector<8x1xf32> to vector<8x16xf32>
    %224 = arith.subf %220, %223 : vector<8x16xf32>
    %225 = math.exp %224 : vector<8x16xf32>
    %cst_93 = arith.constant dense<0.000000e+00> : vector<8xf32>
    %226 = vector.multi_reduction <add>, %225, %cst_93 [1] : vector<8x16xf32> to vector<8xf32>
    %227 = vector.shape_cast %226 : vector<8xf32> to vector<8x1xf32>
    %228 = tpu.reciprocal %227 {approx = true} : vector<8x1xf32> -> vector<8x1xf32>
    %229 = vector.broadcast %228 : vector<8x1xf32> to vector<8x16xf32>
    %230 = arith.mulf %225, %229 : vector<8x16xf32>
    %231 = vector.extract_strided_slice %18 {offsets = [0, 24], sizes = [16, 8], strides = [1, 1]} : vector<16x32xf32> to vector<16x8xf32>
    %cst_94 = arith.constant dense<0.000000e+00> : vector<8x8xf32>
    %232 = tpu.matmul %230, %231, %cst_94 {dimension_numbers = #tpu.dot_dimension_numbers<[1], [0], [0], [1], [0, 0, 1, 1], [], []>} : vector<8x16xf32>, vector<16x8xf32>, vector<8x8xf32> -> vector<8x8xf32>
    %233 = tpu.concatenate %181, %198, %215, %232 in 1 : vector<8x8xf32>, vector<8x8xf32>, vector<8x8xf32>, vector<8x8xf32> -> vector<8x32xf32>
    %c1_95 = arith.constant 1 : index
    %c0_96 = arith.constant 0 : index
    %c0_97 = arith.constant 0 : index
    %234 = vector.load %arg11[%c1_95, %c0_96, %c0_97] : memref<5x32x32xf32, #tpu.memory_space<vmem>>, vector<1x32x32xf32>
    %235 = vector.shape_cast %234 : vector<1x32x32xf32> to vector<32x32xf32>
    %cst_98 = arith.constant dense<0.000000e+00> : vector<8x32xf32>
    %236 = tpu.matmul %233, %235, %cst_98 {dimension_numbers = #tpu.dot_dimension_numbers<[1], [0], [0], [1], [0, 0, 1, 1], [], []>} : vector<8x32xf32>, vector<32x32xf32>, vector<8x32xf32> -> vector<8x32xf32>
    %c1_99 = arith.constant 1 : index
    %c0_100 = arith.constant 0 : index
    %c0_101 = arith.constant 0 : index
    %237 = vector.load %arg12[%c1_99, %c0_100, %c0_101] : memref<5x1x32xf32, #tpu.memory_space<vmem>>, vector<1x1x32xf32>
    %238 = vector.shape_cast %237 : vector<1x1x32xf32> to vector<1x32xf32>
    %239 = vector.broadcast %238 : vector<1x32xf32> to vector<8x32xf32>
    %240 = arith.addf %236, %239 : vector<8x32xf32>
    %241 = arith.addf %129, %240 : vector<8x32xf32>
    %c2 = arith.constant 2 : index
    %c0_102 = arith.constant 0 : index
    %c0_103 = arith.constant 0 : index
    %242 = vector.load %arg17[%c2, %c0_102, %c0_103] : memref<6x1x32xf32, #tpu.memory_space<vmem>>, vector<1x1x32xf32>
    %243 = vector.shape_cast %242 : vector<1x1x32xf32> to vector<1x32xf32>
    %c2_104 = arith.constant 2 : index
    %c0_105 = arith.constant 0 : index
    %c0_106 = arith.constant 0 : index
    %244 = vector.load %arg18[%c2_104, %c0_105, %c0_106] : memref<6x1x32xf32, #tpu.memory_space<vmem>>, vector<1x1x32xf32>
    %245 = vector.shape_cast %244 : vector<1x1x32xf32> to vector<1x32xf32>
    %cst_107 = arith.constant dense<0.000000e+00> : vector<8xf32>
    %246 = vector.multi_reduction <add>, %3, %cst_107 [1] : vector<8x32xf32> to vector<8xf32>
    %247 = vector.shape_cast %246 : vector<8xf32> to vector<8x1xf32>
    %cst_108 = arith.constant 3.200000e+01 : f32
    %248 = vector.broadcast %cst_108 : f32 to vector<8x1xf32>
    %249 = arith.divf %247, %248 : vector<8x1xf32>
    %250 = vector.broadcast %249 : vector<8x1xf32> to vector<8x32xf32>
    %251 = arith.subf %3, %250 : vector<8x32xf32>
    %252 = arith.mulf %251, %251 : vector<8x32xf32>
    %cst_109 = arith.constant dense<0.000000e+00> : vector<8xf32>
    %253 = vector.multi_reduction <add>, %252, %cst_109 [1] : vector<8x32xf32> to vector<8xf32>
    %254 = vector.shape_cast %253 : vector<8xf32> to vector<8x1xf32>
    %cst_110 = arith.constant 0.0322580636 : f32
    %255 = vector.broadcast %cst_110 : f32 to vector<8x1xf32>
    %256 = arith.mulf %254, %255 : vector<8x1xf32>
    %257 = math.sqrt %256 : vector<8x1xf32>
    %cst_111 = arith.constant 9.99999997E-7 : f32
    %258 = vector.broadcast %cst_111 : f32 to vector<8x1xf32>
    %259 = arith.addf %257, %258 : vector<8x1xf32>
    %260 = tpu.reciprocal %259 {approx = true} : vector<8x1xf32> -> vector<8x1xf32>
    %261 = vector.broadcast %260 : vector<8x1xf32> to vector<8x32xf32>
    %262 = arith.mulf %251, %261 : vector<8x32xf32>
    %263 = vector.broadcast %243 : vector<1x32xf32> to vector<8x32xf32>
    %264 = arith.mulf %263, %262 : vector<8x32xf32>
    %265 = vector.broadcast %245 : vector<1x32xf32> to vector<8x32xf32>
    %266 = arith.addf %264, %265 : vector<8x32xf32>
    %c2_112 = arith.constant 2 : index
    %c0_113 = arith.constant 0 : index
    %c0_114 = arith.constant 0 : index
    %267 = vector.load %arg7[%c2_112, %c0_113, %c0_114] : memref<5x32x96xf32, #tpu.memory_space<vmem>>, vector<1x32x96xf32>
    %268 = vector.shape_cast %267 : vector<1x32x96xf32> to vector<32x96xf32>
    %cst_115 = arith.constant dense<0.000000e+00> : vector<8x96xf32>
    %269 = tpu.matmul %266, %268, %cst_115 {dimension_numbers = #tpu.dot_dimension_numbers<[1], [0], [0], [1], [0, 0, 1, 1], [], []>} : vector<8x32xf32>, vector<32x96xf32>, vector<8x96xf32> -> vector<8x96xf32>
    %c2_116 = arith.constant 2 : index
    %c0_117 = arith.constant 0 : index
    %c0_118 = arith.constant 0 : index
    %270 = vector.load %arg8[%c2_116, %c0_117, %c0_118] : memref<5x1x96xf32, #tpu.memory_space<vmem>>, vector<1x1x96xf32>
    %271 = vector.shape_cast %270 : vector<1x1x96xf32> to vector<1x96xf32>
    %272 = vector.broadcast %271 : vector<1x96xf32> to vector<8x96xf32>
    %273 = arith.addf %269, %272 : vector<8x96xf32>
    %274 = vector.extract_strided_slice %273 {offsets = [0, 0], sizes = [8, 32], strides = [1, 1]} : vector<8x96xf32> to vector<8x32xf32>
    %275 = vector.extract_strided_slice %273 {offsets = [0, 32], sizes = [8, 32], strides = [1, 1]} : vector<8x96xf32> to vector<8x32xf32>
    %276 = vector.extract_strided_slice %273 {offsets = [0, 64], sizes = [8, 32], strides = [1, 1]} : vector<8x96xf32> to vector<8x32xf32>
    %277 = tpu.transpose %275, [1, 0] : vector<8x32xf32> -> vector<32x8xf32>
    %278 = vector.extract_strided_slice %274 {offsets = [0, 0], sizes = [8, 8], strides = [1, 1]} : vector<8x32xf32> to vector<8x8xf32>
    %279 = vector.extract_strided_slice %277 {offsets = [0, 0], sizes = [8, 8], strides = [1, 1]} : vector<32x8xf32> to vector<8x8xf32>
    %cst_119 = arith.constant dense<0.000000e+00> : vector<8x8xf32>
    %280 = tpu.matmul %278, %279, %cst_119 {dimension_numbers = #tpu.dot_dimension_numbers<[1], [0], [0], [1], [0, 0, 1, 1], [], []>} : vector<8x8xf32>, vector<8x8xf32>, vector<8x8xf32> -> vector<8x8xf32>
    %281 = vector.broadcast %11 : vector<1x8xf32> to vector<8x8xf32>
    %282 = arith.addf %280, %281 : vector<8x8xf32>
    %cst_120 = arith.constant dense<0xFF800000> : vector<8xf32>
    %283 = vector.multi_reduction <maximumf>, %282, %cst_120 [1] : vector<8x8xf32> to vector<8xf32>
    %284 = vector.shape_cast %283 : vector<8xf32> to vector<8x1xf32>
    %285 = vector.broadcast %284 : vector<8x1xf32> to vector<8x8xf32>
    %286 = arith.subf %282, %285 : vector<8x8xf32>
    %287 = math.exp %286 : vector<8x8xf32>
    %cst_121 = arith.constant dense<0.000000e+00> : vector<8xf32>
    %288 = vector.multi_reduction <add>, %287, %cst_121 [1] : vector<8x8xf32> to vector<8xf32>
    %289 = vector.shape_cast %288 : vector<8xf32> to vector<8x1xf32>
    %290 = tpu.reciprocal %289 {approx = true} : vector<8x1xf32> -> vector<8x1xf32>
    %291 = vector.broadcast %290 : vector<8x1xf32> to vector<8x8xf32>
    %292 = arith.mulf %287, %291 : vector<8x8xf32>
    %293 = vector.extract_strided_slice %276 {offsets = [0, 0], sizes = [8, 8], strides = [1, 1]} : vector<8x32xf32> to vector<8x8xf32>
    %cst_122 = arith.constant dense<0.000000e+00> : vector<8x8xf32>
    %294 = tpu.matmul %292, %293, %cst_122 {dimension_numbers = #tpu.dot_dimension_numbers<[1], [0], [0], [1], [0, 0, 1, 1], [], []>} : vector<8x8xf32>, vector<8x8xf32>, vector<8x8xf32> -> vector<8x8xf32>
    %295 = vector.extract_strided_slice %274 {offsets = [0, 8], sizes = [8, 8], strides = [1, 1]} : vector<8x32xf32> to vector<8x8xf32>
    %296 = vector.extract_strided_slice %277 {offsets = [8, 0], sizes = [8, 8], strides = [1, 1]} : vector<32x8xf32> to vector<8x8xf32>
    %cst_123 = arith.constant dense<0.000000e+00> : vector<8x8xf32>
    %297 = tpu.matmul %295, %296, %cst_123 {dimension_numbers = #tpu.dot_dimension_numbers<[1], [0], [0], [1], [0, 0, 1, 1], [], []>} : vector<8x8xf32>, vector<8x8xf32>, vector<8x8xf32> -> vector<8x8xf32>
    %298 = vector.broadcast %11 : vector<1x8xf32> to vector<8x8xf32>
    %299 = arith.addf %297, %298 : vector<8x8xf32>
    %cst_124 = arith.constant dense<0xFF800000> : vector<8xf32>
    %300 = vector.multi_reduction <maximumf>, %299, %cst_124 [1] : vector<8x8xf32> to vector<8xf32>
    %301 = vector.shape_cast %300 : vector<8xf32> to vector<8x1xf32>
    %302 = vector.broadcast %301 : vector<8x1xf32> to vector<8x8xf32>
    %303 = arith.subf %299, %302 : vector<8x8xf32>
    %304 = math.exp %303 : vector<8x8xf32>
    %cst_125 = arith.constant dense<0.000000e+00> : vector<8xf32>
    %305 = vector.multi_reduction <add>, %304, %cst_125 [1] : vector<8x8xf32> to vector<8xf32>
    %306 = vector.shape_cast %305 : vector<8xf32> to vector<8x1xf32>
    %307 = tpu.reciprocal %306 {approx = true} : vector<8x1xf32> -> vector<8x1xf32>
    %308 = vector.broadcast %307 : vector<8x1xf32> to vector<8x8xf32>
    %309 = arith.mulf %304, %308 : vector<8x8xf32>
    %310 = vector.extract_strided_slice %276 {offsets = [0, 8], sizes = [8, 8], strides = [1, 1]} : vector<8x32xf32> to vector<8x8xf32>
    %cst_126 = arith.constant dense<0.000000e+00> : vector<8x8xf32>
    %311 = tpu.matmul %309, %310, %cst_126 {dimension_numbers = #tpu.dot_dimension_numbers<[1], [0], [0], [1], [0, 0, 1, 1], [], []>} : vector<8x8xf32>, vector<8x8xf32>, vector<8x8xf32> -> vector<8x8xf32>
    %312 = vector.extract_strided_slice %274 {offsets = [0, 16], sizes = [8, 8], strides = [1, 1]} : vector<8x32xf32> to vector<8x8xf32>
    %313 = vector.extract_strided_slice %277 {offsets = [16, 0], sizes = [8, 8], strides = [1, 1]} : vector<32x8xf32> to vector<8x8xf32>
    %cst_127 = arith.constant dense<0.000000e+00> : vector<8x8xf32>
    %314 = tpu.matmul %312, %313, %cst_127 {dimension_numbers = #tpu.dot_dimension_numbers<[1], [0], [0], [1], [0, 0, 1, 1], [], []>} : vector<8x8xf32>, vector<8x8xf32>, vector<8x8xf32> -> vector<8x8xf32>
    %315 = vector.broadcast %11 : vector<1x8xf32> to vector<8x8xf32>
    %316 = arith.addf %314, %315 : vector<8x8xf32>
    %cst_128 = arith.constant dense<0xFF800000> : vector<8xf32>
    %317 = vector.multi_reduction <maximumf>, %316, %cst_128 [1] : vector<8x8xf32> to vector<8xf32>
    %318 = vector.shape_cast %317 : vector<8xf32> to vector<8x1xf32>
    %319 = vector.broadcast %318 : vector<8x1xf32> to vector<8x8xf32>
    %320 = arith.subf %316, %319 : vector<8x8xf32>
    %321 = math.exp %320 : vector<8x8xf32>
    %cst_129 = arith.constant dense<0.000000e+00> : vector<8xf32>
    %322 = vector.multi_reduction <add>, %321, %cst_129 [1] : vector<8x8xf32> to vector<8xf32>
    %323 = vector.shape_cast %322 : vector<8xf32> to vector<8x1xf32>
    %324 = tpu.reciprocal %323 {approx = true} : vector<8x1xf32> -> vector<8x1xf32>
    %325 = vector.broadcast %324 : vector<8x1xf32> to vector<8x8xf32>
    %326 = arith.mulf %321, %325 : vector<8x8xf32>
    %327 = vector.extract_strided_slice %276 {offsets = [0, 16], sizes = [8, 8], strides = [1, 1]} : vector<8x32xf32> to vector<8x8xf32>
    %cst_130 = arith.constant dense<0.000000e+00> : vector<8x8xf32>
    %328 = tpu.matmul %326, %327, %cst_130 {dimension_numbers = #tpu.dot_dimension_numbers<[1], [0], [0], [1], [0, 0, 1, 1], [], []>} : vector<8x8xf32>, vector<8x8xf32>, vector<8x8xf32> -> vector<8x8xf32>
    %329 = vector.extract_strided_slice %274 {offsets = [0, 24], sizes = [8, 8], strides = [1, 1]} : vector<8x32xf32> to vector<8x8xf32>
    %330 = vector.extract_strided_slice %277 {offsets = [24, 0], sizes = [8, 8], strides = [1, 1]} : vector<32x8xf32> to vector<8x8xf32>
    %cst_131 = arith.constant dense<0.000000e+00> : vector<8x8xf32>
    %331 = tpu.matmul %329, %330, %cst_131 {dimension_numbers = #tpu.dot_dimension_numbers<[1], [0], [0], [1], [0, 0, 1, 1], [], []>} : vector<8x8xf32>, vector<8x8xf32>, vector<8x8xf32> -> vector<8x8xf32>
    %332 = vector.broadcast %11 : vector<1x8xf32> to vector<8x8xf32>
    %333 = arith.addf %331, %332 : vector<8x8xf32>
    %cst_132 = arith.constant dense<0xFF800000> : vector<8xf32>
    %334 = vector.multi_reduction <maximumf>, %333, %cst_132 [1] : vector<8x8xf32> to vector<8xf32>
    %335 = vector.shape_cast %334 : vector<8xf32> to vector<8x1xf32>
    %336 = vector.broadcast %335 : vector<8x1xf32> to vector<8x8xf32>
    %337 = arith.subf %333, %336 : vector<8x8xf32>
    %338 = math.exp %337 : vector<8x8xf32>
    %cst_133 = arith.constant dense<0.000000e+00> : vector<8xf32>
    %339 = vector.multi_reduction <add>, %338, %cst_133 [1] : vector<8x8xf32> to vector<8xf32>
    %340 = vector.shape_cast %339 : vector<8xf32> to vector<8x1xf32>
    %341 = tpu.reciprocal %340 {approx = true} : vector<8x1xf32> -> vector<8x1xf32>
    %342 = vector.broadcast %341 : vector<8x1xf32> to vector<8x8xf32>
    %343 = arith.mulf %338, %342 : vector<8x8xf32>
    %344 = vector.extract_strided_slice %276 {offsets = [0, 24], sizes = [8, 8], strides = [1, 1]} : vector<8x32xf32> to vector<8x8xf32>
    %cst_134 = arith.constant dense<0.000000e+00> : vector<8x8xf32>
    %345 = tpu.matmul %343, %344, %cst_134 {dimension_numbers = #tpu.dot_dimension_numbers<[1], [0], [0], [1], [0, 0, 1, 1], [], []>} : vector<8x8xf32>, vector<8x8xf32>, vector<8x8xf32> -> vector<8x8xf32>
    %346 = tpu.concatenate %294, %311, %328, %345 in 1 : vector<8x8xf32>, vector<8x8xf32>, vector<8x8xf32>, vector<8x8xf32> -> vector<8x32xf32>
    %c2_135 = arith.constant 2 : index
    %c0_136 = arith.constant 0 : index
    %c0_137 = arith.constant 0 : index
    %347 = vector.load %arg11[%c2_135, %c0_136, %c0_137] : memref<5x32x32xf32, #tpu.memory_space<vmem>>, vector<1x32x32xf32>
    %348 = vector.shape_cast %347 : vector<1x32x32xf32> to vector<32x32xf32>
    %cst_138 = arith.constant dense<0.000000e+00> : vector<8x32xf32>
    %349 = tpu.matmul %346, %348, %cst_138 {dimension_numbers = #tpu.dot_dimension_numbers<[1], [0], [0], [1], [0, 0, 1, 1], [], []>} : vector<8x32xf32>, vector<32x32xf32>, vector<8x32xf32> -> vector<8x32xf32>
    %c2_139 = arith.constant 2 : index
    %c0_140 = arith.constant 0 : index
    %c0_141 = arith.constant 0 : index
    %350 = vector.load %arg12[%c2_139, %c0_140, %c0_141] : memref<5x1x32xf32, #tpu.memory_space<vmem>>, vector<1x1x32xf32>
    %351 = vector.shape_cast %350 : vector<1x1x32xf32> to vector<1x32xf32>
    %352 = vector.broadcast %351 : vector<1x32xf32> to vector<8x32xf32>
    %353 = arith.addf %349, %352 : vector<8x32xf32>
    %354 = arith.addf %3, %353 : vector<8x32xf32>
    %c3 = arith.constant 3 : index
    %c0_142 = arith.constant 0 : index
    %c0_143 = arith.constant 0 : index
    %355 = vector.load %arg17[%c3, %c0_142, %c0_143] : memref<6x1x32xf32, #tpu.memory_space<vmem>>, vector<1x1x32xf32>
    %356 = vector.shape_cast %355 : vector<1x1x32xf32> to vector<1x32xf32>
    %c3_144 = arith.constant 3 : index
    %c0_145 = arith.constant 0 : index
    %c0_146 = arith.constant 0 : index
    %357 = vector.load %arg18[%c3_144, %c0_145, %c0_146] : memref<6x1x32xf32, #tpu.memory_space<vmem>>, vector<1x1x32xf32>
    %358 = vector.shape_cast %357 : vector<1x1x32xf32> to vector<1x32xf32>
    %cst_147 = arith.constant dense<0.000000e+00> : vector<8xf32>
    %359 = vector.multi_reduction <add>, %354, %cst_147 [1] : vector<8x32xf32> to vector<8xf32>
    %360 = vector.shape_cast %359 : vector<8xf32> to vector<8x1xf32>
    %cst_148 = arith.constant 3.200000e+01 : f32
    %361 = vector.broadcast %cst_148 : f32 to vector<8x1xf32>
    %362 = arith.divf %360, %361 : vector<8x1xf32>
    %363 = vector.broadcast %362 : vector<8x1xf32> to vector<8x32xf32>
    %364 = arith.subf %354, %363 : vector<8x32xf32>
    %365 = arith.mulf %364, %364 : vector<8x32xf32>
    %cst_149 = arith.constant dense<0.000000e+00> : vector<8xf32>
    %366 = vector.multi_reduction <add>, %365, %cst_149 [1] : vector<8x32xf32> to vector<8xf32>
    %367 = vector.shape_cast %366 : vector<8xf32> to vector<8x1xf32>
    %cst_150 = arith.constant 0.0322580636 : f32
    %368 = vector.broadcast %cst_150 : f32 to vector<8x1xf32>
    %369 = arith.mulf %367, %368 : vector<8x1xf32>
    %370 = math.sqrt %369 : vector<8x1xf32>
    %cst_151 = arith.constant 9.99999997E-7 : f32
    %371 = vector.broadcast %cst_151 : f32 to vector<8x1xf32>
    %372 = arith.addf %370, %371 : vector<8x1xf32>
    %373 = tpu.reciprocal %372 {approx = true} : vector<8x1xf32> -> vector<8x1xf32>
    %374 = vector.broadcast %373 : vector<8x1xf32> to vector<8x32xf32>
    %375 = arith.mulf %364, %374 : vector<8x32xf32>
    %376 = vector.broadcast %356 : vector<1x32xf32> to vector<8x32xf32>
    %377 = arith.mulf %376, %375 : vector<8x32xf32>
    %378 = vector.broadcast %358 : vector<1x32xf32> to vector<8x32xf32>
    %379 = arith.addf %377, %378 : vector<8x32xf32>
    %c3_152 = arith.constant 3 : index
    %c0_153 = arith.constant 0 : index
    %c0_154 = arith.constant 0 : index
    %380 = vector.load %arg7[%c3_152, %c0_153, %c0_154] : memref<5x32x96xf32, #tpu.memory_space<vmem>>, vector<1x32x96xf32>
    %381 = vector.shape_cast %380 : vector<1x32x96xf32> to vector<32x96xf32>
    %382 = vector.extract_strided_slice %381 {offsets = [0, 0], sizes = [32, 32], strides = [1, 1]} : vector<32x96xf32> to vector<32x32xf32>
    %cst_155 = arith.constant dense<0.000000e+00> : vector<8x32xf32>
    %383 = tpu.matmul %379, %382, %cst_155 {dimension_numbers = #tpu.dot_dimension_numbers<[1], [0], [0], [1], [0, 0, 1, 1], [], []>} : vector<8x32xf32>, vector<32x32xf32>, vector<8x32xf32> -> vector<8x32xf32>
    %c3_156 = arith.constant 3 : index
    %c0_157 = arith.constant 0 : index
    %c0_158 = arith.constant 0 : index
    %384 = vector.load %arg8[%c3_156, %c0_157, %c0_158] : memref<5x1x96xf32, #tpu.memory_space<vmem>>, vector<1x1x96xf32>
    %385 = vector.shape_cast %384 : vector<1x1x96xf32> to vector<1x96xf32>
    %386 = vector.extract_strided_slice %385 {offsets = [0, 0], sizes = [1, 32], strides = [1, 1]} : vector<1x96xf32> to vector<1x32xf32>
    %387 = vector.broadcast %386 : vector<1x32xf32> to vector<8x32xf32>
    %388 = arith.addf %383, %387 : vector<8x32xf32>
    %389 = tpu.transpose %19, [1, 0] : vector<16x32xf32> -> vector<32x16xf32>
    %390 = vector.extract_strided_slice %388 {offsets = [0, 0], sizes = [8, 8], strides = [1, 1]} : vector<8x32xf32> to vector<8x8xf32>
    %391 = vector.extract_strided_slice %389 {offsets = [0, 0], sizes = [8, 16], strides = [1, 1]} : vector<32x16xf32> to vector<8x16xf32>
    %cst_159 = arith.constant dense<0.000000e+00> : vector<8x16xf32>
    %392 = tpu.matmul %390, %391, %cst_159 {dimension_numbers = #tpu.dot_dimension_numbers<[1], [0], [0], [1], [0, 0, 1, 1], [], []>} : vector<8x8xf32>, vector<8x16xf32>, vector<8x16xf32> -> vector<8x16xf32>
    %393 = vector.broadcast %9 : vector<1x16xf32> to vector<8x16xf32>
    %394 = arith.addf %392, %393 : vector<8x16xf32>
    %cst_160 = arith.constant dense<0xFF800000> : vector<8xf32>
    %395 = vector.multi_reduction <maximumf>, %394, %cst_160 [1] : vector<8x16xf32> to vector<8xf32>
    %396 = vector.shape_cast %395 : vector<8xf32> to vector<8x1xf32>
    %397 = vector.broadcast %396 : vector<8x1xf32> to vector<8x16xf32>
    %398 = arith.subf %394, %397 : vector<8x16xf32>
    %399 = math.exp %398 : vector<8x16xf32>
    %cst_161 = arith.constant dense<0.000000e+00> : vector<8xf32>
    %400 = vector.multi_reduction <add>, %399, %cst_161 [1] : vector<8x16xf32> to vector<8xf32>
    %401 = vector.shape_cast %400 : vector<8xf32> to vector<8x1xf32>
    %402 = tpu.reciprocal %401 {approx = true} : vector<8x1xf32> -> vector<8x1xf32>
    %403 = vector.broadcast %402 : vector<8x1xf32> to vector<8x16xf32>
    %404 = arith.mulf %399, %403 : vector<8x16xf32>
    %405 = vector.extract_strided_slice %20 {offsets = [0, 0], sizes = [16, 8], strides = [1, 1]} : vector<16x32xf32> to vector<16x8xf32>
    %cst_162 = arith.constant dense<0.000000e+00> : vector<8x8xf32>
    %406 = tpu.matmul %404, %405, %cst_162 {dimension_numbers = #tpu.dot_dimension_numbers<[1], [0], [0], [1], [0, 0, 1, 1], [], []>} : vector<8x16xf32>, vector<16x8xf32>, vector<8x8xf32> -> vector<8x8xf32>
    %407 = vector.extract_strided_slice %388 {offsets = [0, 8], sizes = [8, 8], strides = [1, 1]} : vector<8x32xf32> to vector<8x8xf32>
    %408 = vector.extract_strided_slice %389 {offsets = [8, 0], sizes = [8, 16], strides = [1, 1]} : vector<32x16xf32> to vector<8x16xf32>
    %cst_163 = arith.constant dense<0.000000e+00> : vector<8x16xf32>
    %409 = tpu.matmul %407, %408, %cst_163 {dimension_numbers = #tpu.dot_dimension_numbers<[1], [0], [0], [1], [0, 0, 1, 1], [], []>} : vector<8x8xf32>, vector<8x16xf32>, vector<8x16xf32> -> vector<8x16xf32>
    %410 = vector.broadcast %9 : vector<1x16xf32> to vector<8x16xf32>
    %411 = arith.addf %409, %410 : vector<8x16xf32>
    %cst_164 = arith.constant dense<0xFF800000> : vector<8xf32>
    %412 = vector.multi_reduction <maximumf>, %411, %cst_164 [1] : vector<8x16xf32> to vector<8xf32>
    %413 = vector.shape_cast %412 : vector<8xf32> to vector<8x1xf32>
    %414 = vector.broadcast %413 : vector<8x1xf32> to vector<8x16xf32>
    %415 = arith.subf %411, %414 : vector<8x16xf32>
    %416 = math.exp %415 : vector<8x16xf32>
    %cst_165 = arith.constant dense<0.000000e+00> : vector<8xf32>
    %417 = vector.multi_reduction <add>, %416, %cst_165 [1] : vector<8x16xf32> to vector<8xf32>
    %418 = vector.shape_cast %417 : vector<8xf32> to vector<8x1xf32>
    %419 = tpu.reciprocal %418 {approx = true} : vector<8x1xf32> -> vector<8x1xf32>
    %420 = vector.broadcast %419 : vector<8x1xf32> to vector<8x16xf32>
    %421 = arith.mulf %416, %420 : vector<8x16xf32>
    %422 = vector.extract_strided_slice %20 {offsets = [0, 8], sizes = [16, 8], strides = [1, 1]} : vector<16x32xf32> to vector<16x8xf32>
    %cst_166 = arith.constant dense<0.000000e+00> : vector<8x8xf32>
    %423 = tpu.matmul %421, %422, %cst_166 {dimension_numbers = #tpu.dot_dimension_numbers<[1], [0], [0], [1], [0, 0, 1, 1], [], []>} : vector<8x16xf32>, vector<16x8xf32>, vector<8x8xf32> -> vector<8x8xf32>
    %424 = vector.extract_strided_slice %388 {offsets = [0, 16], sizes = [8, 8], strides = [1, 1]} : vector<8x32xf32> to vector<8x8xf32>
    %425 = vector.extract_strided_slice %389 {offsets = [16, 0], sizes = [8, 16], strides = [1, 1]} : vector<32x16xf32> to vector<8x16xf32>
    %cst_167 = arith.constant dense<0.000000e+00> : vector<8x16xf32>
    %426 = tpu.matmul %424, %425, %cst_167 {dimension_numbers = #tpu.dot_dimension_numbers<[1], [0], [0], [1], [0, 0, 1, 1], [], []>} : vector<8x8xf32>, vector<8x16xf32>, vector<8x16xf32> -> vector<8x16xf32>
    %427 = vector.broadcast %9 : vector<1x16xf32> to vector<8x16xf32>
    %428 = arith.addf %426, %427 : vector<8x16xf32>
    %cst_168 = arith.constant dense<0xFF800000> : vector<8xf32>
    %429 = vector.multi_reduction <maximumf>, %428, %cst_168 [1] : vector<8x16xf32> to vector<8xf32>
    %430 = vector.shape_cast %429 : vector<8xf32> to vector<8x1xf32>
    %431 = vector.broadcast %430 : vector<8x1xf32> to vector<8x16xf32>
    %432 = arith.subf %428, %431 : vector<8x16xf32>
    %433 = math.exp %432 : vector<8x16xf32>
    %cst_169 = arith.constant dense<0.000000e+00> : vector<8xf32>
    %434 = vector.multi_reduction <add>, %433, %cst_169 [1] : vector<8x16xf32> to vector<8xf32>
    %435 = vector.shape_cast %434 : vector<8xf32> to vector<8x1xf32>
    %436 = tpu.reciprocal %435 {approx = true} : vector<8x1xf32> -> vector<8x1xf32>
    %437 = vector.broadcast %436 : vector<8x1xf32> to vector<8x16xf32>
    %438 = arith.mulf %433, %437 : vector<8x16xf32>
    %439 = vector.extract_strided_slice %20 {offsets = [0, 16], sizes = [16, 8], strides = [1, 1]} : vector<16x32xf32> to vector<16x8xf32>
    %cst_170 = arith.constant dense<0.000000e+00> : vector<8x8xf32>
    %440 = tpu.matmul %438, %439, %cst_170 {dimension_numbers = #tpu.dot_dimension_numbers<[1], [0], [0], [1], [0, 0, 1, 1], [], []>} : vector<8x16xf32>, vector<16x8xf32>, vector<8x8xf32> -> vector<8x8xf32>
    %441 = vector.extract_strided_slice %388 {offsets = [0, 24], sizes = [8, 8], strides = [1, 1]} : vector<8x32xf32> to vector<8x8xf32>
    %442 = vector.extract_strided_slice %389 {offsets = [24, 0], sizes = [8, 16], strides = [1, 1]} : vector<32x16xf32> to vector<8x16xf32>
    %cst_171 = arith.constant dense<0.000000e+00> : vector<8x16xf32>
    %443 = tpu.matmul %441, %442, %cst_171 {dimension_numbers = #tpu.dot_dimension_numbers<[1], [0], [0], [1], [0, 0, 1, 1], [], []>} : vector<8x8xf32>, vector<8x16xf32>, vector<8x16xf32> -> vector<8x16xf32>
    %444 = vector.broadcast %9 : vector<1x16xf32> to vector<8x16xf32>
    %445 = arith.addf %443, %444 : vector<8x16xf32>
    %cst_172 = arith.constant dense<0xFF800000> : vector<8xf32>
    %446 = vector.multi_reduction <maximumf>, %445, %cst_172 [1] : vector<8x16xf32> to vector<8xf32>
    %447 = vector.shape_cast %446 : vector<8xf32> to vector<8x1xf32>
    %448 = vector.broadcast %447 : vector<8x1xf32> to vector<8x16xf32>
    %449 = arith.subf %445, %448 : vector<8x16xf32>
    %450 = math.exp %449 : vector<8x16xf32>
    %cst_173 = arith.constant dense<0.000000e+00> : vector<8xf32>
    %451 = vector.multi_reduction <add>, %450, %cst_173 [1] : vector<8x16xf32> to vector<8xf32>
    %452 = vector.shape_cast %451 : vector<8xf32> to vector<8x1xf32>
    %453 = tpu.reciprocal %452 {approx = true} : vector<8x1xf32> -> vector<8x1xf32>
    %454 = vector.broadcast %453 : vector<8x1xf32> to vector<8x16xf32>
    %455 = arith.mulf %450, %454 : vector<8x16xf32>
    %456 = vector.extract_strided_slice %20 {offsets = [0, 24], sizes = [16, 8], strides = [1, 1]} : vector<16x32xf32> to vector<16x8xf32>
    %cst_174 = arith.constant dense<0.000000e+00> : vector<8x8xf32>
    %457 = tpu.matmul %455, %456, %cst_174 {dimension_numbers = #tpu.dot_dimension_numbers<[1], [0], [0], [1], [0, 0, 1, 1], [], []>} : vector<8x16xf32>, vector<16x8xf32>, vector<8x8xf32> -> vector<8x8xf32>
    %458 = tpu.concatenate %406, %423, %440, %457 in 1 : vector<8x8xf32>, vector<8x8xf32>, vector<8x8xf32>, vector<8x8xf32> -> vector<8x32xf32>
    %c3_175 = arith.constant 3 : index
    %c0_176 = arith.constant 0 : index
    %c0_177 = arith.constant 0 : index
    %459 = vector.load %arg11[%c3_175, %c0_176, %c0_177] : memref<5x32x32xf32, #tpu.memory_space<vmem>>, vector<1x32x32xf32>
    %460 = vector.shape_cast %459 : vector<1x32x32xf32> to vector<32x32xf32>
    %cst_178 = arith.constant dense<0.000000e+00> : vector<8x32xf32>
    %461 = tpu.matmul %458, %460, %cst_178 {dimension_numbers = #tpu.dot_dimension_numbers<[1], [0], [0], [1], [0, 0, 1, 1], [], []>} : vector<8x32xf32>, vector<32x32xf32>, vector<8x32xf32> -> vector<8x32xf32>
    %c3_179 = arith.constant 3 : index
    %c0_180 = arith.constant 0 : index
    %c0_181 = arith.constant 0 : index
    %462 = vector.load %arg12[%c3_179, %c0_180, %c0_181] : memref<5x1x32xf32, #tpu.memory_space<vmem>>, vector<1x1x32xf32>
    %463 = vector.shape_cast %462 : vector<1x1x32xf32> to vector<1x32xf32>
    %464 = vector.broadcast %463 : vector<1x32xf32> to vector<8x32xf32>
    %465 = arith.addf %461, %464 : vector<8x32xf32>
    %466 = arith.addf %354, %465 : vector<8x32xf32>
    %c4 = arith.constant 4 : index
    %c0_182 = arith.constant 0 : index
    %c0_183 = arith.constant 0 : index
    %467 = vector.load %arg17[%c4, %c0_182, %c0_183] : memref<6x1x32xf32, #tpu.memory_space<vmem>>, vector<1x1x32xf32>
    %468 = vector.shape_cast %467 : vector<1x1x32xf32> to vector<1x32xf32>
    %c4_184 = arith.constant 4 : index
    %c0_185 = arith.constant 0 : index
    %c0_186 = arith.constant 0 : index
    %469 = vector.load %arg18[%c4_184, %c0_185, %c0_186] : memref<6x1x32xf32, #tpu.memory_space<vmem>>, vector<1x1x32xf32>
    %470 = vector.shape_cast %469 : vector<1x1x32xf32> to vector<1x32xf32>
    %cst_187 = arith.constant dense<0.000000e+00> : vector<8xf32>
    %471 = vector.multi_reduction <add>, %241, %cst_187 [1] : vector<8x32xf32> to vector<8xf32>
    %472 = vector.shape_cast %471 : vector<8xf32> to vector<8x1xf32>
    %cst_188 = arith.constant 3.200000e+01 : f32
    %473 = vector.broadcast %cst_188 : f32 to vector<8x1xf32>
    %474 = arith.divf %472, %473 : vector<8x1xf32>
    %475 = vector.broadcast %474 : vector<8x1xf32> to vector<8x32xf32>
    %476 = arith.subf %241, %475 : vector<8x32xf32>
    %477 = arith.mulf %476, %476 : vector<8x32xf32>
    %cst_189 = arith.constant dense<0.000000e+00> : vector<8xf32>
    %478 = vector.multi_reduction <add>, %477, %cst_189 [1] : vector<8x32xf32> to vector<8xf32>
    %479 = vector.shape_cast %478 : vector<8xf32> to vector<8x1xf32>
    %cst_190 = arith.constant 0.0322580636 : f32
    %480 = vector.broadcast %cst_190 : f32 to vector<8x1xf32>
    %481 = arith.mulf %479, %480 : vector<8x1xf32>
    %482 = math.sqrt %481 : vector<8x1xf32>
    %cst_191 = arith.constant 9.99999997E-7 : f32
    %483 = vector.broadcast %cst_191 : f32 to vector<8x1xf32>
    %484 = arith.addf %482, %483 : vector<8x1xf32>
    %485 = tpu.reciprocal %484 {approx = true} : vector<8x1xf32> -> vector<8x1xf32>
    %486 = vector.broadcast %485 : vector<8x1xf32> to vector<8x32xf32>
    %487 = arith.mulf %476, %486 : vector<8x32xf32>
    %488 = vector.broadcast %468 : vector<1x32xf32> to vector<8x32xf32>
    %489 = arith.mulf %488, %487 : vector<8x32xf32>
    %490 = vector.broadcast %470 : vector<1x32xf32> to vector<8x32xf32>
    %491 = arith.addf %489, %490 : vector<8x32xf32>
    %c4_192 = arith.constant 4 : index
    %c0_193 = arith.constant 0 : index
    %c0_194 = arith.constant 0 : index
    %492 = vector.load %arg7[%c4_192, %c0_193, %c0_194] : memref<5x32x96xf32, #tpu.memory_space<vmem>>, vector<1x32x96xf32>
    %493 = vector.shape_cast %492 : vector<1x32x96xf32> to vector<32x96xf32>
    %494 = vector.extract_strided_slice %493 {offsets = [0, 0], sizes = [32, 32], strides = [1, 1]} : vector<32x96xf32> to vector<32x32xf32>
    %cst_195 = arith.constant dense<0.000000e+00> : vector<8x32xf32>
    %495 = tpu.matmul %491, %494, %cst_195 {dimension_numbers = #tpu.dot_dimension_numbers<[1], [0], [0], [1], [0, 0, 1, 1], [], []>} : vector<8x32xf32>, vector<32x32xf32>, vector<8x32xf32> -> vector<8x32xf32>
    %c4_196 = arith.constant 4 : index
    %c0_197 = arith.constant 0 : index
    %c0_198 = arith.constant 0 : index
    %496 = vector.load %arg8[%c4_196, %c0_197, %c0_198] : memref<5x1x96xf32, #tpu.memory_space<vmem>>, vector<1x1x96xf32>
    %497 = vector.shape_cast %496 : vector<1x1x96xf32> to vector<1x96xf32>
    %498 = vector.extract_strided_slice %497 {offsets = [0, 0], sizes = [1, 32], strides = [1, 1]} : vector<1x96xf32> to vector<1x32xf32>
    %499 = vector.broadcast %498 : vector<1x32xf32> to vector<8x32xf32>
    %500 = arith.addf %495, %499 : vector<8x32xf32>
    %c4_199 = arith.constant 4 : index
    %c0_200 = arith.constant 0 : index
    %c0_201 = arith.constant 0 : index
    %501 = vector.load %arg7[%c4_199, %c0_200, %c0_201] : memref<5x32x96xf32, #tpu.memory_space<vmem>>, vector<1x32x96xf32>
    %502 = vector.shape_cast %501 : vector<1x32x96xf32> to vector<32x96xf32>
    %503 = vector.extract_strided_slice %502 {offsets = [0, 32], sizes = [32, 64], strides = [1, 1]} : vector<32x96xf32> to vector<32x64xf32>
    %cst_202 = arith.constant dense<0.000000e+00> : vector<8x64xf32>
    %504 = tpu.matmul %466, %503, %cst_202 {dimension_numbers = #tpu.dot_dimension_numbers<[1], [0], [0], [1], [0, 0, 1, 1], [], []>} : vector<8x32xf32>, vector<32x64xf32>, vector<8x64xf32> -> vector<8x64xf32>
    %c4_203 = arith.constant 4 : index
    %c0_204 = arith.constant 0 : index
    %c0_205 = arith.constant 0 : index
    %505 = vector.load %arg8[%c4_203, %c0_204, %c0_205] : memref<5x1x96xf32, #tpu.memory_space<vmem>>, vector<1x1x96xf32>
    %506 = vector.shape_cast %505 : vector<1x1x96xf32> to vector<1x96xf32>
    %507 = vector.extract_strided_slice %506 {offsets = [0, 32], sizes = [1, 64], strides = [1, 1]} : vector<1x96xf32> to vector<1x64xf32>
    %508 = vector.broadcast %507 : vector<1x64xf32> to vector<8x64xf32>
    %509 = arith.addf %504, %508 : vector<8x64xf32>
    %510 = vector.extract_strided_slice %509 {offsets = [0, 0], sizes = [8, 32], strides = [1, 1]} : vector<8x64xf32> to vector<8x32xf32>
    %511 = vector.extract_strided_slice %509 {offsets = [0, 32], sizes = [8, 32], strides = [1, 1]} : vector<8x64xf32> to vector<8x32xf32>
    %512 = tpu.transpose %510, [1, 0] : vector<8x32xf32> -> vector<32x8xf32>
    %513 = vector.extract_strided_slice %500 {offsets = [0, 0], sizes = [8, 8], strides = [1, 1]} : vector<8x32xf32> to vector<8x8xf32>
    %514 = vector.extract_strided_slice %512 {offsets = [0, 0], sizes = [8, 8], strides = [1, 1]} : vector<32x8xf32> to vector<8x8xf32>
    %cst_206 = arith.constant dense<0.000000e+00> : vector<8x8xf32>
    %515 = tpu.matmul %513, %514, %cst_206 {dimension_numbers = #tpu.dot_dimension_numbers<[1], [0], [0], [1], [0, 0, 1, 1], [], []>} : vector<8x8xf32>, vector<8x8xf32>, vector<8x8xf32> -> vector<8x8xf32>
    %516 = vector.broadcast %11 : vector<1x8xf32> to vector<8x8xf32>
    %517 = arith.addf %515, %516 : vector<8x8xf32>
    %cst_207 = arith.constant dense<0xFF800000> : vector<8xf32>
    %518 = vector.multi_reduction <maximumf>, %517, %cst_207 [1] : vector<8x8xf32> to vector<8xf32>
    %519 = vector.shape_cast %518 : vector<8xf32> to vector<8x1xf32>
    %520 = vector.broadcast %519 : vector<8x1xf32> to vector<8x8xf32>
    %521 = arith.subf %517, %520 : vector<8x8xf32>
    %522 = math.exp %521 : vector<8x8xf32>
    %cst_208 = arith.constant dense<0.000000e+00> : vector<8xf32>
    %523 = vector.multi_reduction <add>, %522, %cst_208 [1] : vector<8x8xf32> to vector<8xf32>
    %524 = vector.shape_cast %523 : vector<8xf32> to vector<8x1xf32>
    %525 = tpu.reciprocal %524 {approx = true} : vector<8x1xf32> -> vector<8x1xf32>
    %526 = vector.broadcast %525 : vector<8x1xf32> to vector<8x8xf32>
    %527 = arith.mulf %522, %526 : vector<8x8xf32>
    %528 = vector.extract_strided_slice %511 {offsets = [0, 0], sizes = [8, 8], strides = [1, 1]} : vector<8x32xf32> to vector<8x8xf32>
    %cst_209 = arith.constant dense<0.000000e+00> : vector<8x8xf32>
    %529 = tpu.matmul %527, %528, %cst_209 {dimension_numbers = #tpu.dot_dimension_numbers<[1], [0], [0], [1], [0, 0, 1, 1], [], []>} : vector<8x8xf32>, vector<8x8xf32>, vector<8x8xf32> -> vector<8x8xf32>
    %530 = vector.extract_strided_slice %500 {offsets = [0, 8], sizes = [8, 8], strides = [1, 1]} : vector<8x32xf32> to vector<8x8xf32>
    %531 = vector.extract_strided_slice %512 {offsets = [8, 0], sizes = [8, 8], strides = [1, 1]} : vector<32x8xf32> to vector<8x8xf32>
    %cst_210 = arith.constant dense<0.000000e+00> : vector<8x8xf32>
    %532 = tpu.matmul %530, %531, %cst_210 {dimension_numbers = #tpu.dot_dimension_numbers<[1], [0], [0], [1], [0, 0, 1, 1], [], []>} : vector<8x8xf32>, vector<8x8xf32>, vector<8x8xf32> -> vector<8x8xf32>
    %533 = vector.broadcast %11 : vector<1x8xf32> to vector<8x8xf32>
    %534 = arith.addf %532, %533 : vector<8x8xf32>
    %cst_211 = arith.constant dense<0xFF800000> : vector<8xf32>
    %535 = vector.multi_reduction <maximumf>, %534, %cst_211 [1] : vector<8x8xf32> to vector<8xf32>
    %536 = vector.shape_cast %535 : vector<8xf32> to vector<8x1xf32>
    %537 = vector.broadcast %536 : vector<8x1xf32> to vector<8x8xf32>
    %538 = arith.subf %534, %537 : vector<8x8xf32>
    %539 = math.exp %538 : vector<8x8xf32>
    %cst_212 = arith.constant dense<0.000000e+00> : vector<8xf32>
    %540 = vector.multi_reduction <add>, %539, %cst_212 [1] : vector<8x8xf32> to vector<8xf32>
    %541 = vector.shape_cast %540 : vector<8xf32> to vector<8x1xf32>
    %542 = tpu.reciprocal %541 {approx = true} : vector<8x1xf32> -> vector<8x1xf32>
    %543 = vector.broadcast %542 : vector<8x1xf32> to vector<8x8xf32>
    %544 = arith.mulf %539, %543 : vector<8x8xf32>
    %545 = vector.extract_strided_slice %511 {offsets = [0, 8], sizes = [8, 8], strides = [1, 1]} : vector<8x32xf32> to vector<8x8xf32>
    %cst_213 = arith.constant dense<0.000000e+00> : vector<8x8xf32>
    %546 = tpu.matmul %544, %545, %cst_213 {dimension_numbers = #tpu.dot_dimension_numbers<[1], [0], [0], [1], [0, 0, 1, 1], [], []>} : vector<8x8xf32>, vector<8x8xf32>, vector<8x8xf32> -> vector<8x8xf32>
    %547 = vector.extract_strided_slice %500 {offsets = [0, 16], sizes = [8, 8], strides = [1, 1]} : vector<8x32xf32> to vector<8x8xf32>
    %548 = vector.extract_strided_slice %512 {offsets = [16, 0], sizes = [8, 8], strides = [1, 1]} : vector<32x8xf32> to vector<8x8xf32>
    %cst_214 = arith.constant dense<0.000000e+00> : vector<8x8xf32>
    %549 = tpu.matmul %547, %548, %cst_214 {dimension_numbers = #tpu.dot_dimension_numbers<[1], [0], [0], [1], [0, 0, 1, 1], [], []>} : vector<8x8xf32>, vector<8x8xf32>, vector<8x8xf32> -> vector<8x8xf32>
    %550 = vector.broadcast %11 : vector<1x8xf32> to vector<8x8xf32>
    %551 = arith.addf %549, %550 : vector<8x8xf32>
    %cst_215 = arith.constant dense<0xFF800000> : vector<8xf32>
    %552 = vector.multi_reduction <maximumf>, %551, %cst_215 [1] : vector<8x8xf32> to vector<8xf32>
    %553 = vector.shape_cast %552 : vector<8xf32> to vector<8x1xf32>
    %554 = vector.broadcast %553 : vector<8x1xf32> to vector<8x8xf32>
    %555 = arith.subf %551, %554 : vector<8x8xf32>
    %556 = math.exp %555 : vector<8x8xf32>
    %cst_216 = arith.constant dense<0.000000e+00> : vector<8xf32>
    %557 = vector.multi_reduction <add>, %556, %cst_216 [1] : vector<8x8xf32> to vector<8xf32>
    %558 = vector.shape_cast %557 : vector<8xf32> to vector<8x1xf32>
    %559 = tpu.reciprocal %558 {approx = true} : vector<8x1xf32> -> vector<8x1xf32>
    %560 = vector.broadcast %559 : vector<8x1xf32> to vector<8x8xf32>
    %561 = arith.mulf %556, %560 : vector<8x8xf32>
    %562 = vector.extract_strided_slice %511 {offsets = [0, 16], sizes = [8, 8], strides = [1, 1]} : vector<8x32xf32> to vector<8x8xf32>
    %cst_217 = arith.constant dense<0.000000e+00> : vector<8x8xf32>
    %563 = tpu.matmul %561, %562, %cst_217 {dimension_numbers = #tpu.dot_dimension_numbers<[1], [0], [0], [1], [0, 0, 1, 1], [], []>} : vector<8x8xf32>, vector<8x8xf32>, vector<8x8xf32> -> vector<8x8xf32>
    %564 = vector.extract_strided_slice %500 {offsets = [0, 24], sizes = [8, 8], strides = [1, 1]} : vector<8x32xf32> to vector<8x8xf32>
    %565 = vector.extract_strided_slice %512 {offsets = [24, 0], sizes = [8, 8], strides = [1, 1]} : vector<32x8xf32> to vector<8x8xf32>
    %cst_218 = arith.constant dense<0.000000e+00> : vector<8x8xf32>
    %566 = tpu.matmul %564, %565, %cst_218 {dimension_numbers = #tpu.dot_dimension_numbers<[1], [0], [0], [1], [0, 0, 1, 1], [], []>} : vector<8x8xf32>, vector<8x8xf32>, vector<8x8xf32> -> vector<8x8xf32>
    %567 = vector.broadcast %11 : vector<1x8xf32> to vector<8x8xf32>
    %568 = arith.addf %566, %567 : vector<8x8xf32>
    %cst_219 = arith.constant dense<0xFF800000> : vector<8xf32>
    %569 = vector.multi_reduction <maximumf>, %568, %cst_219 [1] : vector<8x8xf32> to vector<8xf32>
    %570 = vector.shape_cast %569 : vector<8xf32> to vector<8x1xf32>
    %571 = vector.broadcast %570 : vector<8x1xf32> to vector<8x8xf32>
    %572 = arith.subf %568, %571 : vector<8x8xf32>
    %573 = math.exp %572 : vector<8x8xf32>
    %cst_220 = arith.constant dense<0.000000e+00> : vector<8xf32>
    %574 = vector.multi_reduction <add>, %573, %cst_220 [1] : vector<8x8xf32> to vector<8xf32>
    %575 = vector.shape_cast %574 : vector<8xf32> to vector<8x1xf32>
    %576 = tpu.reciprocal %575 {approx = true} : vector<8x1xf32> -> vector<8x1xf32>
    %577 = vector.broadcast %576 : vector<8x1xf32> to vector<8x8xf32>
    %578 = arith.mulf %573, %577 : vector<8x8xf32>
    %579 = vector.extract_strided_slice %511 {offsets = [0, 24], sizes = [8, 8], strides = [1, 1]} : vector<8x32xf32> to vector<8x8xf32>
    %cst_221 = arith.constant dense<0.000000e+00> : vector<8x8xf32>
    %580 = tpu.matmul %578, %579, %cst_221 {dimension_numbers = #tpu.dot_dimension_numbers<[1], [0], [0], [1], [0, 0, 1, 1], [], []>} : vector<8x8xf32>, vector<8x8xf32>, vector<8x8xf32> -> vector<8x8xf32>
    %581 = tpu.concatenate %529, %546, %563, %580 in 1 : vector<8x8xf32>, vector<8x8xf32>, vector<8x8xf32>, vector<8x8xf32> -> vector<8x32xf32>
    %c4_222 = arith.constant 4 : index
    %c0_223 = arith.constant 0 : index
    %c0_224 = arith.constant 0 : index
    %582 = vector.load %arg11[%c4_222, %c0_223, %c0_224] : memref<5x32x32xf32, #tpu.memory_space<vmem>>, vector<1x32x32xf32>
    %583 = vector.shape_cast %582 : vector<1x32x32xf32> to vector<32x32xf32>
    %cst_225 = arith.constant dense<0.000000e+00> : vector<8x32xf32>
    %584 = tpu.matmul %581, %583, %cst_225 {dimension_numbers = #tpu.dot_dimension_numbers<[1], [0], [0], [1], [0, 0, 1, 1], [], []>} : vector<8x32xf32>, vector<32x32xf32>, vector<8x32xf32> -> vector<8x32xf32>
    %c4_226 = arith.constant 4 : index
    %c0_227 = arith.constant 0 : index
    %c0_228 = arith.constant 0 : index
    %585 = vector.load %arg12[%c4_226, %c0_227, %c0_228] : memref<5x1x32xf32, #tpu.memory_space<vmem>>, vector<1x1x32xf32>
    %586 = vector.shape_cast %585 : vector<1x1x32xf32> to vector<1x32xf32>
    %587 = vector.broadcast %586 : vector<1x32xf32> to vector<8x32xf32>
    %588 = arith.addf %584, %587 : vector<8x32xf32>
    %589 = arith.addf %241, %588 : vector<8x32xf32>
    %c5 = arith.constant 5 : index
    %c0_229 = arith.constant 0 : index
    %c0_230 = arith.constant 0 : index
    %590 = vector.load %arg17[%c5, %c0_229, %c0_230] : memref<6x1x32xf32, #tpu.memory_space<vmem>>, vector<1x1x32xf32>
    %591 = vector.shape_cast %590 : vector<1x1x32xf32> to vector<1x32xf32>
    %c5_231 = arith.constant 5 : index
    %c0_232 = arith.constant 0 : index
    %c0_233 = arith.constant 0 : index
    %592 = vector.load %arg18[%c5_231, %c0_232, %c0_233] : memref<6x1x32xf32, #tpu.memory_space<vmem>>, vector<1x1x32xf32>
    %593 = vector.shape_cast %592 : vector<1x1x32xf32> to vector<1x32xf32>
    %cst_234 = arith.constant dense<0.000000e+00> : vector<8xf32>
    %594 = vector.multi_reduction <add>, %589, %cst_234 [1] : vector<8x32xf32> to vector<8xf32>
    %595 = vector.shape_cast %594 : vector<8xf32> to vector<8x1xf32>
    %cst_235 = arith.constant 3.200000e+01 : f32
    %596 = vector.broadcast %cst_235 : f32 to vector<8x1xf32>
    %597 = arith.divf %595, %596 : vector<8x1xf32>
    %598 = vector.broadcast %597 : vector<8x1xf32> to vector<8x32xf32>
    %599 = arith.subf %589, %598 : vector<8x32xf32>
    %600 = arith.mulf %599, %599 : vector<8x32xf32>
    %cst_236 = arith.constant dense<0.000000e+00> : vector<8xf32>
    %601 = vector.multi_reduction <add>, %600, %cst_236 [1] : vector<8x32xf32> to vector<8xf32>
    %602 = vector.shape_cast %601 : vector<8xf32> to vector<8x1xf32>
    %cst_237 = arith.constant 0.0322580636 : f32
    %603 = vector.broadcast %cst_237 : f32 to vector<8x1xf32>
    %604 = arith.mulf %602, %603 : vector<8x1xf32>
    %605 = math.sqrt %604 : vector<8x1xf32>
    %cst_238 = arith.constant 9.99999997E-7 : f32
    %606 = vector.broadcast %cst_238 : f32 to vector<8x1xf32>
    %607 = arith.addf %605, %606 : vector<8x1xf32>
    %608 = tpu.reciprocal %607 {approx = true} : vector<8x1xf32> -> vector<8x1xf32>
    %609 = vector.broadcast %608 : vector<8x1xf32> to vector<8x32xf32>
    %610 = arith.mulf %599, %609 : vector<8x32xf32>
    %611 = vector.broadcast %591 : vector<1x32xf32> to vector<8x32xf32>
    %612 = arith.mulf %611, %610 : vector<8x32xf32>
    %613 = vector.broadcast %593 : vector<1x32xf32> to vector<8x32xf32>
    %614 = arith.addf %612, %613 : vector<8x32xf32>
    %c0_239 = arith.constant 0 : index
    %c0_240 = arith.constant 0 : index
    %615 = vector.load %arg13[%c0_239, %c0_240] : memref<32x64xf32, #tpu.memory_space<vmem>>, vector<32x64xf32>
    %cst_241 = arith.constant dense<0.000000e+00> : vector<8x64xf32>
    %616 = tpu.matmul %614, %615, %cst_241 {dimension_numbers = #tpu.dot_dimension_numbers<[1], [0], [0], [1], [0, 0, 1, 1], [], []>} : vector<8x32xf32>, vector<32x64xf32>, vector<8x64xf32> -> vector<8x64xf32>
    %c0_242 = arith.constant 0 : index
    %c0_243 = arith.constant 0 : index
    %617 = vector.load %arg14[%c0_242, %c0_243] : memref<1x64xf32, #tpu.memory_space<vmem>>, vector<1x64xf32>
    %618 = vector.broadcast %617 : vector<1x64xf32> to vector<8x64xf32>
    %619 = arith.addf %616, %618 : vector<8x64xf32>
    %cst_244 = arith.constant 0.000000e+00 : f32
    %620 = vector.broadcast %cst_244 : f32 to vector<8x64xf32>
    %621 = arith.maximumf %619, %620 : vector<8x64xf32>
    %c0_245 = arith.constant 0 : index
    %c0_246 = arith.constant 0 : index
    %622 = vector.load %arg15[%c0_245, %c0_246] : memref<64x32xf32, #tpu.memory_space<vmem>>, vector<64x32xf32>
    %cst_247 = arith.constant dense<0.000000e+00> : vector<8x32xf32>
    %623 = tpu.matmul %621, %622, %cst_247 {dimension_numbers = #tpu.dot_dimension_numbers<[1], [0], [0], [1], [0, 0, 1, 1], [], []>} : vector<8x64xf32>, vector<64x32xf32>, vector<8x32xf32> -> vector<8x32xf32>
    %624 = arith.addf %589, %623 : vector<8x32xf32>
    %c0_248 = arith.constant 0 : index
    %c0_249 = arith.constant 0 : index
    %625 = vector.load %arg16[%c0_248, %c0_249] : memref<1x32xf32, #tpu.memory_space<vmem>>, vector<1x32xf32>
    %626 = vector.broadcast %625 : vector<1x32xf32> to vector<8x32xf32>
    %627 = arith.addf %624, %626 : vector<8x32xf32>
    %c0_250 = arith.constant 0 : index
    %c0_251 = arith.constant 0 : index
    %c0_252 = arith.constant 0 : index
    %628 = vector.load %arg19[%c0_250, %c0_251, %c0_252] : memref<1x8x32xf32, #tpu.memory_space<vmem>>, vector<1x8x32xf32>
    %629 = vector.shape_cast %628 : vector<1x8x32xf32> to vector<8x32xf32>
    %630 = vector.shape_cast %627 : vector<8x32xf32> to vector<1x8x32xf32>
    tpu.vector_store %arg19[%c0_250, %c0_251, %c0_252], %630 {strides = array<i32>} : memref<1x8x32xf32, #tpu.memory_space<vmem>>, vector<1x8x32xf32>,
    return
  }
  func.func @transform_0(%arg0: i32) -> (i32, i32, i32) {
    %c0_i32 = arith.constant 0 : i32
    %c0_i32_0 = arith.constant 0 : i32
    %c0_i32_1 = arith.constant 0 : i32
    return %arg0, %c0_i32, %c0_i32_0 : i32, i32, i32
  }
  func.func @transform_1(%arg0: i32) -> (i32, i32, i32) {
    %c0_i32 = arith.constant 0 : i32
    %c0_i32_0 = arith.constant 0 : i32
    %c0_i32_1 = arith.constant 0 : i32
    return %arg0, %c0_i32, %c0_i32_0 : i32, i32, i32
  }
  func.func @transform_2(%arg0: i32) -> (i32, i32, i32) {
    %c0_i32 = arith.constant 0 : i32
    %c0_i32_0 = arith.constant 0 : i32
    %c0_i32_1 = arith.constant 0 : i32
    return %arg0, %c0_i32, %c0_i32_0 : i32, i32, i32
  }
  func.func @transform_3(%arg0: i32) -> (i32, i32, i32) {
    %c0_i32 = arith.constant 0 : i32
    %c0_i32_0 = arith.constant 0 : i32
    %c0_i32_1 = arith.constant 0 : i32
    return %arg0, %c0_i32, %c0_i32_0 : i32, i32, i32
  }
  func.func @transform_4(%arg0: i32) -> (i32, i32, i32) {
    %c0_i32 = arith.constant 0 : i32
    %c0_i32_0 = arith.constant 0 : i32
    %c0_i32_1 = arith.constant 0 : i32
    return %arg0, %c0_i32, %c0_i32_0 : i32, i32, i32
  }
  func.func @transform_5(%arg0: i32) -> (i32, i32, i32) {
    %c0_i32 = arith.constant 0 : i32
    %c0_i32_0 = arith.constant 0 : i32
    %c0_i32_1 = arith.constant 0 : i32
    return %arg0, %c0_i32, %c0_i32_0 : i32, i32, i32
  }
  func.func @transform_6(%arg0: i32) -> (i32, i32, i32) {
    %c0_i32 = arith.constant 0 : i32
    %c0_i32_0 = arith.constant 0 : i32
    %c0_i32_1 = arith.constant 0 : i32
    %c0_i32_2 = arith.constant 0 : i32
    return %c0_i32, %c0_i32_0, %c0_i32_1 : i32, i32, i32
  }
  func.func @transform_7(%arg0: i32) -> (i32, i32, i32) {
    %c0_i32 = arith.constant 0 : i32
    %c0_i32_0 = arith.constant 0 : i32
    %c0_i32_1 = arith.constant 0 : i32
    %c0_i32_2 = arith.constant 0 : i32
    return %c0_i32, %c0_i32_0, %c0_i32_1 : i32, i32, i32
  }
  func.func @transform_8(%arg0: i32) -> (i32, i32) {
    %c0_i32 = arith.constant 0 : i32
    %c0_i32_0 = arith.constant 0 : i32
    %c0_i32_1 = arith.constant 0 : i32
    return %c0_i32, %c0_i32_0 : i32, i32
  }
  func.func @transform_9(%arg0: i32) -> (i32, i32) {
    %c0_i32 = arith.constant 0 : i32
    %c0_i32_0 = arith.constant 0 : i32
    %c0_i32_1 = arith.constant 0 : i32
    return %c0_i32, %c0_i32_0 : i32, i32
  }
  func.func @transform_10(%arg0: i32) -> (i32, i32, i32) {
    %c0_i32 = arith.constant 0 : i32
    %c0_i32_0 = arith.constant 0 : i32
    %c0_i32_1 = arith.constant 0 : i32
    %c0_i32_2 = arith.constant 0 : i32
    return %c0_i32, %c0_i32_0, %c0_i32_1 : i32, i32, i32
  }
  func.func @transform_11(%arg0: i32) -> (i32, i32, i32) {
    %c0_i32 = arith.constant 0 : i32
    %c0_i32_0 = arith.constant 0 : i32
    %c0_i32_1 = arith.constant 0 : i32
    %c0_i32_2 = arith.constant 0 : i32
    return %c0_i32, %c0_i32_0, %c0_i32_1 : i32, i32, i32
  }
  func.func @transform_12(%arg0: i32) -> (i32, i32) {
    %c0_i32 = arith.constant 0 : i32
    %c0_i32_0 = arith.constant 0 : i32
    %c0_i32_1 = arith.constant 0 : i32
    return %c0_i32, %c0_i32_0 : i32, i32
  }
  func.func @transform_13(%arg0: i32) -> (i32, i32) {
    %c0_i32 = arith.constant 0 : i32
    %c0_i32_0 = arith.constant 0 : i32
    %c0_i32_1 = arith.constant 0 : i32
    return %c0_i32, %c0_i32_0 : i32, i32
  }
  func.func @transform_14(%arg0: i32) -> (i32, i32) {
    %c0_i32 = arith.constant 0 : i32
    %c0_i32_0 = arith.constant 0 : i32
    %c0_i32_1 = arith.constant 0 : i32
    return %c0_i32, %c0_i32_0 : i32, i32
  }
  func.func @transform_15(%arg0: i32) -> (i32, i32) {
    %c0_i32 = arith.constant 0 : i32
    %c0_i32_0 = arith.constant 0 : i32
    %c0_i32_1 = arith.constant 0 : i32
    return %c0_i32, %c0_i32_0 : i32, i32
  }
  func.func @transform_16(%arg0: i32) -> (i32, i32, i32) {
    %c0_i32 = arith.constant 0 : i32
    %c0_i32_0 = arith.constant 0 : i32
    %c0_i32_1 = arith.constant 0 : i32
    %c0_i32_2 = arith.constant 0 : i32
    return %c0_i32, %c0_i32_0, %c0_i32_1 : i32, i32, i32
  }
  func.func @transform_17(%arg0: i32) -> (i32, i32, i32) {
    %c0_i32 = arith.constant 0 : i32
    %c0_i32_0 = arith.constant 0 : i32
    %c0_i32_1 = arith.constant 0 : i32
    %c0_i32_2 = arith.constant 0 : i32
    return %c0_i32, %c0_i32_0, %c0_i32_1 : i32, i32, i32
  }
  func.func @transform_18(%arg0: i32) -> (i32, i32, i32) {
    %c0_i32 = arith.constant 0 : i32
    %c0_i32_0 = arith.constant 0 : i32
    %c0_i32_1 = arith.constant 0 : i32
    return %arg0, %c0_i32, %c0_i32_0 : i32, i32, i32
  }
}

</mosaic_0001>

<bundles_post_ra>
// kernel: decoder_layer_caption.1
= control target key start
LH: loop header
LB: loop body
LE: loop exit
PB: predicated region body
PF: predicated region fallthrough
CT: control target
= control target key end

     0   :  { %s8244_s0 = inlined_call_operand.hbm [shape: f32[2,8,32], index: 0, kind: input, shape index: {}]   ;;  %s8245_s1 = inlined_call_operand.vmem [shape: f32[2,8,32], index: 1, kind: input, shape index: {}]   ;;  %s8246_s2 = inlined_call_operand.vmem [shape: f32[2,16,32], index: 2, kind: input, shape index: {}]   ;;  %s8247_s3 = inlined_call_operand.vmem [shape: f32[2,8,8], index: 3, kind: input, shape index: {}]   ;;  %s8248_s4 = inlined_call_operand.vmem [shape: f32[2,1,16], index: 4, kind: input, shape index: {}]   ;;  %s8249_s5 = inlined_call_operand.vmem [shape: f32[2,1,8], index: 5, kind: input, shape index: {}]   ;;  %s8250_s6 = inlined_call_operand.hbm [shape: f32[5,32,96], index: 6, kind: input, shape index: {}]   ;;  %s8251_s7 = inlined_call_operand.hbm [shape: f32[5,1,96], index: 7, kind: input, shape index: {}]   ;;  %s8252_s8 = inlined_call_operand.vmem [shape: f32[32,128], index: 8, kind: input, shape index: {}]   ;;  %s8253_s9 = inlined_call_operand.vmem [shape: f32[1,128], index: 9, kind: input, shape index: {}]   ;;  %s8254_s10 = inlined_call_operand.hbm [shape: f32[5,32,32], index: 10, kind: input, shape index: {}]   ;;  %s8255_s11 = inlined_call_operand.hbm [shape: f32[5,1,32], index: 11, kind: input, shape index: {}]   ;;  %s8256_s12 = inlined_call_operand.vmem [shape: f32[32,64], index: 12, kind: input, shape index: {}]   ;;  %s8257_s13 = inlined_call_operand.hbm [shape: f32[1,64], index: 13, kind: input, shape index: {}]   ;;  %s8258_s14 = inlined_call_operand.vmem [shape: f32[64,32], index: 14, kind: input, shape index: {}]   ;;  %s8259_s15 = inlined_call_operand.hbm [shape: f32[1,32], index: 15, kind: input, shape index: {}]   ;;  %s8260_s16 = inlined_call_operand.hbm [shape: f32[6,1,32], index: 16, kind: input, shape index: {}]   ;;  %s8261_s17 = inlined_call_operand.hbm [shape: f32[6,1,32], index: 17, kind: input, shape index: {}]   ;;  %s8262_s18 = inlined_call_operand.hbm [shape: f32[2,8,32], index: 18, kind: output, shape index: {}]  }
   0x1   :  { %8284 = sst [smem:[#allocation24_spill]] %s8244_s0 }
   0x2   :  { %8285 = sst [smem:[#allocation25_spill]] %s8245_s1 }
   0x3   :  { %8286 = sst [smem:[#allocation26_spill]] %s8246_s2 }
   0x4   :  { %8287 = sst [smem:[#allocation27_spill]] %s8250_s6 }
   0x5   :  { %8288 = sst [smem:[#allocation28_spill]] %s8251_s7 }
   0x6   :  { %8289 = sst [smem:[#allocation29_spill]] %s8254_s10 }
   0x7   :  { %8290 = sst [smem:[#allocation30_spill]] %s8255_s11 }
   0x8   :  { %8291 = sst [smem:[#allocation31_spill]] %s8256_s12 }
   0x9   :  { %8292 = sst [smem:[#allocation32_spill]] %s8257_s13 }
   0xa   :  { %8293 = sst [smem:[#allocation33_spill]] %s8258_s14 }
   0xb   :  { %8294 = sst [smem:[#allocation34_spill]] %s8259_s15 }
   0xc   :  { %8295 = sst [smem:[#allocation35_spill]] %s8260_s16 }
   0xd   :  { %8296 = sst [smem:[#allocation36_spill]] %s8261_s17 }
   0xe   :  { %8297 = sst [smem:[#allocation37_spill]] %s8262_s18 }
   0xf   :  { %23 = vsyncpa [#allocation3], 0 }
  0x10   :  { %25 = vsyncpa [#allocation3 + $0x1], 0 }
  0x11   :  { %26 = vsyncpa [#allocation6], 0 }
  0x12   :  { %27 = vsyncpa [#allocation9], 0 }
  0x13   :  { %28 = vsyncpa [#allocation12], 0 }
  0x14   :  { %29 = vsyncpa [#allocation15], 0 }
  0x15   :  { %30 = vsyncpa [#allocation4], 0 }
  0x16   :  { %32 = vsyncpa [#allocation4 + $0x1], 0  ;;  %s7299_s27 = smov 0   ;;  %s7301_s28 = smov 0  }
  0x17   :  { %s7303_s29 = smov 0   ;;  %s7305_s30 = smov 0  }
  0x18 LB: > { %s7173_s0 = smov [#allocation5]   ;;  %s7320_s1 = sadd.s32 4294967295, %s7171_s30   ;;  %s7171_s30 = sphi %s7305_s30, %s8343_s30   ;;  %s7167_s29 = sphi %s7303_s29, %s8342_s29   ;;  %s7163_s28 = sphi %s7301_s28, %s8341_s28   ;;  %s7159_s27 = sphi %s7299_s27, %s8340_s27  }
  0x19   : > { %s489_s19 = sshll.u32 %s7173_s0, 4  ;;  %p5895_p0 = scmp.ge.s32.totalorder %s7171_s30, 1  ;;  %s490_s19 = int_to_ptr.vmem [resolvable:$true] %s489_s19 }
  0x1a   : > { %p8267_p1 = scmp.eq.s32.totalorder %s7320_s1, 0  ;;  %p477_p2 = scmp.lt.s32.totalorder %s7171_s30, 3 }
  0x1b   : > { %s7174_s21 = smov [#allocation8]   ;;  %s7175_s23 = smov [#allocation11]  }
  0x1c   : > { %p7325_p3 = pnand %p5895_p0, %p477_p2  ;;  %s521_s22 = sshll.u32 %s7174_s21, 4  ;;  %s7338_s22 = int_to_ptr.vmem [resolvable:$true] %s521_s22 }
  0x1d   : > { %s551_s24 = sshll.u32 %s7175_s23, 4  ;;  %s6866_s26 = scalar_lea.vmem %s490_s19, 2560  ;;  %s7340_s24 = int_to_ptr.vmem [resolvable:$true] %s551_s24 }
  0x1e   : > { %s8298_s20 = scalar_select %p7325_p3, 1, 0 }
  0x1f   : > { %p6638_p5 = pneg %p7325_p3  ;;  %p6867_p8 = scmp.ne.s32.totalorder %s490_s19, %s6866_s26 }
  0x20   : > { %p6874_p11 = scmp.lt.s32.totalorder %s490_s19, %s490_s19  ;;  %p6875_p12 = scmp.lt.s32.totalorder %s6866_s26, %s6866_s26 }
  0x21   : > { %p7334_p6 = pnand %p6638_p5, %p8267_p1 }
  0x22   : > { %p6876_p13 = por %p6875_p12, %p6874_p11 }
  0x23   : > { %p7344_p7 = pneg %p7334_p6 }
  0x25   : > { %p6869_p9 = pnand %p6867_p8, %p7344_p7 }
  0x27   : > { %p6870_p10 = pneg %p6869_p9 }
  0x29   : > { %p6877_p0 = pnand %p6876_p13, %p6870_p10 }
  0x2b   : > { %6880 = shalt.err (!%p6877_p0)
}
  0x2c   : > { %s7176_s0 = smov 128   ;;  %s7177_s21 = smov 8  }
  0x2d   : > { %s8301_s6 = sld [smem:[#allocation27_spill]]  ;;  %s6892_s14 = scalar_lea.vmem %s7338_s22, 2560 }
  0x2e   : > { %p6893_p2 = scmp.ne.s32.totalorder %s7338_s22, %s6892_s14  ;;  %p6900_p9 = scmp.lt.s32.totalorder %s7338_s22, %s7338_s22 }
  0x2f   : > { %p6901_p10 = scmp.lt.s32.totalorder %s6892_s14, %s6892_s14 }
  0x30   : > { %p6895_p5 = pnand %p6893_p2, %p7344_p7 }
  0x31   : > { %p6902_p11 = por %p6901_p10, %p6900_p9 }
  0x32   : > { %p6896_p8 = pneg %p6895_p5 }
  0x33   : > { %6641 = dma.hbm_to_vmem [thread:$0]  (!%p7334_p6), %s8301_s6, 2560, %s490_s19, [#allocation6], %s7176_s0, %s7176_s0, %s7177_s21  }
  0x34   : > { %p6903_p12 = pnand %p6902_p11, %p6896_p8 }
  0x36   : > { %6906 = shalt.err (!%p6903_p12)
}
  0x37   : > { %s8302_s10 = sld [smem:[#allocation29_spill]]  ;;  %s6918_s18 = scalar_lea.vmem %s7340_s24, 16 }
  0x38   : > { %p6919_p13 = scmp.ne.s32.totalorder %s7340_s24, %s6918_s18  ;;  %s6925_s14 = scalar_lea.vmem %s7340_s24, 32 }
  0x39   : > { %p6926_p5 = scmp.lt.s32.totalorder %s7340_s24, %s7340_s24  ;;  %p6927_p8 = scmp.lt.s32.totalorder %s6925_s14, %s6918_s18 }
  0x3a   : > { %p6921_p0 = pnand %p6919_p13, %p7344_p7 }
  0x3b   : > { %p6928_p9 = por %p6927_p8, %p6926_p5 }
  0x3c   : > { %p6922_p2 = pneg %p6921_p0 }
  0x3d   : > { %6647 = dma.hbm_to_vmem [thread:$0]  (!%p7334_p6), %s8302_s10, 2560, %s7338_s22, [#allocation9], %s7176_s0, %s7176_s0, %s7177_s21  }
  0x3e   : > { %p6929_p10 = pnand %p6928_p9, %p6922_p2 }
  0x40   : > { %6932 = shalt.err (!%p6929_p10)
}
  0x41   : > { %s8303_s13 = sld [smem:[#allocation32_spill]]  ;;  %s7178_s22 = smov [#allocation14]  }
  0x42   : > { %s575_s0 = sshll.u32 %s7178_s22, 4  ;;  %s7179_s21 = smov [#allocation7]   ;;  %s576_s0 = int_to_ptr.vmem [resolvable:$true] %s575_s0 }
  0x43   : > { %s502_s23 = sshll.u32 %s7179_s21, 4  ;;  %s6944_s26 = scalar_lea.vmem %s576_s0, 96  ;;  %s503_s23 = int_to_ptr.vmem [resolvable:$true] %s502_s23 }
  0x44   : > { %p6945_p11 = scmp.ne.s32.totalorder %s576_s0, %s6944_s26  ;;  %p6952_p0 = scmp.lt.s32.totalorder %s576_s0, %s576_s0 }
  0x45   : > { %p6953_p2 = scmp.lt.s32.totalorder %s6944_s26, %s6944_s26 }
  0x46   : > { %p6947_p12 = pnand %p6945_p11, %p7344_p7 }
  0x47   : > { %6653 = dma.hbm_to_vmem [thread:$0]  (!%p7334_p6), %s8303_s13, 16, %s7340_s24, [#allocation12]  }
  0x48   : > { %p6948_p13 = pneg %p6947_p12  ;;  %p6954_p5 = por %p6953_p2, %p6952_p0 }
  0x4a   : > { %p6955_p8 = pnand %p6954_p5, %p6948_p13 }
  0x4c   : > { %6958 = shalt.err (!%p6955_p8)
}
  0x4d   : > { %s7180_s18 = smov 16   ;;  %s7181_s14 = smov 1  }
  0x4e   : > { %s8304_s16 = sld [smem:[#allocation35_spill]]  ;;  %s6970_s19 = scalar_lea.vmem %s503_s23, 80 }
  0x4f   : > { %p6971_p9 = scmp.ne.s32.totalorder %s503_s23, %s6970_s19  ;;  %s6977_s22 = scalar_lea.vmem %s503_s23, 96 }
  0x50   : > { %p6978_p12 = scmp.lt.s32.totalorder %s503_s23, %s503_s23  ;;  %p6979_p13 = scmp.lt.s32.totalorder %s6977_s22, %s6970_s19 }
  0x51   : > { %p6973_p10 = pnand %p6971_p9, %p7344_p7 }
  0x52   : > { %p6980_p0 = por %p6979_p13, %p6978_p12 }
  0x53   : > { %p6974_p11 = pneg %p6973_p10 }
  0x54   : > { %6659 = dma.hbm_to_vmem [thread:$0]  (!%p7334_p6), %s8304_s16, 96, %s576_s0, [#allocation15], %s7180_s18, %s7180_s18, %s7181_s14  }
  0x55   : > { %p6981_p2 = pnand %p6980_p0, %p6974_p11 }
  0x57   : > { %6984 = shalt.err (!%p6981_p2)
}
  0x58   : > { %s8305_s7 = sld [smem:[#allocation28_spill]]  ;;  %s7182_s0 = smov [#allocation10]  }
  0x59   : > { %s534_s24 = sshll.u32 %s7182_s0, 4  ;;  %s7183_s12 = smov [#allocation13]   ;;  %s535_s24 = int_to_ptr.vmem [resolvable:$true] %s534_s24 }
  0x5a   : > { %s565_s6 = sshll.u32 %s7183_s12, 4  ;;  %s6996_s10 = scalar_lea.vmem %s535_s24, 80  ;;  %s566_s6 = int_to_ptr.vmem [resolvable:$true] %s565_s6 }
  0x5b   : > { %p6997_p5 = scmp.ne.s32.totalorder %s535_s24, %s6996_s10  ;;  %s7003_s19 = scalar_lea.vmem %s535_s24, 96 }
  0x5c   : > { %p7004_p10 = scmp.lt.s32.totalorder %s535_s24, %s535_s24  ;;  %p7005_p11 = scmp.lt.s32.totalorder %s7003_s19, %s6996_s10 }
  0x5d   : > { %p6999_p8 = pnand %p6997_p5, %p7344_p7 }
  0x5e   : > { %6644 = dma.hbm_to_vmem [thread:$0]  (!%p7334_p6), %s8305_s7, 80, %s503_s23, [#allocation6], %s7180_s18, %s7180_s18, %s7181_s14  }
  0x5f   : > { %p7000_p9 = pneg %p6999_p8  ;;  %p7006_p12 = por %p7005_p11, %p7004_p10 }
  0x61   : > { %p7007_p13 = pnand %p7006_p12, %p7000_p9 }
  0x63   : > { %7010 = shalt.err (!%p7007_p13)
}
  0x64   : > { %s8306_s11 = sld [smem:[#allocation30_spill]]  ;;  %s7022_s21 = scalar_lea.vmem %s566_s6, 16 }
  0x65   : > { %p7023_p0 = scmp.ne.s32.totalorder %s566_s6, %s7022_s21  ;;  %s7029_s10 = scalar_lea.vmem %s566_s6, 32 }
  0x66   : > { %p7030_p8 = scmp.lt.s32.totalorder %s566_s6, %s566_s6  ;;  %p7031_p9 = scmp.lt.s32.totalorder %s7029_s10, %s7022_s21 }
  0x67   : > { %p7025_p2 = pnand %p7023_p0, %p7344_p7 }
  0x68   : > { %p7032_p10 = por %p7031_p9, %p7030_p8 }
  0x69   : > { %p7026_p5 = pneg %p7025_p2 }
  0x6a   : > { %6650 = dma.hbm_to_vmem [thread:$0]  (!%p7334_p6), %s8306_s11, 80, %s535_s24, [#allocation9], %s7180_s18, %s7180_s18, %s7181_s14  }
  0x6b   : > { %p7033_p11 = pnand %p7032_p10, %p7026_p5 }
  0x6d   : > { %7036 = shalt.err (!%p7033_p11)
}
  0x6e   : > { %s8307_s15 = sld [smem:[#allocation34_spill]]  ;;  %s7184_s24 = smov [#allocation16]  }
  0x6f   : > { %s588_s12 = sshll.u32 %s7184_s24, 4  ;;  %s589_s12 = int_to_ptr.vmem [resolvable:$true] %s588_s12 }
  0x70   : > { %s7048_s19 = scalar_lea.vmem %s589_s12, 96  ;;  %p7056_p2 = scmp.lt.s32.totalorder %s589_s12, %s589_s12 }
  0x71   : > { %p7049_p12 = scmp.ne.s32.totalorder %s589_s12, %s7048_s19  ;;  %p7057_p4 = scmp.lt.s32.totalorder %s7048_s19, %s7048_s19 }
  0x73   : > { %p7051_p13 = pnand %p7049_p12, %p7344_p7  ;;  %p7058_p8 = por %p7057_p4, %p7056_p2 }
  0x74   : > { %6656 = dma.hbm_to_vmem [thread:$0]  (!%p7334_p6), %s8307_s15, 16, %s566_s6, [#allocation12]  }
  0x75   : > { %p7052_p0 = pneg %p7051_p13 }
  0x77   : > { %p7059_p5 = pnand %p7058_p8, %p7052_p0 }
  0x79   : > { %7062 = shalt.err (!%p7059_p5)
}
  0x7a   : > { %s8308_s17 = sld [smem:[#allocation36_spill]]  ;;  %s5894_s2 = sadd.s32 4294967294, %s7171_s30  }
  0x7b   : > { %s7429_s25 = sadd.s32 1, %s7171_s30   ;;  %s45_s21 = sadd.s32 1, %s7167_s29 }
  0x7c   : > { %s42_s22 = ssub.s32 %s7171_s30, %s7429_s25  ;;  %p52_p7 = scmp.ne.s32.totalorder %s7167_s29, %s7163_s28 }
  0x7d   : > { %p43_p4 = scmp.eq.s32.totalorder %s42_s22, 0  ;;  %p53_p9 = scmp.eq.s32.totalorder %s7171_s30, 0 }
  0x7e   : > { %p58_p10 = scmp.ne.s32.totalorder %s7163_s28, %s7159_s27  ;;  %p464_p12 = scmp.eq.s32.totalorder %s7320_s1, 1 }
  0x7f   : > { %s7440_s10 = scalar_select %p43_p4, %s7167_s29, %s45_s21  }
  0x80   : > { %6662 = dma.hbm_to_vmem [thread:$0]  (!%p7334_p6), %s8308_s17, 96, %s589_s12, [#allocation15], %s7180_s18, %s7180_s18, %s7181_s14  }
  0x81   : > { %p7442_p11 = por %p53_p9, %p52_p7  ;;  %p7448_p6 = por %p8267_p1, %p58_p10 }
  0x82   : > { %p470_p13 = scmp.eq.s32.totalorder %s5894_s2, 1  ;;  %p6679_p0 = scmp.lt.s32.totalorder %s7171_s30, 2 }
  0x83   : > { %s8310_s18 = scalar_select %p7448_p6, 1, 0 }
  0x84   : > { %s602_s14 = sand.u32 1, %s7167_s29   ;;  %p7455_p2 = por %p464_p12, %p52_p7 }
  0x85   : > { %p7459_p8 = por %p470_p13, %p58_p10  ;;  %s5905_s12 = sshll.u32 %s602_s14, 3 }
  0x86   : > { %s8311_s0 = scalar_select %p7455_p2, 1, 0 }
  0x87   : > { %s8312_s24 = scalar_select %p7459_p8, 1, 0 }
  0x88   : > { %s5906_s19 = sshll.u32 %s7171_s30, 7  ;;  %s8313_s22 = sld [smem:[#allocation24_spill]] }
  0x89   : > { %s606_s2 = scalar_lea.vmem [#allocation2], %s5905_s12  ;;  %p7471_p5 = pnand %p6679_p0, %p7442_p11 }
  0x8a   : > { %s613_s7 = sshll.u32 %s606_s2, 4  ;;  %s603_s13 = scalar_lea.sflag [#allocation3], %s602_s14  ;;  %s614_s7 = int_to_ptr.vmem [resolvable:$true] %s613_s7 }
  0x8b   : > { %p7065_p7 = pneg %p7471_p5 }
  0x8e   : > { %s7467_s21 = scalar_lea.hbm %s8313_s22, %s5906_s19  ;;  %s7068_s6 = scalar_lea.hbm %s8313_s22, 256 }
  0x8f   : > { %s7063_s15 = scalar_lea.hbm %s7467_s21, 128  ;;  %p7069_p12 = scmp.lt.s32.totalorder %s7467_s21, %s8313_s22 }
  0x90   : > { %p7064_p4 = scmp.ne.s32.totalorder %s7467_s21, %s7063_s15  ;;  %p7070_p11 = scmp.lt.s32.totalorder %s7068_s6, %s7063_s15 }
  0x92   : > { %p7066_p9 = pnand %p7065_p7, %p7064_p4  ;;  %p7071_p13 = por %p7070_p11, %p7069_p12 }
  0x94   : > { %p7067_p10 = pneg %p7066_p9 }
  0x96   : > { %p7072_p0 = pnand %p7071_p13, %p7067_p10 }
  0x98   : > { %7075 = shalt.err (!%p7072_p0)
}
  0x99   : > { %s7076_s26 = scalar_lea.vmem %s614_s7, 128  ;;  %s7185_s14 = smov [#allocation2]  }
  0x9a   : > { %p7077_p1 = scmp.ne.s32.totalorder %s614_s7, %s7076_s26  ;;  %s7081_s16 = sshll.u32 %s7185_s14, 4  ;;  %s7082_s16 = int_to_ptr.vmem [resolvable:$false] %s7081_s16 }
  0x9b   : > { %s7083_s17 = scalar_lea.vmem %s7082_s16, 256  ;;  %p7084_p4 = scmp.lt.s32.totalorder %s614_s7, %s7082_s16 }
  0x9c   : > { %p7079_p8 = pnand %p7077_p1, %p7065_p7  ;;  %p7085_p9 = scmp.lt.s32.totalorder %s7083_s17, %s7076_s26 }
  0x9e   : > { %p7080_p2 = pneg %p7079_p8  ;;  %p7086_p6 = por %p7085_p9, %p7084_p4 }
  0xa0   : > { %p7087_p3 = pnand %p7086_p6, %p7080_p2 }
  0xa2   : > { %7090 = shalt.err (!%p7087_p3)
}
  0xa3   : > { %6666 = dma.hbm_to_vmem [thread:$0]  (!%p7471_p5), %s7467_s21, 128, %s614_s7, %s603_s13  }
  0xa4   : > { %p8315_p10 = scmp.ne.s32.totalorder %s8298_s20, 0 }
  0xa5   : > { %s7492_s15 = sand.u32 (!%p8315_p10), 1, %s7163_s28   ;;  %p8316_p1 = scmp.ne.s32.totalorder (!%p8315_p10), %s8310_s18, 0 }
  0xa6   : > { %656 = sbr.rel (%p8315_p10) target bundleno = 10911 (0x2a9f), region = 92  ;;  %s8271_s19 = sshll.u32 (!%p8315_p10), %s7492_s15, 3 }
  0xa7   : > { %s659_s16 = scalar_lea.sflag (!%p8315_p10), [#allocation3], %s7492_s15  ;;  %s662_s17 = scalar_lea.vmem (!%p8315_p10), [#allocation2], %s8271_s19 }
  0xab   : > { %7134 = dma.done.wait (%p8316_p1), %s659_s16, 128  }
  0xac   : > { %7136 = vsyncadd (%p8316_p1), %s659_s16, 4294967168  ;;  %p8317_p3 = scmp.eq.s32.totalorder %s7320_s1, 0 }
  0xae   : > { %7138 = dma.done.wait (%p8317_p3), [#allocation6], 2640   ;;  %p8318_p6 = pmov %p8317_p3 }
  0xaf   : > { %p8319_p2 = pmov %p8317_p3 }
  0xb0   : > { %7140 = vsyncadd (%p8318_p6), [#allocation6], 4294964656 }
  0xb1   : > { %7142 = dma.done.wait (%p8319_p2), [#allocation9], 2640   ;;  %p8320_p8 = pmov %p8319_p2 }
  0xb2   : > { %p8321_p5 = pmov %p8319_p2 }
  0xb3   : > { %7144 = vsyncadd (%p8320_p8), [#allocation9], 4294964656 }
  0xb4   : > { %7146 = dma.done.wait (%p8321_p5), [#allocation12], 32   ;;  %p8322_p7 = pmov %p8319_p2 }
  0xb5   : > { %p8323_p12 = pmov %p8319_p2 }
  0xb6   : > { %7148 = vsyncadd (%p8322_p7), [#allocation12], 4294967264 }
  0xb7   : > { %7150 = dma.done.wait (%p8323_p12), [#allocation15], 192   ;;  %p8324_p11 = pmov %p8319_p2 }
  0xb8   : > { %vm803_vm0 = vcmask 261120   ;;  %v7518_v0 = vld [vmem:[%s662_s17] sm:$0xff]  ;;  %v795_v7 = vld [vmem:[%s8252_s8 + $0x18] sm:$0xff]  ;;  %v794_v8 = vld [vmem:[%s8252_s8 + $0x10] sm:$0xff]  ;;  %p766_p13 = scmp.lt.s32.totalorder %s7320_s1, 1  ;;  %v7186_v9 = vmov 0.0  }
  0xb9   : > { %7152 = vsyncadd (%p8324_p11), [#allocation15], 4294967104  ;;  %v887_v1 = vsel %vm803_vm0, %v7518_v0, 0.0  ;;  %6208 = vmatprep.subr.mxu1 %v795_v7  ;;  %6230 = vmatprep.subr.mxu0 %v7186_v9  ;;  %v793_v10 = vld [vmem:[%s8252_s8 + $0x8] sm:$0xff]  ;;  %vm7187_vm1 = vmmov 0   ;;  %v792_v11 = vld [vmem:[%s8252_s8] sm:$0xff] }
  0xba   : > { %888 = vadd.xlane.f32.xlu0 %v887_v1  ;;  %6209 = vmatpush3.msra.mxu1 %v795_v7  ;;  %s7536_s23 = scalar_select %p766_p13, %s7320_s1, 1  ;;  %v925_v14 = vld [vmem:[#allocation5 + $0x18] sm:$0xff]  ;;  %v924_v15 = vld [vmem:[#allocation5 + $0x10] sm:$0xff]  ;;  %v923_v16 = vld [vmem:[#allocation5 + $0x8] sm:$0xff]  ;;  %vm1009_vm4 = vcmask 64512   ;;  %vm1679_vm5 = vcmask 130048  }
  0xbb   : > { %6232 = vmatprep.mubr.msk.f32.mxu0 %vm7187_vm1, %v7186_v9  ;;  %6210 = vmatprep.subr.mxu1 %v794_v8  ;;  %s8325_s16 = sld [smem:[#allocation26_spill]]  ;;  %v922_v17 = vld [vmem:[#allocation5] sm:$0xff]  ;;  %v5925_v27 = vld [vmem:[#allocation14] ss:$0 sm:$0xff]  ;;  %v5926_v29 = vld [vmem:[#allocation16] ss:$0 sm:$0xff] }
  0xbc   : > { %6211 = vmatpush3.msra.mxu1 %v794_v8  ;;  %s6036_s2 = sshll.u32 %s7536_s23, 4  ;;  %v5927_v34 = vld [vmem:[#allocation7] ss:$0 sm:$0xff]  ;;  %s7188_s7 = smov 120   ;;  %vm1681_vm6 = vcmask 195584  }
  0xbd   : > { %6212 = vmatprep.subr.mxu1 %v793_v10  ;;  %s7189_s11 = smov 96   ;;  %s8280_s13 = smov 88  }
  0xbe   : > { %6213 = vmatpush3.msra.mxu1 %v793_v10  ;;  %s7191_s20 = smov 80   ;;  %s7192_s18 = smov 112  }
  0xbf   : > { %6214 = vmatprep.subr.mxu1 %v792_v11  ;;  %s7193_s21 = smov 72   ;;  %s7194_s6 = smov 104  }
  0xc0   : > { %6215 = vmatpush3.msra.mxu1 %v792_v11  ;;  %s5918_s12 = sshll.u32 %s7536_s23, 3  ;;  %s8272_s26 = smov 56  }
  0xc1   : > { %s774_s17 = scalar_lea.vmem %s8325_s16, %s6036_s2  ;;  %6219 = vmatprep.subr.mxu1 %v7186_v9  ;;  %s778_s14 = scalar_lea.vmem %s8247_s3, %s5918_s12 }
  0xc2   : > { %v787_v12 = vld [vmem:[%s774_s17] sm:$0xff]  ;;  %v788_v13 = vld [vmem:[%s774_s17 + $0x8] sm:$0xff]  ;;  %s8278_s16 = smov 64   ;;  %s8276_s17 = smov 48  }
  0xc3   : > { %6216 = vmatprep.mubr.msk.f32.mxu1 %vm803_vm0, %v787_v12  ;;  %v789_v45 = vld [vmem:[%s778_s14] sm:$0xff]  ;;  %s8274_s2 = smov 40   ;;  %s7199_s14 = smov 8  }
  0xc4   : > { %6217 = vmatmul.mubr.msk.f32.vlgmr.msra.gmra.mxu1 %vm803_vm0, %v788_v13  ;;  %s7200_s19 = smov 16   ;;  %p8337_p4 = scmp.ne.s32.totalorder %s8311_s0, 0 }
  0xc5   : > { %6220 = vmatpush3.msra.mxu1 %v925_v14  ;;  %6227 = vmatprep.mubr.msk.f32.mxu1 %vm7187_vm1, %v7186_v9 }
  0xc6   : > { %6221 = vmatprep.subr.mxu1 %v7186_v9 }
  0xc7   : > { %6222 = vmatpush3.msra.mxu1 %v924_v15 }
  0xc8   : > { %6223 = vmatprep.subr.mxu1 %v7186_v9 }
  0xc9   : > { %6224 = vmatpush3.msra.mxu1 %v923_v16 }
  0xca   : > { %6225 = vmatprep.subr.mxu1 %v7186_v9 }
  0xcb   : > { %6226 = vmatpush3.msra.mxu1 %v922_v17 }
  0xcc   : > { %6235 = vmatprep.subr.mxu1 %v7186_v9 }
 0x143   : > { %v889_v2 = vpop.xlane.xlu0 %888 }
 0x144   : > { %v891_v3 = vmul.f32 0.03125, %v889_v2 }
 0x146   : > { %v892_v4 = vsub.f32 %v7518_v0, %v891_v3 }
 0x148   : > { %v893_v5 = vmul.f32 %v892_v4, %v892_v4 }
 0x14a   : > { %v894_v6 = vsel %vm803_vm0, %v893_v5, 0.0 }
 0x14b   : > { %895 = vadd.xlane.f32.xlu0 %v894_v6 }
 0x184   : > { %v7559_v32 = vpop.f32.mrf.mxu1 }
 0x186   : > { %v7561_v33 = vpop.f32.mrf.mxu1 }
 0x1d4   : > { %v896_v18 = vpop.xlane.xlu0 %895 }
 0x1d5   : > { %v897_v19 = vmul.f32 0.032258064, %v896_v18 }
 0x1d7   : > { %6750 = vrsqrt.f32 %v897_v19  ;;  %vm900_vm2 = vcmp.eq.f32.partialorder %v897_v19, inf  ;;  %v903_v22 = vand.u32 2147483648, %v897_v19  ;;  %vm902_vm3 = vcmp.eq.f32.partialorder %v897_v19, 0.0 }
 0x1e4   : > { %v6751_v20 = vpop.eup %6750 }
 0x1e5   : > { %v899_v21 = vmul.f32 %v6751_v20, %v897_v19 }
 0x1e7   : > { %v901_v23 = vsel %vm900_vm2, %v897_v19, %v899_v21  ;;  %vm5596_vm2 = vcmask 523264  }
 0x1e8   : > { %v904_v24 = vsel %vm902_vm3, %v903_v22, %v901_v23 }
 0x1e9   : > { %v905_v25 = vadd.f32 1e-06, %v904_v24 }
 0x1eb   : > { %6752 = vrcp.f32 %v905_v25 }
 0x1f8   : > { %v6753_v26 = vpop.eup %6752 }
 0x1f9   : > { %v907_v28 = vmul.f32 %v6753_v26, %v892_v4 }
 0x1fb   : > { %v914_v30 = vmul.f32 %v5925_v27, %v907_v28 }
 0x1fd   : > { %v921_v31 = vadd.f32 %v5926_v29, %v914_v30 }
 0x1ff   : > { %6228 = vmatmul.mubr.msk.f32.vlgmr.msra.gmra.mxu1 %vm803_vm0, %v921_v31 }
 0x200   : > { %6237 = vmatprep.mubr.msk.f32.mxu1 %vm7187_vm1, %v7186_v9 }
 0x2bf   : > { %v1002_v35 = vpop.f32.mrf.mxu1 }
 0x2c0   : > { %v7563_v36 = vadd.f32 %v5927_v34, %v1002_v35 }
 0x2c1   : > { %v6229_v37 = vpop.f32.mrf.mxu1 }
 0x2c2   : > { %1171 = vrot.lane.b32.xlu0 %v7563_v36, %s7188_s7  ;;  %1007 = vrot.lane.b32.xlu1 %v7563_v36, %s7189_s11 }
 0x2c6   : > { %1173 = vrot.lane.b32.xlu1 %v7563_v36, %s8280_s13 }
 0x2ca   : > { %1338 = vrot.lane.b32.xlu1 %v7563_v36, %s7191_s20 }
 0x2ce   : > { %1336 = vrot.lane.b32.xlu1 %v7563_v36, %s7192_s18 }
 0x2d2   : > { %1503 = vrot.lane.b32.xlu1 %v7563_v36, %s7193_s21 }
 0x2d6   : > { %1501 = vrot.lane.b32.xlu1 %v7563_v36, %s7194_s6 }
 0x334   : > { %v1008_v38 = vpop.permute.xlu1 %1007  ;;  %v1172_v40 = vpop.permute.xlu0 %1171 }
 0x335   : > { %6231 = vmatpush3.xpose.msk.msra.mxu0 %vm1009_vm4, %v1008_v38  ;;  %v1686_v38 = vld [vmem:[#allocation8 + $0x18] sm:$0xff] }
 0x336   : > { %6240 = vmatprep.subr.mxu0 %v7186_v9 }
 0x338   : > { %6233 = vmatmul.mubr.msk.f32.vlgmr.msra.gmra.mxu0 %vm1009_vm4, %v7563_v36  ;;  %v1174_v39 = vpop.permute.xlu1 %1173 }
 0x339   : > { %6241 = vmatpush3.xpose.msk.msra.mxu0 %vm1009_vm4, %v1174_v39  ;;  %6242 = vmatprep.mubr.msk.f32.mxu0 %vm7187_vm1, %v7186_v9  ;;  %v1685_v39 = vld [vmem:[#allocation8 + $0x10] sm:$0xff] }
 0x33a   : > { %6250 = vmatprep.subr.mxu0 %v7186_v9 }
 0x33c   : > { %6243 = vmatmul.mubr.msk.f32.vlgmr.msra.gmra.mxu0 %vm1009_vm4, %v1172_v40  ;;  %v1339_v41 = vpop.permute.xlu1 %1338 }
 0x33d   : > { %6251 = vmatpush3.xpose.msk.msra.mxu0 %vm1009_vm4, %v1339_v41  ;;  %6252 = vmatprep.mubr.msk.f32.mxu0 %vm7187_vm1, %v7186_v9  ;;  %v1684_v41 = vld [vmem:[#allocation8 + $0x8] sm:$0xff] }
 0x33e   : > { %6260 = vmatprep.subr.mxu0 %v7186_v9 }
 0x340   : > { %v1337_v42 = vpop.permute.xlu1 %1336 }
 0x341   : > { %6253 = vmatmul.mubr.msk.f32.vlgmr.msra.gmra.mxu0 %vm1009_vm4, %v1337_v42 }
 0x342   : > { %6262 = vmatprep.mubr.msk.f32.mxu0 %vm7187_vm1, %v7186_v9 }
 0x344   : > { %v1504_v43 = vpop.permute.xlu1 %1503 }
 0x345   : > { %6261 = vmatpush3.xpose.msk.msra.mxu0 %vm1009_vm4, %v1504_v43  ;;  %v1683_v43 = vld [vmem:[#allocation8] sm:$0xff] }
 0x346   : > { %6270 = vmatprep.subr.mxu0 %v7186_v9 }
 0x348   : > { %v1502_v44 = vpop.permute.xlu1 %1501 }
 0x349   : > { %6263 = vmatmul.mubr.msk.f32.vlgmr.msra.gmra.mxu0 %vm1009_vm4, %v1502_v44 }
 0x34a   : > { %6278 = vmatprep.mubr.msk.f32.mxu0 %vm7187_vm1, %v7186_v9  ;;  %6271 = vmatpush3.msra.mxu0 %v1686_v38 }
 0x34b   : > { %6272 = vmatprep.subr.mxu0 %v7186_v9 }
 0x34c   : > { %6273 = vmatpush3.msra.mxu0 %v1685_v39 }
 0x34d   : > { %6274 = vmatprep.subr.mxu0 %v7186_v9 }
 0x34e   : > { %6275 = vmatpush3.msra.mxu0 %v1684_v41 }
 0x34f   : > { %6276 = vmatprep.subr.mxu0 %v7186_v9 }
 0x350   : > { %6277 = vmatpush3.msra.mxu0 %v1683_v43 }
 0x351   : > { %6292 = vmatprep.subr.mxu0 %v7186_v9 }
 0x3f8   : > { %v1080_v46 = vpop.f32.mrf.mxu0 }
 0x3f9   : > { %v1081_v47 = vadd.f32 %v1080_v46, %v789_v45 }
 0x3fa   : > { %v6234_v48 = vpop.f32.mrf.mxu0 }
 0x3fb   : > { %v1084_v49 = vsel %vm1009_vm4, %v1081_v47, -inf }
 0x3fc   : > { %1085 = vmax.xlane.f32.xlu1 %v1084_v49  ;;  %v1245_v50 = vpop.f32.mrf.mxu0 }
 0x3fd   : > { %v1246_v51 = vadd.f32 %v1245_v50, %v789_v45 }
 0x3fe   : > { %v6244_v52 = vpop.f32.mrf.mxu0 }
 0x3ff   : > { %v1249_v53 = vsel %vm1009_vm4, %v1246_v51, -inf  ;;  %v5922_v52 = vld [vmem:[%s8253_s9] ss:$0 sm:$0xff] }
 0x400   : > { %1250 = vmax.xlane.f32.xlu0 %v1249_v53 }
 0x401   : > { %v1410_v54 = vpop.f32.mrf.mxu0 }
 0x402   : > { %v1411_v55 = vadd.f32 %v1410_v54, %v789_v45 }
 0x403   : > { %v6254_v56 = vpop.f32.mrf.mxu0 }
 0x404   : > { %v1414_v57 = vsel %vm1009_vm4, %v1411_v55, -inf  ;;  %v7651_v56 = vadd.f32 %v7559_v32, %v5922_v52  ;;  %v5941_v32 = vld [vmem:[#allocation10] ss:$0 sm:$0xff] }
 0x405   : > { %1415 = vmax.xlane.f32.xlu1 %v1414_v57 }
 0x409   : > { %v1575_v58 = vpop.f32.mrf.mxu0 }
 0x40a   : > { %v1576_v59 = vadd.f32 %v1575_v58, %v789_v45  ;;  %v7661_v58 = vadd.f32 %v5922_v52, %v7561_v33 }
 0x40b   : > { %v6264_v60 = vpop.f32.mrf.mxu0 }
 0x40c   : > { %v1579_v61 = vsel %vm1009_vm4, %v1576_v59, -inf }
 0x40d   : > { %1580 = vmax.xlane.f32.xlu0 %v1579_v61 }
 0x416   : > { %1095 = vrot.lane.b32.xlu1 %v7563_v36, %s8278_s16  ;;  %s7694_s16 = scalar_lea.vmem %s8248_s4, %s7536_s23 }
 0x485   : > { %v1086_v62 = vpop.xlane.xlu1 %1085 }
 0x486   : > { %v1087_v63 = vsub.f32 %v1081_v47, %v1086_v62 }
 0x488   : > { %v1088_v1 = vmul.f32 1.442695, %v1087_v63 }
 0x489   : > { %v1251_v2 = vpop.xlane.xlu0 %1250 }
 0x48a   : > { %6754 = vpow2.f32 %v1088_v1  ;;  %v1252_v3 = vsub.f32 %v1246_v51, %v1251_v2 }
 0x48c   : > { %v1253_v4 = vmul.f32 1.442695, %v1252_v3 }
 0x48e   : > { %6756 = vpow2.f32 %v1253_v4  ;;  %v1416_v5 = vpop.xlane.xlu1 %1415 }
 0x48f   : > { %v1417_v6 = vsub.f32 %v1411_v55, %v1416_v5  ;;  %v1809_v5 = vld [vmem:[#allocation5 + $0x30] sm:$0xff] }
 0x491   : > { %v1418_v7 = vmul.f32 1.442695, %v1417_v6  ;;  %v1808_v6 = vld [vmem:[#allocation5 + $0x28] sm:$0xff] }
 0x492   : > { %v1096_v8 = vpop.permute.xlu1 %1095 }
 0x493   : > { %6758 = vpow2.f32 %v1418_v7  ;;  %6236 = vmatpush3.msra.mxu1 %v1096_v8  ;;  %v1807_v7 = vld [vmem:[#allocation5 + $0x20] sm:$0xff] }
 0x494   : > { %6245 = vmatprep.subr.mxu1 %v7186_v9 }
 0x496   : > { %v1581_v10 = vpop.xlane.xlu0 %1580 }
 0x497   : > { %v6755_v11 = vpop.eup %6754  ;;  %v1582_v12 = vsub.f32 %v1576_v59, %v1581_v10 }
 0x498   : > { %v1090_v13 = vsel %vm1009_vm4, %v6755_v11, 0.0 }
 0x499   : > { %v1583_v14 = vmul.f32 1.442695, %v1582_v12  ;;  %1091 = vadd.xlane.f32.xlu1 %v1090_v13 }
 0x49b   : > { %v6757_v15 = vpop.eup %6756  ;;  %6760 = vpow2.f32 %v1583_v14 }
 0x49c   : > { %v1255_v16 = vsel %vm1009_vm4, %v6757_v15, 0.0 }
 0x49d   : > { %1256 = vadd.xlane.f32.xlu0 %v1255_v16 }
 0x4a0   : > { %v6759_v17 = vpop.eup %6758 }
 0x4a1   : > { %v1420_v18 = vsel %vm1009_vm4, %v6759_v17, 0.0 }
 0x4a2   : > { %1421 = vadd.xlane.f32.xlu1 %v1420_v18  ;;  %v5943_v18 = vld [vmem:[#allocation14 + $0x1] ss:$0 sm:$0xff] }
 0x4a8   : > { %v6761_v19 = vpop.eup %6760 }
 0x4a9   : > { %v1585_v20 = vsel %vm1009_vm4, %v6761_v19, 0.0 }
 0x4aa   : > { %1586 = vadd.xlane.f32.xlu0 %v1585_v20  ;;  %v5944_v20 = vld [vmem:[#allocation16 + $0x1] ss:$0 sm:$0xff] }
 0x4b3   : > { %1425 = vrot.lane.b32.xlu1 %v7563_v36, %s8276_s17  ;;  %s8331_s17 = smov 40  }
 0x4b7   : > { %1590 = vrot.lane.b32.xlu1 %v7563_v36, %s8274_s2  ;;  %s784_s2 = scalar_lea.vmem %s8249_s5, %s7536_s23  ;;  %s8329_s23 = smov 64  }
 0x4c0   : > { %1260 = vrot.lane.b32.xlu0 %v7563_v36, %s8272_s26  ;;  %s8282_s26 = smov 24  }
 0x522   : > { %v1092_v21 = vpop.xlane.xlu1 %1091 }
 0x523   : > { %6762 = vrcp.f32 %v1092_v21 }
 0x526   : > { %v1257_v22 = vpop.xlane.xlu0 %1256 }
 0x527   : > { %6764 = vrcp.f32 %v1257_v22 }
 0x52b   : > { %v1422_v23 = vpop.xlane.xlu1 %1421 }
 0x52c   : > { %6766 = vrcp.f32 %v1422_v23  ;;  %v5945_v23 = vld [vmem:[#allocation7 + $0x1] ss:$0 sm:$0xff] }
 0x52f   : > { %v1426_v28 = vpop.permute.xlu1 %1425 }
 0x530   : > { %v6763_v24 = vpop.eup %6762 }
 0x531   : > { %v1094_v25 = vmul.f32 %v6763_v24, %v6755_v11 }
 0x533   : > { %v1587_v26 = vpop.xlane.xlu0 %1586  ;;  %6238 = vmatmul.mubr.msk.f32.vlgmr.msra.gmra.mxu1 %vm1009_vm4, %v1094_v25  ;;  %v1591_v35 = vpop.permute.xlu1 %1590 }
 0x534   : > { %v6765_v27 = vpop.eup %6764  ;;  %6768 = vrcp.f32 %v1587_v26  ;;  %6247 = vmatprep.mubr.msk.f32.mxu1 %vm7187_vm1, %v7186_v9 }
 0x535   : > { %v1259_v30 = vmul.f32 %v6765_v27, %v6757_v15  ;;  %v7697_v27 = vld [vmem:[%s7694_s16] ss:$0 sm:$0xff] }
 0x537   : > { %v1261_v29 = vpop.permute.xlu0 %1260 }
 0x538   : > { %6246 = vmatpush3.msra.mxu1 %v1261_v29 }
 0x539   : > { %v6767_v31 = vpop.eup %6766  ;;  %6248 = vmatmul.mubr.msk.f32.vlgmr.msra.gmra.mxu1 %vm1009_vm4, %v1259_v30  ;;  %6255 = vmatprep.subr.mxu1 %v7186_v9 }
 0x53a   : > { %6256 = vmatpush3.msra.mxu1 %v1426_v28  ;;  %6257 = vmatprep.mubr.msk.f32.mxu1 %vm7187_vm1, %v7186_v9  ;;  %v1424_v34 = vmul.f32 %v6767_v31, %v6759_v17 }
 0x53b   : > { %6265 = vmatprep.subr.mxu1 %v7186_v9 }
 0x53d   : > { %6258 = vmatmul.mubr.msk.f32.vlgmr.msra.gmra.mxu1 %vm1009_vm4, %v1424_v34 }
 0x53e   : > { %6266 = vmatpush3.msra.mxu1 %v1591_v35  ;;  %6267 = vmatprep.mubr.msk.f32.mxu1 %vm7187_vm1, %v7186_v9 }
 0x53f   : > { %6281 = vmatprep.subr.mxu1 %v7186_v9 }
 0x541   : > { %v6769_v36 = vpop.eup %6768 }
 0x542   : > { %v1589_v37 = vmul.f32 %v6769_v36, %v6761_v19 }
 0x544   : > { %6268 = vmatmul.mubr.msk.f32.vlgmr.msra.gmra.mxu1 %vm1009_vm4, %v1589_v37 }
 0x545   : > { %6289 = vmatprep.mubr.msk.f32.mxu1 %vm7187_vm1, %v7186_v9 }
 0x5f3   : > { %v1167_v40 = vpop.f32.mrf.mxu1 }
 0x5f5   : > { %v6239_v42 = vpop.f32.mrf.mxu1 }
 0x5f9   : > { %v1332_v44 = vpop.f32.mrf.mxu1 }
 0x5fa   : > { %1667 = vrot.lane.b32.xlu0 %v1332_v44, %s7199_s14 }
 0x5fb   : > { %v6249_v45 = vpop.f32.mrf.mxu1 }
 0x5fd   : > { %v1497_v46 = vpop.f32.mrf.mxu1 }
 0x5fe   : > { %1671 = vrot.lane.b32.xlu1 %v1497_v46, %s7200_s19 }
 0x5ff   : > { %v6259_v47 = vpop.f32.mrf.mxu1 }
 0x604   : > { %v1662_v48 = vpop.f32.mrf.mxu1 }
 0x605   : > { %1675 = vrot.lane.b32.xlu0 %v1662_v48, %s8282_s26 }
 0x606   : > { %v6269_v49 = vpop.f32.mrf.mxu1 }
 0x66c   : > { %v1668_v50 = vpop.permute.xlu0 %1667 }
 0x66d   : > { %v1678_v53 = vsel %vm1009_vm4, %v1167_v40, %v1668_v50 }
 0x670   : > { %v1672_v51 = vpop.permute.xlu1 %1671 }
 0x671   : > { %v1680_v54 = vsel %vm1679_vm5, %v1678_v53, %v1672_v51 }
 0x677   : > { %v1676_v55 = vpop.permute.xlu0 %1675 }
 0x678   : > { %v1682_v57 = vsel %vm1681_vm6, %v1680_v54, %v1676_v55 }
 0x679   : > { %6279 = vmatmul.mubr.msk.f32.vlgmr.msra.gmra.mxu0 %vm803_vm0, %v1682_v57 }
 0x67a   : > { %6293 = vmatpush3.xpose.msk.msra.mxu0 %vm1009_vm4, %v7651_v56  ;;  %6296 = vmatprep.mubr.msk.f32.mxu0 %vm7187_vm1, %v7186_v9 }
 0x67b   : > { %6294 = vmatprep.subr.mxu0 %v7186_v9 }
 0x67e   : > { %6295 = vmatpush3.xpose.msk.msra.mxu0 %vm1009_vm4, %v7661_v58 }
 0x67f   : > { %6313 = vmatprep.subr.mxu0 %v7186_v9 }
 0x739   : > { %v1763_v59 = vpop.f32.mrf.mxu0 }
 0x73a   : > { %v1764_v60 = vadd.f32 %v5941_v32, %v1763_v59 }
 0x73b   : > { %v6280_v61 = vpop.f32.mrf.mxu0 }
 0x73c   : > { %v7667_v62 = vadd.f32 %v1764_v60, %v7518_v0  ;;  %v1810_v0 = vld [vmem:[#allocation5 + $0x38] sm:$0xff] }
 0x73d   : > { %6282 = vmatpush3.msra.mxu1 %v1810_v0 }
 0x73e   : > { %v1772_v63 = vsel %vm803_vm0, %v7667_v62, 0.0  ;;  %6283 = vmatprep.subr.mxu1 %v7186_v9 }
 0x73f   : > { %1773 = vadd.xlane.f32.xlu1 %v1772_v63  ;;  %6284 = vmatpush3.msra.mxu1 %v1809_v5 }
 0x740   : > { %6285 = vmatprep.subr.mxu1 %v7186_v9 }
 0x741   : > { %6286 = vmatpush3.msra.mxu1 %v1808_v6 }
 0x742   : > { %6287 = vmatprep.subr.mxu1 %v7186_v9 }
 0x743   : > { %6288 = vmatpush3.msra.mxu1 %v1807_v7 }
 0x744   : > { %6299 = vmatprep.subr.mxu1 %v7186_v9 }
 0x750   : > { %1988 = vrot.lane.b32.xlu1 %v7661_v58, %s7189_s11 }
 0x754   : > { %2071 = vrot.lane.b32.xlu1 %v7651_v56, %s7188_s7 }
 0x7c8   : > { %v1774_v33 = vpop.xlane.xlu1 %1773 }
 0x7c9   : > { %v1775_v1 = vmul.f32 0.03125, %v1774_v33 }
 0x7cb   : > { %v1776_v2 = vsub.f32 %v7667_v62, %v1775_v1 }
 0x7cc   : > { %v1989_v38 = vpop.permute.xlu1 %1988 }
 0x7cd   : > { %v1777_v3 = vmul.f32 %v1776_v2, %v1776_v2 }
 0x7cf   : > { %v1778_v4 = vsel %vm803_vm0, %v1777_v3, 0.0 }
 0x7d0   : > { %1779 = vadd.xlane.f32.xlu0 %v1778_v4  ;;  %v2072_v41 = vpop.permute.xlu1 %2071 }
 0x859   : > { %v1780_v8 = vpop.xlane.xlu0 %1779 }
 0x85a   : > { %v1781_v10 = vmul.f32 0.032258064, %v1780_v8 }
 0x85c   : > { %6770 = vrsqrt.f32 %v1781_v10  ;;  %vm1784_vm7 = vcmp.eq.f32.partialorder %v1781_v10, inf  ;;  %v1787_v13 = vand.u32 2147483648, %v1781_v10  ;;  %vm1786_vm8 = vcmp.eq.f32.partialorder %v1781_v10, 0.0 }
 0x869   : > { %v6771_v11 = vpop.eup %6770 }
 0x86a   : > { %v1783_v12 = vmul.f32 %v6771_v11, %v1781_v10 }
 0x86c   : > { %v1785_v14 = vsel %vm1784_vm7, %v1781_v10, %v1783_v12 }
 0x86d   : > { %v1788_v15 = vsel %vm1786_vm8, %v1787_v13, %v1785_v14 }
 0x86e   : > { %v1789_v16 = vadd.f32 1e-06, %v1788_v15 }
 0x870   : > { %6772 = vrcp.f32 %v1789_v16 }
 0x87d   : > { %v6773_v17 = vpop.eup %6772 }
 0x87e   : > { %v1791_v19 = vmul.f32 %v6773_v17, %v1776_v2 }
 0x880   : > { %v1798_v21 = vmul.f32 %v5943_v18, %v1791_v19 }
 0x882   : > { %v1805_v22 = vadd.f32 %v5944_v20, %v1798_v21 }
 0x884   : > { %6290 = vmatmul.mubr.msk.f32.vlgmr.msra.gmra.mxu1 %vm803_vm0, %v1805_v22 }
 0x885   : > { %6303 = vmatprep.mubr.msk.f32.mxu1 %vm7187_vm1, %v7186_v9 }
 0x944   : > { %v1888_v24 = vpop.f32.mrf.mxu1 }
 0x945   : > { %v7684_v25 = vadd.f32 %v5945_v23, %v1888_v24 }
 0x946   : > { %v6291_v26 = vpop.f32.mrf.mxu1 }
 0x947   : > { %6297 = vmatmul.mubr.msk.f32.vlgmr.msra.gmra.mxu0 %vm1009_vm4, %v7684_v25 }
 0x948   : > { %6317 = vmatprep.mubr.msk.f32.mxu0 %vm7187_vm1, %v7186_v9 }
 0xa07   : > { %v1973_v28 = vpop.f32.mrf.mxu0 }
 0xa08   : > { %v1974_v29 = vadd.f32 %v7697_v27, %v1973_v28 }
 0xa09   : > { %v6298_v30 = vpop.f32.mrf.mxu0 }
 0xa0a   : > { %v1977_v31 = vsel %vm1679_vm5, %v1974_v29, -inf }
 0xa0b   : > { %1978 = vmax.xlane.f32.xlu0 %v1977_v31  ;;  %v2727_v31 = vld [vmem:[#allocation5 + $0x58] sm:$0xff] }
 0xa21   : > { %1990 = vrot.lane.b32.xlu0 %v7651_v56, %s7189_s11 }
 0xa25   : > { %2069 = vrot.lane.b32.xlu0 %v7661_v58, %s7188_s7 }
 0xa94   : > { %v1979_v34 = vpop.xlane.xlu0 %1978 }
 0xa95   : > { %v1980_v35 = vsub.f32 %v1974_v29, %v1979_v34  ;;  %v2726_v34 = vld [vmem:[#allocation5 + $0x50] sm:$0xff] }
 0xa97   : > { %v1981_v36 = vmul.f32 1.442695, %v1980_v35  ;;  %v2725_v35 = vld [vmem:[#allocation5 + $0x48] sm:$0xff] }
 0xa98   : > { %v1991_v37 = vpop.permute.xlu0 %1990 }
 0xa99   : > { %6774 = vpow2.f32 %v1981_v36  ;;  %6300 = vmatpush3.msra.mxu1 %v1991_v37  ;;  %v2724_v36 = vld [vmem:[#allocation5 + $0x40] sm:$0xff] }
 0xa9a   : > { %6301 = vmatprep.subr.mxu1 %v7186_v9 }
 0xa9b   : > { %6302 = vmatpush3.msra.mxu1 %v1989_v38 }
 0xa9c   : > { %6306 = vmatprep.subr.mxu1 %v7186_v9  ;;  %v2070_v45 = vpop.permute.xlu0 %2069 }
 0xaa6   : > { %v6775_v39 = vpop.eup %6774 }
 0xaa7   : > { %v1983_v40 = vsel %vm1679_vm5, %v6775_v39, 0.0 }
 0xaa8   : > { %1984 = vadd.xlane.f32.xlu1 %v1983_v40 }
 0xab9   : > { %2067 = vrot.lane.b32.xlu1 %v7684_v25, %s7188_s7 }
 0xabd   : > { %2160 = vrot.lane.b32.xlu1 %v7661_v58, %s8280_s13 }
 0xb31   : > { %v1985_v42 = vpop.xlane.xlu1 %1984 }
 0xb32   : > { %6776 = vrcp.f32 %v1985_v42 }
 0xb35   : > { %v2068_v46 = vpop.permute.xlu1 %2067 }
 0xb39   : > { %v2161_v32 = vpop.permute.xlu1 %2160 }
 0xb3f   : > { %v6777_v43 = vpop.eup %6776 }
 0xb40   : > { %v1987_v44 = vmul.f32 %v6777_v43, %v6775_v39 }
 0xb42   : > { %6304 = vmatmul.mubr.msk.f32.vlgmr.msra.gmra.mxu1 %vm1679_vm5, %v1987_v44 }
 0xb43   : > { %6307 = vmatpush3.xpose.msk.msra.mxu1 %vm1009_vm4, %v2072_v41  ;;  %6310 = vmatprep.mubr.msk.f32.mxu1 %vm7187_vm1, %v7186_v9 }
 0xb44   : > { %6308 = vmatprep.subr.mxu1 %v7186_v9 }
 0xb47   : > { %6309 = vmatpush3.xpose.msk.msra.mxu1 %vm1009_vm4, %v2070_v45 }
 0xb48   : > { %6327 = vmatprep.subr.mxu1 %v7186_v9 }
 0xb4a   : > { %6311 = vmatmul.mubr.msk.f32.vlgmr.msra.gmra.mxu1 %vm1009_vm4, %v2068_v46 }
 0xb4b   : > { %6331 = vmatprep.mubr.msk.f32.mxu1 %vm7187_vm1, %v7186_v9 }
 0xc02   : > { %v7722_v47 = vpop.f32.mrf.mxu1 }
 0xc04   : > { %v6305_v48 = vpop.f32.mrf.mxu1 }
 0xc0a   : > { %v2145_v49 = vpop.f32.mrf.mxu1 }
 0xc0b   : > { %v2146_v50 = vadd.f32 %v7697_v27, %v2145_v49 }
 0xc0c   : > { %v6312_v51 = vpop.f32.mrf.mxu1 }
 0xc0d   : > { %v2149_v52 = vsel %vm1679_vm5, %v2146_v50, -inf }
 0xc0e   : > { %2150 = vmax.xlane.f32.xlu0 %v2149_v52 }
 0xc24   : > { %2162 = vrot.lane.b32.xlu0 %v7651_v56, %s8280_s13  ;;  %s8326_s13 = sld [smem:[#allocation25_spill]] }
 0xc28   : > { %2243 = vrot.lane.b32.xlu0 %v7651_v56, %s7192_s18 }
 0xc2a   : > { %s769_s26 = scalar_lea.vmem %s8326_s13, %s5918_s12  ;;  %s8327_s13 = smov 24  }
 0xc2b   : > { %v7767_v15 = vld [vmem:[%s769_s26] sm:$0xff]  ;;  %s8328_s12 = smov 88   ;;  %s8330_s26 = smov 48  }
 0xc2c   : > { %2239 = vrot.lane.b32.xlu0 %v7684_v25, %s7192_s18  ;;  %v2689_v16 = vsel %vm803_vm0, %v7767_v15, 0.0 }
 0xc97   : > { %v2151_v53 = vpop.xlane.xlu0 %2150 }
 0xc98   : > { %v2152_v54 = vsub.f32 %v2146_v50, %v2151_v53  ;;  %v5966_v53 = vld [vmem:[#allocation14 + $0x2] ss:$0 sm:$0xff] }
 0xc9a   : > { %v2153_v55 = vmul.f32 1.442695, %v2152_v54 }
 0xc9b   : > { %v2163_v57 = vpop.permute.xlu0 %2162 }
 0xc9c   : > { %6778 = vpow2.f32 %v2153_v55  ;;  %6314 = vmatpush3.msra.mxu0 %v2163_v57  ;;  %v5967_v55 = vld [vmem:[#allocation16 + $0x2] ss:$0 sm:$0xff] }
 0xc9d   : > { %6315 = vmatprep.subr.mxu0 %v7186_v9 }
 0xc9e   : > { %6316 = vmatpush3.msra.mxu0 %v2161_v32 }
 0xc9f   : > { %6320 = vmatprep.subr.mxu0 %v7186_v9  ;;  %v2244_v1 = vpop.permute.xlu0 %2243 }
 0xca3   : > { %v2240_v3 = vpop.permute.xlu0 %2239 }
 0xca9   : > { %v6779_v59 = vpop.eup %6778 }
 0xcaa   : > { %v2155_v60 = vsel %vm1679_vm5, %v6779_v59, 0.0 }
 0xcab   : > { %2156 = vadd.xlane.f32.xlu1 %v2155_v60 }
 0xcbc   : > { %2241 = vrot.lane.b32.xlu1 %v7661_v58, %s7192_s18 }
 0xd34   : > { %v2157_v61 = vpop.xlane.xlu1 %2156 }
 0xd35   : > { %6780 = vrcp.f32 %v2157_v61 }
 0xd38   : > { %v2242_v2 = vpop.permute.xlu1 %2241 }
 0xd42   : > { %v6781_v63 = vpop.eup %6780 }
 0xd43   : > { %v2159_v33 = vmul.f32 %v6781_v63, %v6779_v59 }
 0xd45   : > { %6318 = vmatmul.mubr.msk.f32.vlgmr.msra.gmra.mxu0 %vm1679_vm5, %v2159_v33 }
 0xd46   : > { %6321 = vmatpush3.xpose.msk.msra.mxu0 %vm1009_vm4, %v2244_v1  ;;  %6324 = vmatprep.mubr.msk.f32.mxu0 %vm7187_vm1, %v7186_v9 }
 0xd47   : > { %6322 = vmatprep.subr.mxu0 %v7186_v9 }
 0xd4a   : > { %6323 = vmatpush3.xpose.msk.msra.mxu0 %vm1009_vm4, %v2242_v2  ;;  %v5968_v2 = vld [vmem:[#allocation7 + $0x2] ss:$0 sm:$0xff] }
 0xd4b   : > { %6341 = vmatprep.subr.mxu0 %v7186_v9 }
 0xd4d   : > { %6325 = vmatmul.mubr.msk.f32.vlgmr.msra.gmra.mxu0 %vm1009_vm4, %v2240_v3 }
 0xd4e   : > { %6345 = vmatprep.mubr.msk.f32.mxu0 %vm7187_vm1, %v7186_v9 }
 0xe05   : > { %v7747_v4 = vpop.f32.mrf.mxu0 }
 0xe07   : > { %v6319_v0 = vpop.f32.mrf.mxu0 }
 0xe0d   : > { %v2317_v5 = vpop.f32.mrf.mxu0 }
 0xe0e   : > { %v2318_v6 = vadd.f32 %v7697_v27, %v2317_v5 }
 0xe0f   : > { %v6326_v7 = vpop.f32.mrf.mxu0 }
 0xe10   : > { %v2321_v8 = vsel %vm1679_vm5, %v2318_v6, -inf }
 0xe11   : > { %2322 = vmax.xlane.f32.xlu1 %v2321_v8 }
 0xe22   : > { %2332 = vrot.lane.b32.xlu1 %v7661_v58, %s7191_s20 }
 0xe26   : > { %2415 = vrot.lane.b32.xlu1 %v7651_v56, %s7194_s6 }
 0xe2a   : > { %2411 = vrot.lane.b32.xlu1 %v7684_v25, %s7194_s6 }
 0xe9a   : > { %v2323_v10 = vpop.xlane.xlu1 %2322 }
 0xe9b   : > { %v2324_v11 = vsub.f32 %v2318_v6, %v2323_v10  ;;  %v2602_v10 = vld [vmem:[#allocation8 + $0x38] sm:$0xff] }
 0xe9d   : > { %v2325_v12 = vmul.f32 1.442695, %v2324_v11  ;;  %v2601_v11 = vld [vmem:[#allocation8 + $0x30] sm:$0xff] }
 0xe9e   : > { %v2333_v19 = vpop.permute.xlu1 %2332 }
 0xe9f   : > { %6782 = vpow2.f32 %v2325_v12  ;;  %v2600_v12 = vld [vmem:[#allocation8 + $0x28] sm:$0xff] }
 0xea2   : > { %v2416_v22 = vpop.permute.xlu1 %2415 }
 0xea6   : > { %v2412_v24 = vpop.permute.xlu1 %2411 }
 0xeac   : > { %v6783_v13 = vpop.eup %6782 }
 0xead   : > { %v2327_v14 = vsel %vm1679_vm5, %v6783_v13, 0.0 }
 0xeae   : > { %2328 = vadd.xlane.f32.xlu0 %v2327_v14 }
 0xec4   : > { %2334 = vrot.lane.b32.xlu0 %v7651_v56, %s7191_s20 }
 0xec8   : > { %2413 = vrot.lane.b32.xlu0 %v7661_v58, %s7194_s6 }
 0xee7   : > { %2690 = vadd.xlane.f32.xlu0 %v2689_v16 }
 0xf37   : > { %v2329_v17 = vpop.xlane.xlu0 %2328 }
 0xf38   : > { %6784 = vrcp.f32 %v2329_v17 }
 0xf3b   : > { %v2335_v18 = vpop.permute.xlu0 %2334 }
 0xf3c   : > { %6328 = vmatpush3.msra.mxu1 %v2335_v18 }
 0xf3d   : > { %6329 = vmatprep.subr.mxu1 %v7186_v9 }
 0xf3e   : > { %6330 = vmatpush3.msra.mxu1 %v2333_v19 }
 0xf3f   : > { %6334 = vmatprep.subr.mxu1 %v7186_v9  ;;  %v2414_v23 = vpop.permute.xlu0 %2413 }
 0xf45   : > { %v6785_v20 = vpop.eup %6784 }
 0xf46   : > { %v2331_v21 = vmul.f32 %v6785_v20, %v6783_v13  ;;  %v2599_v13 = vld [vmem:[#allocation8 + $0x20] sm:$0xff] }
 0xf48   : > { %6332 = vmatmul.mubr.msk.f32.vlgmr.msra.gmra.mxu1 %vm1679_vm5, %v2331_v21 }
 0xf49   : > { %6335 = vmatpush3.xpose.msk.msra.mxu1 %vm1009_vm4, %v2416_v22  ;;  %6338 = vmatprep.mubr.msk.f32.mxu1 %vm7187_vm1, %v7186_v9 }
 0xf4a   : > { %6336 = vmatprep.subr.mxu1 %v7186_v9 }
 0xf4d   : > { %6337 = vmatpush3.xpose.msk.msra.mxu1 %vm1009_vm4, %v2414_v23 }
 0xf4e   : > { %6359 = vmatprep.subr.mxu1 %v7186_v9 }
 0xf50   : > { %6339 = vmatmul.mubr.msk.f32.vlgmr.msra.gmra.mxu1 %vm1009_vm4, %v2412_v24 }
 0xf51   : > { %6367 = vmatprep.mubr.msk.f32.mxu1 %vm7187_vm1, %v7186_v9  ;;  %6360 = vmatpush3.msra.mxu1 %v2727_v31 }
 0xf52   : > { %6361 = vmatprep.subr.mxu1 %v7186_v9 }
 0xf53   : > { %6362 = vmatpush3.msra.mxu1 %v2726_v34  ;;  %v7862_v34 = vld [vmem:[%s784_s2] ss:$0 sm:$0xff]  ;;  %s8332_s2 = smov 56  }
 0xf54   : > { %6363 = vmatprep.subr.mxu1 %v7186_v9 }
 0xf55   : > { %6364 = vmatpush3.msra.mxu1 %v2725_v35 }
 0xf56   : > { %6365 = vmatprep.subr.mxu1 %v7186_v9 }
 0xf57   : > { %6366 = vmatpush3.msra.mxu1 %v2724_v36 }
 0xf58   : > { %6375 = vmatprep.subr.mxu1 %v7186_v9 }
 0xf70   : > { %v2691_v25 = vpop.xlane.xlu0 %2690 }
 0xf71   : > { %v2692_v26 = vmul.f32 0.03125, %v2691_v25 }
 0xf73   : > { %v2693_v28 = vsub.f32 %v7767_v15, %v2692_v26 }
 0xf75   : > { %v2694_v29 = vmul.f32 %v2693_v28, %v2693_v28 }
 0xf77   : > { %v2695_v30 = vsel %vm803_vm0, %v2694_v29, 0.0 }
 0xf78   : > { %2696 = vadd.xlane.f32.xlu0 %v2695_v30 }
0x1001   : > { %v2697_v37 = vpop.xlane.xlu0 %2696 }
0x1002   : > { %v2698_v38 = vmul.f32 0.032258064, %v2697_v37 }
0x1004   : > { %6786 = vrsqrt.f32 %v2698_v38  ;;  %vm2701_vm9 = vcmp.eq.f32.partialorder %v2698_v38, inf  ;;  %v2704_v44 = vand.u32 2147483648, %v2698_v38  ;;  %vm2703_vm10 = vcmp.eq.f32.partialorder %v2698_v38, 0.0 }
0x1008   : > { %v2407_v39 = vpop.f32.mrf.mxu1 }
0x100a   : > { %v6333_v40 = vpop.f32.mrf.mxu1 }
0x1010   : > { %v2489_v41 = vpop.f32.mrf.mxu1 }
0x1011   : > { %v6787_v42 = vpop.eup %6786  ;;  %v2490_v43 = vadd.f32 %v7697_v27, %v2489_v41 }
0x1012   : > { %v6340_v45 = vpop.f32.mrf.mxu1  ;;  %v2700_v46 = vmul.f32 %v6787_v42, %v2698_v38 }
0x1013   : > { %v2493_v48 = vsel %vm1679_vm5, %v2490_v43, -inf }
0x1014   : > { %2494 = vmax.xlane.f32.xlu1 %v2493_v48  ;;  %v2702_v49 = vsel %vm2701_vm9, %v2698_v38, %v2700_v46 }
0x1015   : > { %v2705_v50 = vsel %vm2703_vm10, %v2704_v44, %v2702_v49 }
0x1016   : > { %v2706_v51 = vadd.f32 1e-06, %v2705_v50 }
0x1018   : > { %6788 = vrcp.f32 %v2706_v51 }
0x1025   : > { %v6789_v52 = vpop.eup %6788  ;;  %2506 = vrot.lane.b32.xlu1 %v7651_v56, %s7193_s21 }
0x1026   : > { %v2708_v54 = vmul.f32 %v6789_v52, %v2693_v28 }
0x1028   : > { %v2715_v57 = vmul.f32 %v5966_v53, %v2708_v54 }
0x1029   : > { %2584 = vrot.lane.b32.xlu1 %v7747_v4, %s7199_s14 }
0x102a   : > { %v2722_v32 = vadd.f32 %v5967_v55, %v2715_v57 }
0x102c   : > { %6368 = vmatmul.mubr.msk.f32.vlgmr.msra.gmra.mxu1 %vm803_vm0, %v2722_v32 }
0x102d   : > { %2588 = vrot.lane.b32.xlu1 %v2407_v39, %s7200_s19  ;;  %6377 = vmatprep.mubr.msk.f32.mxu1 %vm7187_vm1, %v7186_v9 }
0x109d   : > { %v2495_v59 = vpop.xlane.xlu1 %2494 }
0x109e   : > { %v2496_v60 = vsub.f32 %v2490_v43, %v2495_v59 }
0x10a0   : > { %v2497_v61 = vmul.f32 1.442695, %v2496_v60 }
0x10a1   : > { %v2507_v63 = vpop.permute.xlu1 %2506 }
0x10a2   : > { %6790 = vpow2.f32 %v2497_v61  ;;  %6342 = vmatpush3.msra.mxu0 %v2507_v63 }
0x10a3   : > { %6343 = vmatprep.subr.mxu0 %v7186_v9 }
0x10a5   : > { %v2585_v17 = vpop.permute.xlu1 %2584 }
0x10a6   : > { %v2595_v19 = vsel %vm1009_vm4, %v7722_v47, %v2585_v17 }
0x10a9   : > { %v2589_v18 = vpop.permute.xlu1 %2588 }
0x10aa   : > { %v2596_v21 = vsel %vm1679_vm5, %v2595_v19, %v2589_v18 }
0x10af   : > { %v6791_v33 = vpop.eup %6790 }
0x10b0   : > { %v2499_v1 = vsel %vm1679_vm5, %v6791_v33, 0.0 }
0x10b1   : > { %2500 = vadd.xlane.f32.xlu0 %v2499_v1 }
0x10c7   : > { %2504 = vrot.lane.b32.xlu0 %v7661_v58, %s7193_s21 }
0x10ec   : > { %v2805_v3 = vpop.f32.mrf.mxu1 }
0x10ed   : > { %v7803_v4 = vadd.f32 %v5968_v2, %v2805_v3 }
0x10ee   : > { %v6369_v0 = vpop.f32.mrf.mxu1 }
0x10ef   : > { %2816 = vrot.lane.b32.xlu1 %v7803_v4, %s7189_s11 }
0x10f3   : > { %2979 = vrot.lane.b32.xlu1 %v7803_v4, %s7188_s7 }
0x10f7   : > { %3144 = vrot.lane.b32.xlu1 %v7803_v4, %s7192_s18 }
0x10fb   : > { %3309 = vrot.lane.b32.xlu1 %v7803_v4, %s7194_s6 }
0x113a   : > { %v2501_v5 = vpop.xlane.xlu0 %2500 }
0x113b   : > { %6792 = vrcp.f32 %v2501_v5 }
0x113e   : > { %v2505_v6 = vpop.permute.xlu0 %2504 }
0x113f   : > { %6344 = vmatpush3.msra.mxu0 %v2505_v6 }
0x1140   : > { %6348 = vmatprep.subr.mxu0 %v7186_v9 }
0x1148   : > { %v6793_v7 = vpop.eup %6792 }
0x1149   : > { %v2503_v8 = vmul.f32 %v6793_v7, %v6791_v33 }
0x114b   : > { %6346 = vmatmul.mubr.msk.f32.vlgmr.msra.gmra.mxu0 %vm1679_vm5, %v2503_v8 }
0x114c   : > { %6356 = vmatprep.mubr.msk.f32.mxu0 %vm7187_vm1, %v7186_v9  ;;  %6349 = vmatpush3.msra.mxu0 %v2602_v10 }
0x114d   : > { %6350 = vmatprep.subr.mxu0 %v7186_v9 }
0x114e   : > { %6351 = vmatpush3.msra.mxu0 %v2601_v11 }
0x114f   : > { %6352 = vmatprep.subr.mxu0 %v7186_v9 }
0x1150   : > { %6353 = vmatpush3.msra.mxu0 %v2600_v12 }
0x1151   : > { %6354 = vmatprep.subr.mxu0 %v7186_v9 }
0x1152   : > { %6355 = vmatpush3.msra.mxu0 %v2599_v13 }
0x1153   : > { %6370 = vmatprep.subr.mxu0 %v7186_v9 }
0x1161   : > { %v2817_v20 = vpop.permute.xlu1 %2816 }
0x1165   : > { %v2980_v25 = vpop.permute.xlu1 %2979 }
0x1169   : > { %v3145_v26 = vpop.permute.xlu1 %3144 }
0x116d   : > { %v3310_v29 = vpop.permute.xlu1 %3309 }
0x120b   : > { %v2579_v14 = vpop.f32.mrf.mxu0 }
0x120c   : > { %2592 = vrot.lane.b32.xlu0 %v2579_v14, %s8327_s13 }
0x120d   : > { %v6347_v16 = vpop.f32.mrf.mxu0 }
0x1210   : > { %2981 = vrot.lane.b32.xlu0 %v7803_v4, %s8328_s12 }
0x1214   : > { %3146 = vrot.lane.b32.xlu0 %v7803_v4, %s7191_s20 }
0x1218   : > { %3311 = vrot.lane.b32.xlu0 %v7803_v4, %s7193_s21 }
0x127e   : > { %v2593_v22 = vpop.permute.xlu0 %2592 }
0x127f   : > { %v2597_v23 = vsel %vm1681_vm6, %v2596_v21, %v2593_v22 }
0x1280   : > { %6357 = vmatmul.mubr.msk.f32.vlgmr.msra.gmra.mxu0 %vm803_vm0, %v2597_v23 }
0x1281   : > { %6371 = vmatpush3.xpose.msk.msra.mxu0 %vm1009_vm4, %v2817_v20  ;;  %6372 = vmatprep.mubr.msk.f32.mxu0 %vm7187_vm1, %v7186_v9 }
0x1282   : > { %v2982_v24 = vpop.permute.xlu0 %2981  ;;  %6380 = vmatprep.subr.mxu0 %v7186_v9 }
0x1284   : > { %6373 = vmatmul.mubr.msk.f32.vlgmr.msra.gmra.mxu0 %vm1009_vm4, %v7803_v4 }
0x1285   : > { %6381 = vmatpush3.xpose.msk.msra.mxu0 %vm1009_vm4, %v2982_v24  ;;  %6382 = vmatprep.mubr.msk.f32.mxu0 %vm7187_vm1, %v7186_v9 }
0x1286   : > { %v3147_v47 = vpop.permute.xlu0 %3146  ;;  %6390 = vmatprep.subr.mxu0 %v7186_v9 }
0x1288   : > { %6383 = vmatmul.mubr.msk.f32.vlgmr.msra.gmra.mxu0 %vm1009_vm4, %v2980_v25 }
0x1289   : > { %6391 = vmatpush3.xpose.msk.msra.mxu0 %vm1009_vm4, %v3147_v47  ;;  %6392 = vmatprep.mubr.msk.f32.mxu0 %vm7187_vm1, %v7186_v9 }
0x128a   : > { %v3312_v28 = vpop.permute.xlu0 %3311  ;;  %6400 = vmatprep.subr.mxu0 %v7186_v9 }
0x128c   : > { %6393 = vmatmul.mubr.msk.f32.vlgmr.msra.gmra.mxu0 %vm1009_vm4, %v3145_v26  ;;  %v3493_v26 = vld [vmem:[#allocation8 + $0x58] sm:$0xff] }
0x128d   : > { %6401 = vmatpush3.xpose.msk.msra.mxu0 %vm1009_vm4, %v3312_v28  ;;  %6402 = vmatprep.mubr.msk.f32.mxu0 %vm7187_vm1, %v7186_v9  ;;  %v3492_v28 = vld [vmem:[#allocation8 + $0x50] sm:$0xff] }
0x128e   : > { %6410 = vmatprep.subr.mxu0 %v7186_v9 }
0x1290   : > { %6403 = vmatmul.mubr.msk.f32.vlgmr.msra.gmra.mxu0 %vm1009_vm4, %v3310_v29  ;;  %v3491_v29 = vld [vmem:[#allocation8 + $0x48] sm:$0xff] }
0x1291   : > { %6418 = vmatprep.mubr.msk.f32.mxu0 %vm7187_vm1, %v7186_v9  ;;  %6411 = vmatpush3.msra.mxu0 %v3493_v26 }
0x1292   : > { %6412 = vmatprep.subr.mxu0 %v7186_v9 }
0x1293   : > { %6413 = vmatpush3.msra.mxu0 %v3492_v28 }
0x1294   : > { %6414 = vmatprep.subr.mxu0 %v7186_v9 }
0x1295   : > { %6415 = vmatpush3.msra.mxu0 %v3491_v29 }
0x1296   : > { %6416 = vmatprep.subr.mxu0 %v7186_v9 }
0x1340   : > { %v7860_v30 = vpop.f32.mrf.mxu0 }
0x1342   : > { %v6358_v31 = vpop.f32.mrf.mxu0 }
0x1344   : > { %v2888_v35 = vpop.f32.mrf.mxu0 }
0x1345   : > { %v2889_v36 = vadd.f32 %v7862_v34, %v2888_v35  ;;  %v3490_v35 = vld [vmem:[#allocation8 + $0x40] sm:$0xff] }
0x1346   : > { %v6374_v37 = vpop.f32.mrf.mxu0  ;;  %6417 = vmatpush3.msra.mxu0 %v3490_v35 }
0x1347   : > { %v2892_v38 = vsel %vm1009_vm4, %v2889_v36, -inf  ;;  %6432 = vmatprep.subr.mxu0 %v7186_v9 }
0x1348   : > { %2893 = vmax.xlane.f32.xlu0 %v2892_v38  ;;  %v3053_v39 = vpop.f32.mrf.mxu0 }
0x1349   : > { %v3054_v40 = vadd.f32 %v7862_v34, %v3053_v39 }
0x134a   : > { %v6384_v41 = vpop.f32.mrf.mxu0 }
0x134b   : > { %v3057_v42 = vsel %vm1009_vm4, %v3054_v40, -inf }
0x134c   : > { %3058 = vmax.xlane.f32.xlu1 %v3057_v42  ;;  %v3218_v43 = vpop.f32.mrf.mxu0 }
0x134d   : > { %v3219_v44 = vadd.f32 %v7862_v34, %v3218_v43 }
0x134e   : > { %v6394_v45 = vpop.f32.mrf.mxu0 }
0x134f   : > { %v3222_v46 = vsel %vm1009_vm4, %v3219_v44, -inf }
0x1350   : > { %3223 = vmax.xlane.f32.xlu0 %v3222_v46  ;;  %v3383_v48 = vpop.f32.mrf.mxu0 }
0x1351   : > { %v3384_v49 = vadd.f32 %v7862_v34, %v3383_v48 }
0x1352   : > { %v6404_v50 = vpop.f32.mrf.mxu0 }
0x1353   : > { %v3387_v51 = vsel %vm1009_vm4, %v3384_v49, -inf  ;;  %v5983_v50 = vld [vmem:[#allocation10 + $0x2] ss:$0 sm:$0xff] }
0x1354   : > { %3388 = vmax.xlane.f32.xlu0 %v3387_v51 }
0x135d   : > { %2903 = vrot.lane.b32.xlu1 %v7803_v4, %s8329_s23 }
0x13d1   : > { %v2894_v52 = vpop.xlane.xlu0 %2893 }
0x13d2   : > { %v2895_v53 = vsub.f32 %v2889_v36, %v2894_v52 }
0x13d4   : > { %v2896_v54 = vmul.f32 1.442695, %v2895_v53 }
0x13d5   : > { %v3059_v55 = vpop.xlane.xlu1 %3058 }
0x13d6   : > { %6794 = vpow2.f32 %v2896_v54  ;;  %v3060_v57 = vsub.f32 %v3054_v40, %v3059_v55 }
0x13d8   : > { %v3061_v32 = vmul.f32 1.442695, %v3060_v57 }
0x13d9   : > { %v3224_v59 = vpop.xlane.xlu0 %3223  ;;  %v2904_v60 = vpop.permute.xlu1 %2903 }
0x13da   : > { %6796 = vpow2.f32 %v3061_v32  ;;  %v3225_v61 = vsub.f32 %v3219_v44, %v3224_v59  ;;  %6376 = vmatpush3.msra.mxu1 %v2904_v60 }
0x13db   : > { %6385 = vmatprep.subr.mxu1 %v7186_v9 }
0x13dc   : > { %v3226_v63 = vmul.f32 1.442695, %v3225_v61 }
0x13dd   : > { %v3389_v33 = vpop.xlane.xlu0 %3388 }
0x13de   : > { %6798 = vpow2.f32 %v3226_v63  ;;  %v3390_v1 = vsub.f32 %v3384_v49, %v3389_v33  ;;  %v3617_v63 = vld [vmem:[#allocation5 + $0x70] sm:$0xff]  ;;  %v3616_v33 = vld [vmem:[#allocation5 + $0x68] sm:$0xff] }
0x13e0   : > { %v3391_v2 = vmul.f32 1.442695, %v3390_v1  ;;  %v3615_v1 = vld [vmem:[#allocation5 + $0x60] sm:$0xff] }
0x13e2   : > { %6800 = vpow2.f32 %v3391_v2 }
0x13e3   : > { %v6795_v3 = vpop.eup %6794 }
0x13e4   : > { %v2898_v0 = vsel %vm1009_vm4, %v6795_v3, 0.0 }
0x13e5   : > { %2899 = vadd.xlane.f32.xlu1 %v2898_v0 }
0x13e7   : > { %v6797_v5 = vpop.eup %6796 }
0x13e8   : > { %v3063_v6 = vsel %vm1009_vm4, %v6797_v5, 0.0 }
0x13e9   : > { %3064 = vadd.xlane.f32.xlu0 %v3063_v6 }
0x13eb   : > { %v6799_v7 = vpop.eup %6798 }
0x13ec   : > { %v3228_v8 = vsel %vm1009_vm4, %v6799_v7, 0.0 }
0x13ed   : > { %3229 = vadd.xlane.f32.xlu1 %v3228_v8 }
0x13ef   : > { %v6801_v10 = vpop.eup %6800 }
0x13f0   : > { %v3393_v11 = vsel %vm1009_vm4, %v6801_v10, 0.0 }
0x13f1   : > { %3394 = vadd.xlane.f32.xlu0 %v3393_v11 }
0x13fe   : > { %3233 = vrot.lane.b32.xlu1 %v7803_v4, %s8330_s26 }
0x1402   : > { %3398 = vrot.lane.b32.xlu1 %v7803_v4, %s8331_s17 }
0x1407   : > { %3068 = vrot.lane.b32.xlu0 %v7803_v4, %s8332_s2 }
0x146e   : > { %v2900_v12 = vpop.xlane.xlu1 %2899 }
0x146f   : > { %6802 = vrcp.f32 %v2900_v12 }
0x1472   : > { %v3065_v13 = vpop.xlane.xlu0 %3064 }
0x1473   : > { %6804 = vrcp.f32 %v3065_v13 }
0x1476   : > { %v3230_v14 = vpop.xlane.xlu1 %3229 }
0x1477   : > { %6806 = vrcp.f32 %v3230_v14  ;;  %v5985_v14 = vld [vmem:[#allocation14 + $0x3] ss:$0 sm:$0xff] }
0x147a   : > { %v3395_v16 = vpop.xlane.xlu0 %3394  ;;  %v3234_v21 = vpop.permute.xlu1 %3233 }
0x147b   : > { %6808 = vrcp.f32 %v3395_v16 }
0x147c   : > { %v6803_v17 = vpop.eup %6802 }
0x147d   : > { %v2902_v18 = vmul.f32 %v6803_v17, %v6795_v3  ;;  %v5986_v17 = vld [vmem:[#allocation16 + $0x3] ss:$0 sm:$0xff] }
0x147e   : > { %v3069_v19 = vpop.permute.xlu0 %3068  ;;  %v3399_v24 = vpop.permute.xlu1 %3398 }
0x147f   : > { %6378 = vmatmul.mubr.msk.f32.vlgmr.msra.gmra.mxu1 %vm1009_vm4, %v2902_v18 }
0x1480   : > { %v6805_v20 = vpop.eup %6804  ;;  %6386 = vmatpush3.msra.mxu1 %v3069_v19  ;;  %6387 = vmatprep.mubr.msk.f32.mxu1 %vm7187_vm1, %v7186_v9 }
0x1481   : > { %6395 = vmatprep.subr.mxu1 %v7186_v9  ;;  %v3067_v4 = vmul.f32 %v6805_v20, %v6797_v5  ;;  %v5987_v20 = vld [vmem:[#allocation7 + $0x3] ss:$0 sm:$0xff] }
0x1483   : > { %6388 = vmatmul.mubr.msk.f32.vlgmr.msra.gmra.mxu1 %vm1009_vm4, %v3067_v4 }
0x1484   : > { %v6807_v22 = vpop.eup %6806  ;;  %6396 = vmatpush3.msra.mxu1 %v3234_v21  ;;  %6397 = vmatprep.mubr.msk.f32.mxu1 %vm7187_vm1, %v7186_v9 }
0x1485   : > { %6405 = vmatprep.subr.mxu1 %v7186_v9  ;;  %v3232_v23 = vmul.f32 %v6807_v22, %v6799_v7 }
0x1487   : > { %6398 = vmatmul.mubr.msk.f32.vlgmr.msra.gmra.mxu1 %vm1009_vm4, %v3232_v23 }
0x1488   : > { %v6809_v25 = vpop.eup %6808  ;;  %6406 = vmatpush3.msra.mxu1 %v3399_v24  ;;  %6407 = vmatprep.mubr.msk.f32.mxu1 %vm7187_vm1, %v7186_v9 }
0x1489   : > { %v3397_v47 = vmul.f32 %v6809_v25, %v6801_v10  ;;  %6421 = vmatprep.subr.mxu1 %v7186_v9 }
0x148b   : > { %6408 = vmatmul.mubr.msk.f32.vlgmr.msra.gmra.mxu1 %vm1009_vm4, %v3397_v47 }
0x148c   : > { %6429 = vmatprep.mubr.msk.f32.mxu1 %vm7187_vm1, %v7186_v9 }
0x153f   : > { %v2975_v31 = vpop.f32.mrf.mxu1 }
0x1541   : > { %v6379_v36 = vpop.f32.mrf.mxu1 }
0x1543   : > { %v3140_v37 = vpop.f32.mrf.mxu1 }
0x1544   : > { %3475 = vrot.lane.b32.xlu0 %v3140_v37, %s7199_s14 }
0x1545   : > { %v6389_v38 = vpop.f32.mrf.mxu1 }
0x1547   : > { %v3305_v39 = vpop.f32.mrf.mxu1 }
0x1548   : > { %3479 = vrot.lane.b32.xlu1 %v3305_v39, %s7200_s19 }
0x1549   : > { %v6399_v40 = vpop.f32.mrf.mxu1 }
0x154b   : > { %v3470_v41 = vpop.f32.mrf.mxu1 }
0x154c   : > { %3483 = vrot.lane.b32.xlu0 %v3470_v41, %s8327_s13 }
0x154d   : > { %v6409_v42 = vpop.f32.mrf.mxu1 }
0x15b6   : > { %v3476_v43 = vpop.permute.xlu0 %3475 }
0x15b7   : > { %v3486_v45 = vsel %vm1009_vm4, %v2975_v31, %v3476_v43 }
0x15ba   : > { %v3480_v44 = vpop.permute.xlu1 %3479 }
0x15bb   : > { %v3487_v46 = vsel %vm1679_vm5, %v3486_v45, %v3480_v44 }
0x15be   : > { %v3484_v48 = vpop.permute.xlu0 %3483 }
0x15bf   : > { %v3488_v49 = vsel %vm1681_vm6, %v3487_v46, %v3484_v48 }
0x15c0   : > { %6419 = vmatmul.mubr.msk.f32.vlgmr.msra.gmra.mxu0 %vm803_vm0, %v3488_v49 }
0x15c1   : > { %6436 = vmatprep.mubr.msk.f32.mxu0 %vm7187_vm1, %v7186_v9 }
0x1680   : > { %v3571_v51 = vpop.f32.mrf.mxu0 }
0x1681   : > { %v3572_v52 = vadd.f32 %v5983_v50, %v3571_v51 }
0x1682   : > { %v6420_v53 = vpop.f32.mrf.mxu0 }
0x1683   : > { %v7914_v54 = vadd.f32 %v3572_v52, %v7767_v15  ;;  %v3618_v15 = vld [vmem:[#allocation5 + $0x78] sm:$0xff] }
0x1684   : > { %6422 = vmatpush3.msra.mxu1 %v3618_v15 }
0x1685   : > { %v3580_v55 = vsel %vm803_vm0, %v7914_v54, 0.0  ;;  %6423 = vmatprep.subr.mxu1 %v7186_v9 }
0x1686   : > { %3581 = vadd.xlane.f32.xlu1 %v3580_v55  ;;  %6424 = vmatpush3.msra.mxu1 %v3617_v63 }
0x1687   : > { %6425 = vmatprep.subr.mxu1 %v7186_v9 }
0x1688   : > { %6426 = vmatpush3.msra.mxu1 %v3616_v33 }
0x1689   : > { %6427 = vmatprep.subr.mxu1 %v7186_v9 }
0x168a   : > { %6428 = vmatpush3.msra.mxu1 %v3615_v1 }
0x168b   : > { %6439 = vmatprep.subr.mxu1 %v7186_v9 }
0x1697   : > { %3700 = vrot.lane.b32.xlu1 %v7661_v58, %s8329_s23 }
0x170f   : > { %v3582_v57 = vpop.xlane.xlu1 %3581 }
0x1710   : > { %v3583_v32 = vmul.f32 0.03125, %v3582_v57 }
0x1712   : > { %v3584_v59 = vsub.f32 %v7914_v54, %v3583_v32 }
0x1713   : > { %v3701_v5 = vpop.permute.xlu1 %3700 }
0x1714   : > { %v3585_v60 = vmul.f32 %v3584_v59, %v3584_v59 }
0x1716   : > { %v3586_v61 = vsel %vm803_vm0, %v3585_v60, 0.0 }
0x1717   : > { %3587 = vadd.xlane.f32.xlu0 %v3586_v61 }
0x172d   : > { %3702 = vrot.lane.b32.xlu0 %v7651_v56, %s8329_s23  ;;  %s7202_s23 = smov 32  }
0x17a0   : > { %v3588_v2 = vpop.xlane.xlu0 %3587 }
0x17a1   : > { %v3589_v3 = vmul.f32 0.032258064, %v3588_v2 }
0x17a3   : > { %6810 = vrsqrt.f32 %v3589_v3  ;;  %vm3592_vm11 = vcmp.eq.f32.partialorder %v3589_v3, inf  ;;  %v3595_v8 = vand.u32 2147483648, %v3589_v3  ;;  %vm3594_vm12 = vcmp.eq.f32.partialorder %v3589_v3, 0.0 }
0x17a4   : > { %v3703_v0 = vpop.permute.xlu0 %3702 }
0x17a5   : > { %6433 = vmatpush3.xpose.msk.msra.mxu0 %vm1009_vm4, %v3703_v0 }
0x17a6   : > { %6434 = vmatprep.subr.mxu0 %v7186_v9 }
0x17a9   : > { %6435 = vmatpush3.xpose.msk.msra.mxu0 %vm1009_vm4, %v3701_v5 }
0x17aa   : > { %6453 = vmatprep.subr.mxu0 %v7186_v9 }
0x17b0   : > { %v6811_v6 = vpop.eup %6810 }
0x17b1   : > { %v3591_v7 = vmul.f32 %v6811_v6, %v3589_v3 }
0x17b3   : > { %v3593_v10 = vsel %vm3592_vm11, %v3589_v3, %v3591_v7 }
0x17b4   : > { %v3596_v11 = vsel %vm3594_vm12, %v3595_v8, %v3593_v10 }
0x17b5   : > { %v3597_v12 = vadd.f32 1e-06, %v3596_v11 }
0x17b7   : > { %6812 = vrcp.f32 %v3597_v12 }
0x17c4   : > { %v6813_v13 = vpop.eup %6812 }
0x17c5   : > { %v3599_v16 = vmul.f32 %v6813_v13, %v3584_v59 }
0x17c7   : > { %v3606_v18 = vmul.f32 %v5985_v14, %v3599_v16 }
0x17c9   : > { %v3613_v19 = vadd.f32 %v5986_v17, %v3606_v18 }
0x17cb   : > { %6430 = vmatmul.mubr.msk.f32.vlgmr.msra.gmra.mxu1 %vm803_vm0, %v3613_v19 }
0x17cc   : > { %6443 = vmatprep.mubr.msk.f32.mxu1 %vm7187_vm1, %v7186_v9 }
0x188b   : > { %v3696_v21 = vpop.f32.mrf.mxu1 }
0x188c   : > { %v7935_v4 = vadd.f32 %v5987_v20, %v3696_v21 }
0x188d   : > { %v6431_v22 = vpop.f32.mrf.mxu1 }
0x188e   : > { %6437 = vmatmul.mubr.msk.f32.vlgmr.msra.gmra.mxu0 %vm1009_vm4, %v7935_v4 }
0x188f   : > { %6457 = vmatprep.mubr.msk.f32.mxu0 %vm7187_vm1, %v7186_v9 }
0x194e   : > { %v3777_v23 = vpop.f32.mrf.mxu0 }
0x194f   : > { %v3778_v24 = vadd.f32 %v7697_v27, %v3777_v23 }
0x1950   : > { %v6438_v25 = vpop.f32.mrf.mxu0 }
0x1951   : > { %v3781_v47 = vsel %vm1679_vm5, %v3778_v24, -inf }
0x1952   : > { %3782 = vmax.xlane.f32.xlu1 %v3781_v47 }
0x1963   : > { %3792 = vrot.lane.b32.xlu1 %v7661_v58, %s7202_s23 }
0x1967   : > { %3875 = vrot.lane.b32.xlu1 %v7651_v56, %s8332_s2 }
0x196b   : > { %3871 = vrot.lane.b32.xlu1 %v7935_v4, %s7188_s7 }
0x196f   : > { %3964 = vrot.lane.b32.xlu1 %v7661_v58, %s8327_s13 }
0x19db   : > { %v3783_v26 = vpop.xlane.xlu1 %3782 }
0x19dc   : > { %v3784_v28 = vsub.f32 %v3778_v24, %v3783_v26  ;;  %v6854_v24 = vld [vmem:[%s7694_s16] ss:$0 sm:$0xff]  ;;  %s5681_s16 = scalar_lea.sflag [#allocation4], %s7492_s15 }
0x19de   : > { %v3785_v29 = vmul.f32 1.442695, %v3784_v28 }
0x19df   : > { %v3793_v38 = vpop.permute.xlu1 %3792 }
0x19e0   : > { %6814 = vpow2.f32 %v3785_v29 }
0x19e3   : > { %v3876_v41 = vpop.permute.xlu1 %3875 }
0x19e7   : > { %v3872_v43 = vpop.permute.xlu1 %3871 }
0x19eb   : > { %v3965_v57 = vpop.permute.xlu1 %3964 }
0x19ed   : > { %v6815_v31 = vpop.eup %6814 }
0x19ee   : > { %v3787_v35 = vsel %vm1679_vm5, %v6815_v31, 0.0 }
0x19ef   : > { %3788 = vadd.xlane.f32.xlu0 %v3787_v35 }
0x1a05   : > { %3794 = vrot.lane.b32.xlu0 %v7651_v56, %s7202_s23  ;;  %s8335_s23 = sshll.u32 %s7492_s15, 3 }
0x1a09   : > { %3873 = vrot.lane.b32.xlu0 %v7661_v58, %s8332_s2  ;;  %s6033_s2 = sshll.u32 %s7320_s1, 7  ;;  %s7203_s1 = smov [#allocation17]  }
0x1a78   : > { %v3789_v36 = vpop.xlane.xlu0 %3788 }
0x1a79   : > { %6816 = vrcp.f32 %v3789_v36 }
0x1a7c   : > { %v3795_v37 = vpop.permute.xlu0 %3794 }
0x1a7d   : > { %6440 = vmatpush3.msra.mxu1 %v3795_v37 }
0x1a7e   : > { %6441 = vmatprep.subr.mxu1 %v7186_v9 }
0x1a7f   : > { %6442 = vmatpush3.msra.mxu1 %v3793_v38 }
0x1a80   : > { %6446 = vmatprep.subr.mxu1 %v7186_v9  ;;  %v3874_v42 = vpop.permute.xlu0 %3873 }
0x1a86   : > { %v6817_v39 = vpop.eup %6816 }
0x1a87   : > { %v3791_v40 = vmul.f32 %v6817_v39, %v6815_v31 }
0x1a89   : > { %6444 = vmatmul.mubr.msk.f32.vlgmr.msra.gmra.mxu1 %vm1679_vm5, %v3791_v40 }
0x1a8a   : > { %6447 = vmatpush3.xpose.msk.msra.mxu1 %vm1009_vm4, %v3876_v41  ;;  %6450 = vmatprep.mubr.msk.f32.mxu1 %vm7187_vm1, %v7186_v9 }
0x1a8b   : > { %6448 = vmatprep.subr.mxu1 %v7186_v9 }
0x1a8e   : > { %6449 = vmatpush3.xpose.msk.msra.mxu1 %vm1009_vm4, %v3874_v42 }
0x1a8f   : > { %6467 = vmatprep.subr.mxu1 %v7186_v9 }
0x1a91   : > { %6451 = vmatmul.mubr.msk.f32.vlgmr.msra.gmra.mxu1 %vm1009_vm4, %v3872_v43 }
0x1a92   : > { %6471 = vmatprep.mubr.msk.f32.mxu1 %vm7187_vm1, %v7186_v9 }
0x1b49   : > { %v7966_v44 = vpop.f32.mrf.mxu1 }
0x1b4b   : > { %v6445_v45 = vpop.f32.mrf.mxu1 }
0x1b4c   : > { %v4404_v45 = vld [vmem:[#allocation8 + $0x68] sm:$0xff] }
0x1b51   : > { %v3949_v46 = vpop.f32.mrf.mxu1 }
0x1b52   : > { %v3950_v48 = vadd.f32 %v7697_v27, %v3949_v46  ;;  %v4403_v46 = vld [vmem:[#allocation8 + $0x60] sm:$0xff] }
0x1b53   : > { %v6452_v49 = vpop.f32.mrf.mxu1 }
0x1b54   : > { %v3953_v50 = vsel %vm1679_vm5, %v3950_v48, -inf }
0x1b55   : > { %3954 = vmax.xlane.f32.xlu0 %v3953_v50 }
0x1b6b   : > { %3966 = vrot.lane.b32.xlu0 %v7651_v56, %s8327_s13 }
0x1b6f   : > { %4047 = vrot.lane.b32.xlu0 %v7651_v56, %s8330_s26 }
0x1b73   : > { %4043 = vrot.lane.b32.xlu0 %v7935_v4, %s7192_s18 }
0x1bde   : > { %v3955_v51 = vpop.xlane.xlu0 %3954 }
0x1bdf   : > { %v3956_v52 = vsub.f32 %v3950_v48, %v3955_v51 }
0x1be1   : > { %v3957_v53 = vmul.f32 1.442695, %v3956_v52 }
0x1be2   : > { %v3967_v55 = vpop.permute.xlu0 %3966 }
0x1be3   : > { %6818 = vpow2.f32 %v3957_v53  ;;  %6454 = vmatpush3.msra.mxu0 %v3967_v55 }
0x1be4   : > { %6455 = vmatprep.subr.mxu0 %v7186_v9 }
0x1be5   : > { %6456 = vmatpush3.msra.mxu0 %v3965_v57 }
0x1be6   : > { %6460 = vmatprep.subr.mxu0 %v7186_v9  ;;  %v4048_v63 = vpop.permute.xlu0 %4047 }
0x1bea   : > { %v4044_v1 = vpop.permute.xlu0 %4043 }
0x1bf0   : > { %v6819_v32 = vpop.eup %6818 }
0x1bf1   : > { %v3959_v59 = vsel %vm1679_vm5, %v6819_v32, 0.0 }
0x1bf2   : > { %3960 = vadd.xlane.f32.xlu1 %v3959_v59  ;;  %v4530_v59 = vld [vmem:[#allocation5 + $0x90] sm:$0xff] }
0x1c03   : > { %4045 = vrot.lane.b32.xlu1 %v7661_v58, %s8330_s26  ;;  %s8334_s26 = sld [smem:[#allocation33_spill]] }
0x1c7b   : > { %v3961_v60 = vpop.xlane.xlu1 %3960 }
0x1c7c   : > { %6820 = vrcp.f32 %v3961_v60  ;;  %v4528_v60 = vld [vmem:[#allocation5 + $0x80] sm:$0xff] }
0x1c7f   : > { %v4046_v33 = vpop.permute.xlu1 %4045 }
0x1c89   : > { %v6821_v61 = vpop.eup %6820 }
0x1c8a   : > { %v3963_v15 = vmul.f32 %v6821_v61, %v6819_v32  ;;  %v4531_v32 = vld [vmem:[#allocation5 + $0x98] sm:$0xff]  ;;  %v4529_v61 = vld [vmem:[#allocation5 + $0x88] sm:$0xff] }
0x1c8c   : > { %6458 = vmatmul.mubr.msk.f32.vlgmr.msra.gmra.mxu0 %vm1679_vm5, %v3963_v15 }
0x1c8d   : > { %6461 = vmatpush3.xpose.msk.msra.mxu0 %vm1009_vm4, %v4048_v63  ;;  %6464 = vmatprep.mubr.msk.f32.mxu0 %vm7187_vm1, %v7186_v9 }
0x1c8e   : > { %6462 = vmatprep.subr.mxu0 %v7186_v9 }
0x1c91   : > { %6463 = vmatpush3.xpose.msk.msra.mxu0 %vm1009_vm4, %v4046_v33 }
0x1c92   : > { %6481 = vmatprep.subr.mxu0 %v7186_v9 }
0x1c94   : > { %6465 = vmatmul.mubr.msk.f32.vlgmr.msra.gmra.mxu0 %vm1009_vm4, %v4044_v1 }
0x1c95   : > { %6485 = vmatprep.mubr.msk.f32.mxu0 %vm7187_vm1, %v7186_v9 }
0x1d4c   : > { %v4039_v2 = vpop.f32.mrf.mxu0 }
0x1d4e   : > { %v6459_v3 = vpop.f32.mrf.mxu0 }
0x1d54   : > { %v4121_v0 = vpop.f32.mrf.mxu0 }
0x1d55   : > { %v4122_v5 = vadd.f32 %v7697_v27, %v4121_v0 }
0x1d56   : > { %v6466_v6 = vpop.f32.mrf.mxu0 }
0x1d57   : > { %v4125_v7 = vsel %vm1679_vm5, %v4122_v5, -inf }
0x1d58   : > { %4126 = vmax.xlane.f32.xlu1 %v4125_v7 }
0x1d69   : > { %4136 = vrot.lane.b32.xlu1 %v7661_v58, %s7200_s19 }
0x1d6d   : > { %4219 = vrot.lane.b32.xlu1 %v7651_v56, %s8331_s17 }
0x1d71   : > { %4215 = vrot.lane.b32.xlu1 %v7935_v4, %s7194_s6 }
0x1de1   : > { %v4127_v8 = vpop.xlane.xlu1 %4126 }
0x1de2   : > { %v4128_v10 = vsub.f32 %v4122_v5, %v4127_v8 }
0x1de4   : > { %v4129_v11 = vmul.f32 1.442695, %v4128_v10 }
0x1de5   : > { %v4137_v16 = vpop.permute.xlu1 %4136 }
0x1de6   : > { %6822 = vpow2.f32 %v4129_v11  ;;  %v6009_v11 = vld [vmem:[#allocation7 + $0x4] ss:$0 sm:$0xff] }
0x1de9   : > { %v4220_v19 = vpop.permute.xlu1 %4219 }
0x1ded   : > { %v4216_v21 = vpop.permute.xlu1 %4215 }
0x1df3   : > { %v6823_v12 = vpop.eup %6822 }
0x1df4   : > { %v4131_v27 = vsel %vm1679_vm5, %v6823_v12, 0.0 }
0x1df5   : > { %4132 = vadd.xlane.f32.xlu0 %v4131_v27 }
0x1e0b   : > { %4138 = vrot.lane.b32.xlu0 %v7651_v56, %s7200_s19 }
0x1e0f   : > { %4217 = vrot.lane.b32.xlu0 %v7661_v58, %s8331_s17 }
0x1e7e   : > { %v4133_v13 = vpop.xlane.xlu0 %4132 }
0x1e7f   : > { %6824 = vrcp.f32 %v4133_v13 }
0x1e82   : > { %v4139_v14 = vpop.permute.xlu0 %4138 }
0x1e83   : > { %6468 = vmatpush3.msra.mxu1 %v4139_v14 }
0x1e84   : > { %6469 = vmatprep.subr.mxu1 %v7186_v9 }
0x1e85   : > { %6470 = vmatpush3.msra.mxu1 %v4137_v16 }
0x1e86   : > { %6474 = vmatprep.subr.mxu1 %v7186_v9  ;;  %v4218_v20 = vpop.permute.xlu0 %4217 }
0x1e8c   : > { %v6825_v17 = vpop.eup %6824 }
0x1e8d   : > { %v4135_v18 = vmul.f32 %v6825_v17, %v6823_v12  ;;  %v6007_v17 = vld [vmem:[#allocation14 + $0x4] ss:$0 sm:$0xff] }
0x1e8f   : > { %6472 = vmatmul.mubr.msk.f32.vlgmr.msra.gmra.mxu1 %vm1679_vm5, %v4135_v18 }
0x1e90   : > { %6475 = vmatpush3.xpose.msk.msra.mxu1 %vm1009_vm4, %v4220_v19  ;;  %6478 = vmatprep.mubr.msk.f32.mxu1 %vm7187_vm1, %v7186_v9  ;;  %v6008_v19 = vld [vmem:[#allocation16 + $0x4] ss:$0 sm:$0xff] }
0x1e91   : > { %6476 = vmatprep.subr.mxu1 %v7186_v9 }
0x1e94   : > { %6477 = vmatpush3.xpose.msk.msra.mxu1 %vm1009_vm4, %v4218_v20 }
0x1e95   : > { %6499 = vmatprep.subr.mxu1 %v7186_v9 }
0x1e97   : > { %6479 = vmatmul.mubr.msk.f32.vlgmr.msra.gmra.mxu1 %vm1009_vm4, %v4216_v21 }
0x1e98   : > { %6507 = vmatprep.mubr.msk.f32.mxu1 %vm7187_vm1, %v7186_v9  ;;  %6500 = vmatpush3.msra.mxu1 %v4531_v32 }
0x1e99   : > { %6501 = vmatprep.subr.mxu1 %v7186_v9 }
0x1e9a   : > { %6502 = vmatpush3.msra.mxu1 %v4530_v59 }
0x1e9b   : > { %6503 = vmatprep.subr.mxu1 %v7186_v9 }
0x1e9c   : > { %6504 = vmatpush3.msra.mxu1 %v4529_v61 }
0x1e9d   : > { %6505 = vmatprep.subr.mxu1 %v7186_v9 }
0x1e9e   : > { %6506 = vmatpush3.msra.mxu1 %v4528_v60 }
0x1e9f   : > { %6521 = vmatprep.subr.mxu1 %v7186_v9 }
0x1f4f   : > { %v4211_v4 = vpop.f32.mrf.mxu1 }
0x1f51   : > { %v6473_v22 = vpop.f32.mrf.mxu1 }
0x1f57   : > { %v4293_v23 = vpop.f32.mrf.mxu1 }
0x1f58   : > { %v4294_v25 = vadd.f32 %v6854_v24, %v4293_v23 }
0x1f59   : > { %v6480_v47 = vpop.f32.mrf.mxu1 }
0x1f5a   : > { %v4297_v26 = vsel %vm1679_vm5, %v4294_v25, -inf }
0x1f5b   : > { %4298 = vmax.xlane.f32.xlu0 %v4297_v26 }
0x1f71   : > { %4310 = vrot.lane.b32.xlu0 %v7651_v56, %s7199_s14  ;;  %v5964_v56 = vld [vmem:[#allocation10 + $0x1] ss:$0 sm:$0xff] }
0x1f72   : > { %v2681_v38 = vadd.f32 %v5964_v56, %v7860_v30  ;;  %v4406_v30 = vld [vmem:[#allocation8 + $0x78] sm:$0xff] }
0x1f74   : > { %v8028_v39 = vadd.f32 %v2681_v38, %v7667_v62  ;;  %v4405_v62 = vld [vmem:[#allocation8 + $0x70] sm:$0xff] }
0x1f75   : > { %4388 = vrot.lane.b32.xlu0 %v4039_v2, %s7199_s14 }
0x1f76   : > { %v4493_v40 = vsel %vm803_vm0, %v8028_v39, 0.0 }
0x1fe4   : > { %v4299_v28 = vpop.xlane.xlu0 %4298 }
0x1fe5   : > { %v4300_v29 = vsub.f32 %v4294_v25, %v4299_v28 }
0x1fe7   : > { %v4301_v31 = vmul.f32 1.442695, %v4300_v29 }
0x1fe8   : > { %v4311_v35 = vpop.permute.xlu0 %4310 }
0x1fe9   : > { %6826 = vpow2.f32 %v4301_v31  ;;  %6482 = vmatpush3.msra.mxu0 %v4311_v35 }
0x1fea   : > { %6483 = vmatprep.subr.mxu0 %v7186_v9 }
0x1fec   : > { %v4389_v15 = vpop.permute.xlu0 %4388 }
0x1fed   : > { %v4399_v63 = vsel %vm1009_vm4, %v7966_v44, %v4389_v15 }
0x1ff6   : > { %v6827_v36 = vpop.eup %6826 }
0x1ff7   : > { %v4303_v37 = vsel %vm1679_vm5, %v6827_v36, 0.0 }
0x1ff8   : > { %4304 = vadd.xlane.f32.xlu1 %v4303_v37 }
0x2009   : > { %4308 = vrot.lane.b32.xlu1 %v7661_v58, %s7199_s14 }
0x200d   : > { %4392 = vrot.lane.b32.xlu1 %v4211_v4, %s7200_s19  ;;  %v6005_v4 = vld [vmem:[#allocation10 + $0x3] ss:$0 sm:$0xff] }
0x2031   : > { %4494 = vadd.xlane.f32.xlu1 %v4493_v40 }
0x2042   : > { %4621 = vrot.lane.b32.xlu1 %v4530_v59, %s7189_s11 }
0x2046   : > { %4619 = vrot.lane.b32.xlu1 %v4529_v61, %s7189_s11 }
0x204a   : > { %4629 = vrot.lane.b32.xlu1 %v6009_v11, %s7189_s11 }
0x2081   : > { %v4305_v41 = vpop.xlane.xlu1 %4304 }
0x2082   : > { %6828 = vrcp.f32 %v4305_v41 }
0x2085   : > { %v4309_v42 = vpop.permute.xlu1 %4308 }
0x2086   : > { %6484 = vmatpush3.msra.mxu0 %v4309_v42 }
0x2087   : > { %6488 = vmatprep.subr.mxu0 %v7186_v9 }
0x2089   : > { %v4393_v50 = vpop.permute.xlu1 %4392 }
0x208a   : > { %v4400_v33 = vsel %vm1679_vm5, %v4399_v63, %v4393_v50 }
0x208f   : > { %v6829_v43 = vpop.eup %6828 }
0x2090   : > { %v4307_v58 = vmul.f32 %v6829_v43, %v6827_v36 }
0x2092   : > { %6486 = vmatmul.mubr.msk.f32.vlgmr.msra.gmra.mxu0 %vm1679_vm5, %v4307_v58 }
0x2093   : > { %6496 = vmatprep.mubr.msk.f32.mxu0 %vm7187_vm1, %v7186_v9  ;;  %6489 = vmatpush3.msra.mxu0 %v4406_v30 }
0x2094   : > { %6490 = vmatprep.subr.mxu0 %v7186_v9 }
0x2095   : > { %6491 = vmatpush3.msra.mxu0 %v4405_v62 }
0x2096   : > { %6492 = vmatprep.subr.mxu0 %v7186_v9 }
0x2097   : > { %6493 = vmatpush3.msra.mxu0 %v4404_v45 }
0x2098   : > { %6494 = vmatprep.subr.mxu0 %v7186_v9 }
0x2099   : > { %6495 = vmatpush3.msra.mxu0 %v4403_v46 }
0x209a   : > { %6510 = vmatprep.subr.mxu0 %v7186_v9 }
0x20ba   : > { %v4495_v51 = vpop.xlane.xlu1 %4494 }
0x20bb   : > { %v4496_v52 = vmul.f32 0.03125, %v4495_v51 }
0x20bd   : > { %v4497_v53 = vsub.f32 %v8028_v39, %v4496_v52 }
0x20be   : > { %v4622_v6 = vpop.permute.xlu1 %4621 }
0x20bf   : > { %v4498_v55 = vmul.f32 %v4497_v53, %v4497_v53 }
0x20c1   : > { %v4499_v57 = vsel %vm803_vm0, %v4498_v55, 0.0 }
0x20c2   : > { %v4620_v44 = vpop.permute.xlu1 %4619 }
0x20c6   : > { %v4630_v29 = vpop.permute.xlu1 %4629 }
0x2152   : > { %v4383_v48 = vpop.f32.mrf.mxu0 }
0x2153   : > { %4396 = vrot.lane.b32.xlu0 %v4383_v48, %s8327_s13 }
0x2154   : > { %v6487_v49 = vpop.f32.mrf.mxu0 }
0x2172   : > { %4500 = vadd.xlane.f32.xlu0 %v4499_v57 }
0x2188   : > { %4623 = vrot.lane.b32.xlu0 %v4531_v32, %s7189_s11 }
0x218c   : > { %4617 = vrot.lane.b32.xlu0 %v4528_v60, %s7189_s11 }
0x21c5   : > { %v4397_v1 = vpop.permute.xlu0 %4396 }
0x21c6   : > { %v4401_v2 = vsel %vm1681_vm6, %v4400_v33, %v4397_v1 }
0x21c7   : > { %6497 = vmatmul.mubr.msk.f32.vlgmr.msra.gmra.mxu0 %vm803_vm0, %v4401_v2 }
0x21c8   : > { %6518 = vmatprep.mubr.msk.f32.mxu0 %vm7187_vm1, %v7186_v9 }
0x21fb   : > { %v4501_v3 = vpop.xlane.xlu0 %4500 }
0x21fc   : > { %v4502_v0 = vmul.f32 0.032258064, %v4501_v3 }
0x21fe   : > { %6830 = vrsqrt.f32 %v4502_v0  ;;  %vm4505_vm13 = vcmp.eq.f32.partialorder %v4502_v0, inf  ;;  %v4508_v12 = vand.u32 2147483648, %v4502_v0  ;;  %vm4507_vm14 = vcmp.eq.f32.partialorder %v4502_v0, 0.0 }
0x21ff   : > { %v4624_v5 = vpop.permute.xlu0 %4623 }
0x2200   : > { %6511 = vmatpush3.msra.mxu0 %v4624_v5 }
0x2201   : > { %6512 = vmatprep.subr.mxu0 %v7186_v9 }
0x2202   : > { %6513 = vmatpush3.msra.mxu0 %v4622_v6 }
0x2203   : > { %6514 = vmatprep.subr.mxu0 %v7186_v9  ;;  %v4618_v7 = vpop.permute.xlu0 %4617 }
0x2204   : > { %6515 = vmatpush3.msra.mxu0 %v4620_v44 }
0x2205   : > { %6516 = vmatprep.subr.mxu0 %v7186_v9 }
0x2206   : > { %6517 = vmatpush3.msra.mxu0 %v4618_v7 }
0x2207   : > { %6531 = vmatprep.subr.mxu0 %v7186_v9 }
0x220b   : > { %v6831_v8 = vpop.eup %6830 }
0x220c   : > { %v4504_v10 = vmul.f32 %v6831_v8, %v4502_v0 }
0x220e   : > { %v4506_v27 = vsel %vm4505_vm13, %v4502_v0, %v4504_v10 }
0x220f   : > { %v4509_v13 = vsel %vm4507_vm14, %v4508_v12, %v4506_v27 }
0x2210   : > { %v4510_v14 = vadd.f32 1e-06, %v4509_v13 }
0x2212   : > { %6832 = vrcp.f32 %v4510_v14 }
0x221f   : > { %v6833_v16 = vpop.eup %6832 }
0x2220   : > { %v4512_v18 = vmul.f32 %v6833_v16, %v4497_v53 }
0x2222   : > { %v4519_v20 = vmul.f32 %v6007_v17, %v4512_v18 }
0x2224   : > { %v4526_v21 = vadd.f32 %v6008_v19, %v4519_v20 }
0x2226   : > { %6508 = vmatmul.mubr.msk.f32.vlgmr.msra.gmra.mxu1 %vm803_vm0, %v4526_v21 }
0x2227   : > { %6523 = vmatprep.mubr.msk.f32.mxu1 %vm7187_vm1, %v7186_v9 }
0x2287   : > { %v4484_v22 = vpop.f32.mrf.mxu0 }
0x2288   : > { %v4485_v23 = vadd.f32 %v6005_v4, %v4484_v22 }
0x2289   : > { %v6498_v24 = vpop.f32.mrf.mxu0 }
0x228a   : > { %v4488_v25 = vadd.f32 %v4485_v23, %v7914_v54 }
0x228c   : > { %6519 = vmatmul.mubr.msk.f32.vlgmr.msra.gmra.mxu0 %vm803_vm0, %v4488_v25 }
0x228d   : > { %6533 = vmatprep.mubr.msk.f32.mxu0 %vm7187_vm1, %v7186_v9 }
0x22e6   : > { %v4609_v47 = vpop.f32.mrf.mxu1 }
0x22e7   : > { %v4610_v26 = vadd.f32 %v6009_v11, %v4609_v47 }
0x22e8   : > { %v6509_v28 = vpop.f32.mrf.mxu1 }
0x22e9   : > { %4868 = vrot.lane.b32.xlu1 %v4610_v26, %s7188_s7 }
0x22ed   : > { %5033 = vrot.lane.b32.xlu1 %v4610_v26, %s7192_s18 }
0x22f1   : > { %5198 = vrot.lane.b32.xlu1 %v4610_v26, %s7194_s6 }
0x234c   : > { %v4701_v31 = vpop.f32.mrf.mxu0 }
0x234d   : > { %v8073_v35 = vadd.f32 %v4701_v31, %v4630_v29 }
0x234e   : > { %v6520_v36 = vpop.f32.mrf.mxu0 }
0x234f   : > { %4870 = vrot.lane.b32.xlu0 %v8073_v35, %s7188_s7  ;;  %6522 = vmatpush3.xpose.msk.msra.mxu1 %vm1009_vm4, %v8073_v35  ;;  %v5381_v36 = vld [vmem:[#allocation8 + $0x90] sm:$0xff] }
0x2350   : > { %6526 = vmatprep.subr.mxu1 %v7186_v9 }
0x2352   : > { %6524 = vmatmul.mubr.msk.f32.vlgmr.msra.gmra.mxu1 %vm1009_vm4, %v4610_v26 }
0x2353   : > { %5035 = vrot.lane.b32.xlu0 %v8073_v35, %s7192_s18  ;;  %6528 = vmatprep.mubr.msk.f32.mxu1 %vm7187_vm1, %v7186_v9 }
0x2357   : > { %5200 = vrot.lane.b32.xlu0 %v8073_v35, %s7194_s6 }
0x235b   : > { %v4869_v54 = vpop.permute.xlu1 %4868 }
0x235f   : > { %v5034_v38 = vpop.permute.xlu1 %5033 }
0x2363   : > { %v5199_v41 = vpop.permute.xlu1 %5198 }
0x23c1   : > { %v4871_v37 = vpop.permute.xlu0 %4870 }
0x23c2   : > { %6532 = vmatpush3.xpose.msk.msra.mxu0 %vm1009_vm4, %v4871_v37  ;;  %v5379_v37 = vld [vmem:[#allocation8 + $0x80] sm:$0xff] }
0x23c3   : > { %6541 = vmatprep.subr.mxu0 %v7186_v9 }
0x23c5   : > { %v5036_v56 = vpop.permute.xlu0 %5035  ;;  %6534 = vmatmul.mubr.msk.f32.vlgmr.msra.gmra.mxu0 %vm1009_vm4, %v4869_v54  ;;  %v5380_v54 = vld [vmem:[#allocation8 + $0x88] sm:$0xff] }
0x23c6   : > { %6542 = vmatpush3.xpose.msk.msra.mxu0 %vm1009_vm4, %v5036_v56  ;;  %6543 = vmatprep.mubr.msk.f32.mxu0 %vm7187_vm1, %v7186_v9 }
0x23c7   : > { %6551 = vmatprep.subr.mxu0 %v7186_v9 }
0x23c9   : > { %v5201_v40 = vpop.permute.xlu0 %5200  ;;  %6544 = vmatmul.mubr.msk.f32.vlgmr.msra.gmra.mxu0 %vm1009_vm4, %v5034_v38 }
0x23ca   : > { %6552 = vmatpush3.xpose.msk.msra.mxu0 %vm1009_vm4, %v5201_v40  ;;  %6553 = vmatprep.mubr.msk.f32.mxu0 %vm7187_vm1, %v7186_v9 }
0x23cb   : > { %6561 = vmatprep.subr.mxu0 %v7186_v9 }
0x23cd   : > { %6554 = vmatmul.mubr.msk.f32.vlgmr.msra.gmra.mxu0 %vm1009_vm4, %v5199_v41 }
0x23ce   : > { %6569 = vmatprep.mubr.msk.f32.mxu0 %vm7187_vm1, %v7186_v9 }
0x2412   : > { %v4777_v42 = vpop.f32.mrf.mxu1 }
0x2413   : > { %v4778_v43 = vadd.f32 %v7862_v34, %v4777_v42 }
0x2414   : > { %v6525_v58 = vpop.f32.mrf.mxu1 }
0x2415   : > { %v4781_v30 = vsel %vm1009_vm4, %v4778_v43, -inf }
0x2416   : > { %4782 = vmax.xlane.f32.xlu0 %v4781_v30 }
0x2485   : > { %v4942_v62 = vpop.f32.mrf.mxu0 }
0x2486   : > { %v4943_v45 = vadd.f32 %v7862_v34, %v4942_v62 }
0x2487   : > { %v6535_v46 = vpop.f32.mrf.mxu0 }
0x2488   : > { %v4946_v48 = vsel %vm1009_vm4, %v4943_v45, -inf }
0x2489   : > { %4947 = vmax.xlane.f32.xlu1 %v4946_v48  ;;  %v5107_v49 = vpop.f32.mrf.mxu0 }
0x248a   : > { %v5108_v50 = vadd.f32 %v7862_v34, %v5107_v49  ;;  %v6024_v49 = vld [vmem:[#allocation10 + $0x4] ss:$0 sm:$0xff] }
0x248b   : > { %v6545_v51 = vpop.f32.mrf.mxu0 }
0x248c   : > { %v5111_v52 = vsel %vm1009_vm4, %v5108_v50, -inf }
0x248d   : > { %v5272_v53 = vpop.f32.mrf.mxu0  ;;  %5112 = vmax.xlane.f32.xlu0 %v5111_v52 }
0x248e   : > { %v5273_v55 = vadd.f32 %v7862_v34, %v5272_v53 }
0x248f   : > { %v6555_v57 = vpop.f32.mrf.mxu0 }
0x2490   : > { %v5276_v32 = vsel %vm1009_vm4, %v5273_v55, -inf }
0x2491   : > { %5277 = vmax.xlane.f32.xlu0 %v5276_v32 }
0x249a   : > { %4792 = vrot.lane.b32.xlu1 %v8073_v35, %s7189_s11  ;;  %s8333_s11 = sld [smem:[#allocation31_spill]] }
0x249f   : > { %v4783_v59 = vpop.xlane.xlu0 %4782 }
0x24a0   : > { %v4784_v60 = vsub.f32 %v4778_v43, %v4783_v59 }
0x24a2   : > { %v4785_v61 = vmul.f32 1.442695, %v4784_v60 }
0x24a4   : > { %6834 = vpow2.f32 %v4785_v61 }
0x24b1   : > { %v6835_v15 = vpop.eup %6834 }
0x24b2   : > { %v4787_v63 = vsel %vm1009_vm4, %v6835_v15, 0.0 }
0x24be   : > { %4788 = vadd.xlane.f32.xlu1 %v4787_v63  ;;  %v5504_v63 = vld [vmem:[%s8333_s11 + $0x8] sm:$0xff] }
0x2512   : > { %v4948_v33 = vpop.xlane.xlu1 %4947 }
0x2513   : > { %v4949_v1 = vsub.f32 %v4943_v45, %v4948_v33  ;;  %v5503_v33 = vld [vmem:[%s8333_s11] sm:$0xff] }
0x2515   : > { %v4950_v2 = vmul.f32 1.442695, %v4949_v1  ;;  %v5595_v1 = vld [vmem:[%s8334_s26 + $0x38] sm:$0xff] }
0x2516   : > { %v4793_v3 = vpop.permute.xlu1 %4792  ;;  %v5113_v34 = vpop.xlane.xlu0 %5112 }
0x2517   : > { %6836 = vpow2.f32 %v4950_v2  ;;  %v5114_v0 = vsub.f32 %v5108_v50, %v5113_v34  ;;  %6527 = vmatpush3.msra.mxu1 %v4793_v3  ;;  %v5594_v2 = vld [vmem:[%s8334_s26 + $0x30] sm:$0xff]  ;;  %v5593_v3 = vld [vmem:[%s8334_s26 + $0x28] sm:$0xff]  ;;  %v5592_v34 = vld [vmem:[%s8334_s26 + $0x20] sm:$0xff] }
0x2518   : > { %6536 = vmatprep.subr.mxu1 %v7186_v9 }
0x2519   : > { %v5115_v5 = vmul.f32 1.442695, %v5114_v0  ;;  %v5591_v0 = vld [vmem:[%s8334_s26 + $0x18] sm:$0xff] }
0x251a   : > { %v5278_v6 = vpop.xlane.xlu0 %5277 }
0x251b   : > { %6838 = vpow2.f32 %v5115_v5  ;;  %v5279_v44 = vsub.f32 %v5273_v55, %v5278_v6 }
0x251d   : > { %v5280_v7 = vmul.f32 1.442695, %v5279_v44 }
0x251f   : > { %6840 = vpow2.f32 %v5280_v7 }
0x2524   : > { %v6837_v8 = vpop.eup %6836 }
0x2525   : > { %v4952_v10 = vsel %vm1009_vm4, %v6837_v8, 0.0 }
0x2526   : > { %4953 = vadd.xlane.f32.xlu0 %v4952_v10 }
0x2528   : > { %v6839_v11 = vpop.eup %6838 }
0x2529   : > { %v5117_v12 = vsel %vm1009_vm4, %v6839_v11, 0.0 }
0x252a   : > { %5118 = vadd.xlane.f32.xlu1 %v5117_v12 }
0x252c   : > { %v6841_v27 = vpop.eup %6840 }
0x252d   : > { %v5282_v13 = vsel %vm1009_vm4, %v6841_v27, 0.0 }
0x252e   : > { %5283 = vadd.xlane.f32.xlu0 %v5282_v13  ;;  %v6026_v13 = vld [vmem:[#allocation14 + $0x5] ss:$0 sm:$0xff] }
0x253b   : > { %5122 = vrot.lane.b32.xlu1 %v8073_v35, %s7191_s20 }
0x253f   : > { %5287 = vrot.lane.b32.xlu1 %v8073_v35, %s7193_s21  ;;  %s8336_s21 = sld [smem:[#allocation37_spill]] }
0x2544   : > { %4957 = vrot.lane.b32.xlu0 %v8073_v35, %s8328_s12  ;;  %v5382_v35 = vld [vmem:[#allocation8 + $0x98] sm:$0xff] }
0x2545   : > { %6562 = vmatpush3.msra.mxu0 %v5382_v35  ;;  %s5692_s6 = scalar_lea.hbm %s8336_s21, %s6033_s2 }
0x2546   : > { %6563 = vmatprep.subr.mxu0 %v7186_v9 }
0x2547   : > { %v4789_v14 = vpop.xlane.xlu1 %4788  ;;  %6564 = vmatpush3.msra.mxu0 %v5381_v36 }
0x2548   : > { %6842 = vrcp.f32 %v4789_v14  ;;  %6565 = vmatprep.subr.mxu0 %v7186_v9 }
0x2549   : > { %6566 = vmatpush3.msra.mxu0 %v5380_v54 }
0x254a   : > { %6567 = vmatprep.subr.mxu0 %v7186_v9 }
0x254b   : > { %6568 = vmatpush3.msra.mxu0 %v5379_v37 }
0x254c   : > { %6583 = vmatprep.subr.mxu0 %v7186_v9 }
0x2555   : > { %v6843_v16 = vpop.eup %6842 }
0x2556   : > { %v4791_v17 = vmul.f32 %v6843_v16, %v6835_v15  ;;  %v5506_v15 = vld [vmem:[%s8333_s11 + $0x18] sm:$0xff]  ;;  %v6027_v16 = vld [vmem:[#allocation16 + $0x5] ss:$0 sm:$0xff] }
0x2558   : > { %6529 = vmatmul.mubr.msk.f32.vlgmr.msra.gmra.mxu1 %vm1009_vm4, %v4791_v17 }
0x2559   : > { %6538 = vmatprep.mubr.msk.f32.mxu1 %vm7187_vm1, %v7186_v9 }
0x25af   : > { %v4954_v18 = vpop.xlane.xlu0 %4953 }
0x25b0   : > { %6844 = vrcp.f32 %v4954_v18 }
0x25b3   : > { %v5119_v19 = vpop.xlane.xlu1 %5118 }
0x25b4   : > { %6846 = vrcp.f32 %v5119_v19  ;;  %v5590_v19 = vld [vmem:[%s8334_s26 + $0x10] sm:$0xff] }
0x25b7   : > { %v5284_v20 = vpop.xlane.xlu0 %5283  ;;  %v5123_v22 = vpop.permute.xlu1 %5122 }
0x25b8   : > { %6848 = vrcp.f32 %v5284_v20  ;;  %v5589_v20 = vld [vmem:[%s8334_s26 + $0x8] sm:$0xff] }
0x25bb   : > { %v4958_v21 = vpop.permute.xlu0 %4957  ;;  %v5288_v47 = vpop.permute.xlu1 %5287 }
0x25bc   : > { %6537 = vmatpush3.msra.mxu1 %v4958_v21  ;;  %v5588_v21 = vld [vmem:[%s8334_s26] sm:$0xff] }
0x25bd   : > { %v6845_v4 = vpop.eup %6844  ;;  %6546 = vmatprep.subr.mxu1 %v7186_v9 }
0x25be   : > { %v4956_v23 = vmul.f32 %v6845_v4, %v6837_v8  ;;  %v6028_v4 = vld [vmem:[#allocation11] ss:$0 sm:$0xff] }
0x25c0   : > { %6539 = vmatmul.mubr.msk.f32.vlgmr.msra.gmra.mxu1 %vm1009_vm4, %v4956_v23 }
0x25c1   : > { %v6847_v24 = vpop.eup %6846  ;;  %6547 = vmatpush3.msra.mxu1 %v5123_v22  ;;  %6548 = vmatprep.mubr.msk.f32.mxu1 %vm7187_vm1, %v7186_v9 }
0x25c2   : > { %6556 = vmatprep.subr.mxu1 %v7186_v9  ;;  %v5121_v25 = vmul.f32 %v6847_v24, %v6839_v11 }
0x25c4   : > { %6549 = vmatmul.mubr.msk.f32.vlgmr.msra.gmra.mxu1 %vm1009_vm4, %v5121_v25 }
0x25c5   : > { %v6849_v26 = vpop.eup %6848  ;;  %6557 = vmatpush3.msra.mxu1 %v5288_v47  ;;  %6558 = vmatprep.mubr.msk.f32.mxu1 %vm7187_vm1, %v7186_v9 }
0x25c6   : > { %v5286_v28 = vmul.f32 %v6849_v26, %v6841_v27  ;;  %6572 = vmatprep.subr.mxu1 %v7186_v9  ;;  %v6031_v26 = vld [vmem:[#allocation13] ss:$0 sm:$0xff] }
0x25c8   : > { %6559 = vmatmul.mubr.msk.f32.vlgmr.msra.gmra.mxu1 %vm1009_vm4, %v5286_v28 }
0x25c9   : > { %6580 = vmatprep.mubr.msk.f32.mxu1 %vm7187_vm1, %v7186_v9  ;;  %6573 = vmatpush3.msra.mxu1 %v5506_v15 }
0x25ca   : > { %6574 = vmatprep.subr.mxu1 %v7186_v9 }
0x2618   : > { %v4864_v29 = vpop.f32.mrf.mxu1 }
0x261a   : > { %v6530_v31 = vpop.f32.mrf.mxu1 }
0x2680   : > { %v5029_v56 = vpop.f32.mrf.mxu1 }
0x2681   : > { %5364 = vrot.lane.b32.xlu0 %v5029_v56, %s7199_s14 }
0x2682   : > { %v6540_v38 = vpop.f32.mrf.mxu1 }
0x2684   : > { %v5194_v40 = vpop.f32.mrf.mxu1 }
0x2685   : > { %5368 = vrot.lane.b32.xlu1 %v5194_v40, %s7200_s19  ;;  %s765_s19 = scalar_lea.vmem [#allocation17], %s8335_s23 }
0x2686   : > { %v6550_v41 = vpop.f32.mrf.mxu1  ;;  %s5694_s7 = sshll.u32 %s765_s19, 4  ;;  %s5695_s7 = int_to_ptr.vmem [resolvable:$true] %s5694_s7 }
0x2687   : > { %s7091_s14 = scalar_lea.vmem %s5695_s7, 128 }
0x2688   : > { %v5359_v42 = vpop.f32.mrf.mxu1  ;;  %p7092_p0 = scmp.ne.s32.totalorder %s5695_s7, %s7091_s14 }
0x2689   : > { %5372 = vrot.lane.b32.xlu0 %v5359_v42, %s8327_s13  ;;  %s7095_s13 = sshll.u32 %s7203_s1, 4  ;;  %s7096_s13 = int_to_ptr.vmem [resolvable:$false] %s7095_s13 }
0x268a   : > { %v6560_v43 = vpop.f32.mrf.mxu1  ;;  %p7093_p9 = pnand %p7092_p0, %p8337_p4  ;;  %s7097_s12 = scalar_lea.vmem %s7096_s13, 256 }
0x268b   : > { %p7098_p1 = scmp.lt.s32.totalorder %s5695_s7, %s7096_s13  ;;  %p7099_p3 = scmp.lt.s32.totalorder %s7097_s12, %s7091_s14 }
0x268c   : > { %p7094_p10 = pneg %p7093_p9 }
0x268d   : > { %p7100_p6 = por %p7099_p3, %p7098_p1 }
0x268f   : > { %p7101_p2 = pnand %p7100_p6, %p7094_p10 }
0x26f3   : > { %v5365_v58 = vpop.permute.xlu0 %5364 }
0x26f4   : > { %v5375_v62 = vsel %vm1009_vm4, %v4864_v29, %v5365_v58 }
0x26f7   : > { %v5369_v30 = vpop.permute.xlu1 %5368 }
0x26f8   : > { %v5376_v45 = vsel %vm1679_vm5, %v5375_v62, %v5369_v30 }
0x26fb   : > { %v5373_v46 = vpop.permute.xlu0 %5372 }
0x26fc   : > { %v5377_v48 = vsel %vm1681_vm6, %v5376_v45, %v5373_v46 }
0x26fd   : > { %6570 = vmatmul.mubr.msk.f32.vlgmr.msra.gmra.mxu0 %vm803_vm0, %v5377_v48 }
0x26fe   : > { %6599 = vmatprep.mubr.msk.f32.mxu0 %vm7187_vm1, %v7186_v9  ;;  %6584 = vmatpush3.msra.mxu0 %v5595_v1 }
0x26ff   : > { %6585 = vmatprep.subr.mxu0 %v7186_v9 }
0x2700   : > { %6586 = vmatpush3.msra.mxu0 %v5594_v2 }
0x2701   : > { %6587 = vmatprep.subr.mxu0 %v7186_v9 }
0x2702   : > { %6588 = vmatpush3.msra.mxu0 %v5593_v3 }
0x2703   : > { %6589 = vmatprep.subr.mxu0 %v7186_v9 }
0x2704   : > { %6590 = vmatpush3.msra.mxu0 %v5592_v34 }
0x2705   : > { %6591 = vmatprep.subr.mxu0 %v7186_v9 }
0x2706   : > { %6592 = vmatpush3.msra.mxu0 %v5591_v0 }
0x2707   : > { %6593 = vmatprep.subr.mxu0 %v7186_v9 }
0x2708   : > { %6594 = vmatpush3.msra.mxu0 %v5590_v19 }
0x2709   : > { %6595 = vmatprep.subr.mxu0 %v7186_v9 }
0x270a   : > { %6596 = vmatpush3.msra.mxu0 %v5589_v20 }
0x270b   : > { %6597 = vmatprep.subr.mxu0 %v7186_v9 }
0x270c   : > { %6598 = vmatpush3.msra.mxu0 %v5588_v21 }
0x27bd   : > { %v5460_v50 = vpop.f32.mrf.mxu0 }
0x27be   : > { %v5461_v51 = vadd.f32 %v6024_v49, %v5460_v50 }
0x27bf   : > { %v6571_v52 = vpop.f32.mrf.mxu0 }
0x27c0   : > { %v8152_v53 = vadd.f32 %v5461_v51, %v8028_v39  ;;  %v5505_v39 = vld [vmem:[%s8333_s11 + $0x10] sm:$0xff] }
0x27c1   : > { %6575 = vmatpush3.msra.mxu1 %v5505_v39 }
0x27c2   : > { %v5469_v55 = vsel %vm803_vm0, %v8152_v53, 0.0  ;;  %6576 = vmatprep.subr.mxu1 %v7186_v9 }
0x27c3   : > { %5470 = vadd.xlane.f32.xlu1 %v5469_v55  ;;  %6577 = vmatpush3.msra.mxu1 %v5504_v63 }
0x27c4   : > { %6578 = vmatprep.subr.mxu1 %v7186_v9 }
0x27c5   : > { %6579 = vmatpush3.msra.mxu1 %v5503_v33 }
0x284c   : > { %v5471_v57 = vpop.xlane.xlu1 %5470 }
0x284d   : > { %v5472_v32 = vmul.f32 0.03125, %v5471_v57 }
0x284f   : > { %v5473_v59 = vsub.f32 %v8152_v53, %v5472_v32 }
0x2851   : > { %v5474_v60 = vmul.f32 %v5473_v59, %v5473_v59 }
0x2853   : > { %v5475_v61 = vsel %vm803_vm0, %v5474_v60, 0.0 }
0x2854   : > { %5476 = vadd.xlane.f32.xlu0 %v5475_v61 }
0x28dd   : > { %v5477_v5 = vpop.xlane.xlu0 %5476 }
0x28de   : > { %v5478_v6 = vmul.f32 0.032258064, %v5477_v5 }
0x28e0   : > { %6850 = vrsqrt.f32 %v5478_v6  ;;  %vm5481_vm15 = vcmp.eq.f32.partialorder %v5478_v6, inf  ;;  %v5484_v8 = vand.u32 2147483648, %v5478_v6  ;;  %vm5483_vm1 = vcmp.eq.f32.partialorder %v5478_v6, 0.0 }
0x28ed   : > { %v6851_v44 = vpop.eup %6850 }
0x28ee   : > { %v5480_v7 = vmul.f32 %v6851_v44, %v5478_v6 }
0x28f0   : > { %v5482_v10 = vsel %vm5481_vm15, %v5478_v6, %v5480_v7 }
0x28f1   : > { %v5485_v11 = vsel %vm5483_vm1, %v5484_v8, %v5482_v10 }
0x28f2   : > { %v5486_v12 = vadd.f32 1e-06, %v5485_v11 }
0x28f4   : > { %6852 = vrcp.f32 %v5486_v12 }
0x2901   : > { %v6853_v27 = vpop.eup %6852 }
0x2902   : > { %v5488_v14 = vmul.f32 %v6853_v27, %v5473_v59 }
0x2904   : > { %v5495_v17 = vmul.f32 %v6026_v13, %v5488_v14 }
0x2906   : > { %v5502_v18 = vadd.f32 %v6027_v16, %v5495_v17 }
0x2908   : > { %6581 = vmatmul.mubr.msk.f32.vlgmr.msra.gmra.mxu1 %vm803_vm0, %v5502_v18 }
0x29c8   : > { %v5583_v22 = vpop.f32.mrf.mxu1 }
0x29c9   : > { %v5584_v23 = vadd.f32 %v6028_v4, %v5583_v22 }
0x29ca   : > { %v6582_v24 = vpop.f32.mrf.mxu1 }
0x29cb   : > { %v5587_v25 = vmax.f32 %v5584_v23, 0.0 }
0x29cd   : > { %6600 = vmatmul.mubr.msk.f32.vlgmr.msra.gmra.mxu0 %vm5596_vm2, %v5587_v25 }
0x2a8d   : > { %v5666_v47 = vpop.f32.mrf.mxu0 }
0x2a8e   : > { %v5670_v28 = vadd.f32 %v5666_v47, %v8152_v53 }
0x2a8f   : > { %v6601_v29 = vpop.f32.mrf.mxu0 }
0x2a90   : > { %v5678_v9 = vadd.f32 %v6031_v26, %v5670_v28 }
0x2a92   : > { %5679 = vst.msk [vmem:[%s765_s19] sm:$0xff] %vm803_vm0, %v5678_v9 }
0x2a93   : > { %7104 = shalt.err (!%p7101_p2)
}
0x2a94   : > { %s7105_s17 = scalar_lea.hbm %s5692_s6, 128  ;;  %s7109_s23 = scalar_lea.hbm %s8336_s21, 256 }
0x2a95   : > { %p7106_p8 = scmp.ne.s32.totalorder %s5692_s6, %s7105_s17  ;;  %p7110_p12 = scmp.lt.s32.totalorder %s5692_s6, %s8336_s21 }
0x2a96   : > { %p7111_p11 = scmp.lt.s32.totalorder %s7109_s23, %s7105_s17 }
0x2a97   : > { %p7107_p5 = pnand %p7106_p8, %p8337_p4 }
0x2a98   : > { %p7112_p13 = por %p7111_p11, %p7110_p12 }
0x2a99   : > { %p7108_p7 = pneg %p7107_p5 }
0x2a9b   : > { %p7113_p0 = pnand %p7112_p13, %p7108_p7 }
0x2a9d   : > { %7116 = shalt.err (!%p7113_p0)
}
0x2a9e   : > { %6636 = dma.vmem_to_hbm [thread:$0]  (%p8337_p4), %s5695_s7, 128, %s5692_s6, %s5681_s16  }
0x2a9f PF: > { %s5706_s18 = sand.u32 1, %s7159_s27   ;;  %p8338_p9 = scmp.ne.s32.totalorder %s8312_s24, 0 }
0x2aa0   : > { %p8339_p10 = scmp.ge.s32.totalorder %s7171_s30, 2  ;;  %s5707_s14 = scalar_lea.sflag [#allocation4], %s5706_s18 }
0x2aa2   : > { %p6668_p1 = pnand %p8339_p10, %p8338_p9 }
0x2aa4   : > { %p6669_p3 = pneg %p6668_p1 }
0x2aa6   : > { %7154 = dma.done.wait (%p6669_p3), %s5707_s14, 128  }
0x2aa7   : > { %7156 = vsyncadd (%p6669_p3), %s5707_s14, 4294967168  ;;  %p35_p6 = scmp.ge.s32.totalorder %s7429_s25, 4   ;;  %s8340_s27 = smov %s7163_s28 }
0x2aa8   : > { %s8341_s28 = smov %s7167_s29  ;;  %s8342_s29 = smov %s7440_s10 }
0x2aa9   : > { %s8343_s30 = smov %s7429_s25  ;;  %37 = sbr.rel (!%p35_p6) target bundleno = 24 (0x18), region = 210 }
0x2aae   :  { %5712 = vsyncpa [#allocation3], 1 }
0x2aaf   :  { %5714 = vsyncpa [#allocation3 + $0x1], 1 }
0x2ab0   :  { %5715 = vsyncpa [#allocation6], 1 }
0x2ab1   :  { %5716 = vsyncpa [#allocation9], 1 }
0x2ab2   :  { %5717 = vsyncpa [#allocation12], 1 }
0x2ab3   :  { %5718 = vsyncpa [#allocation15], 1 }
0x2ab4   :  { %5719 = vsyncpa [#allocation4], 1 }
0x2ab5   :  { %5721 = vsyncpa [#allocation4 + $0x1], 1 }

</bundles_post_ra>
